<compile_context>
chip_gen: v6e
topology: v6e:2x2x1
jax: 0.10.0
libtpu: 0.0.40
codegen_flags: <defaults>
</compile_context>

<pallas_src>
import math

import jax
import jax.numpy as jnp
import numpy as np
from jax.experimental import pallas as pl
from jax.experimental.pallas import tpu as pltpu  # noqa: F401  (TPU backend)

# ---------------- config (small shapes consistent with the module) ----------
INPUT_RES = (16, 16)
PATCH = 4
NUM_CHANNELS = 3
EMBED_DIM = 32
NUM_HEADS = [2, 4]          # one transformer Block per entry
MLP_RATIO = 4
EPS = 1e-5                  # PyTorch LayerNorm default
BATCH = 2

PATCH_RES = (INPUT_RES[0] // PATCH, INPUT_RES[1] // PATCH)
NUM_PATCHES = PATCH_RES[0] * PATCH_RES[1]        # 16
PATCH_DIM = NUM_CHANNELS * PATCH * PATCH         # 48
OUT_PAD = 128                                    # lane-dense padded output width
HIDDEN = MLP_RATIO * EMBED_DIM                   # 128
NUM_BLOCKS = len(NUM_HEADS)
PER_BLOCK = 12                                   # kernel operands per block

_BLOCK_KEYS = ('ln1_g', 'ln1_b', 'w_qkv', 'b_qkv', 'wo', 'bo',
               'ln2_g', 'ln2_b', 'w1', 'b1', 'w2', 'b2')


# ---------------- shared math helpers (kernel + reference) ------------------
def _layernorm(x, g, b):
    mu = jnp.mean(x, axis=-1, keepdims=True)
    var = jnp.mean((x - mu) ** 2, axis=-1, keepdims=True)
    return (x - mu) * jax.lax.rsqrt(var + EPS) * g + b


def _gelu(x):
    # tanh-approx GELU (Block definition not given in the source)
    c = math.sqrt(2.0 / math.pi)
    return 0.5 * x * (1.0 + jnp.tanh(c * (x + 0.044715 * x * x * x)))


# ---------------- Pallas kernel ----------------------------------------------
def vit_decoder_kernel(*refs):
    x_ref, pos_ref = refs[0], refs[1]
    tail = 2 + NUM_BLOCKS * PER_BLOCK
    lnf_g_ref, lnf_b_ref, wp_ref, bp_ref = refs[tail:tail + 4]
    out_ref = refs[-1]

    B, N, D = x_ref.shape
    T = B * N

    # pos-embed add, then flatten batch x patches into one sublane-dense slab
    h = (x_ref[...] + pos_ref[...]).reshape(T, D)                   # (T, D)

    for blk, nh in enumerate(NUM_HEADS):                            # static unroll
        (ln1_g, ln1_b, w_qkv, b_qkv, wo, bo,
         ln2_g, ln2_b, w1, b1, w2, b2) = refs[2 + blk * PER_BLOCK:
                                              2 + (blk + 1) * PER_BLOCK]
        hd = D // nh

        # --- multi-head self-attention (fused QKV, softmax scale pre-folded) --
        y = _layernorm(h, ln1_g[...], ln1_b[...])
        qkv = jnp.dot(y, w_qkv[...],
                      preferred_element_type=jnp.float32) + b_qkv[...]
        qkv = qkv.reshape(B, N, 3 * D)                              # (B, N, 3D)
        wo_full = wo[...]                                           # (D, D)

        attn = jnp.zeros((T, D), jnp.float32)
        for hh in range(nh):                                        # static per-head
            q_h = qkv[:, :, hh * hd:(hh + 1) * hd]                  # (B, N, hd)
            k_h = qkv[:, :, D + hh * hd:D + (hh + 1) * hd]
            v_h = qkv[:, :, 2 * D + hh * hd:2 * D + (hh + 1) * hd]

            s = jnp.einsum('bqd,bkd->bqk', q_h, k_h,
                           preferred_element_type=jnp.float32)      # (B, N, N)
            s = s - jnp.max(s, axis=-1, keepdims=True)
            p = jnp.exp(s)
            denom = jnp.sum(p, axis=-1, keepdims=True)
            inv = pl.reciprocal(denom, approx=True)                 # EUP slot
            inv = inv * (2.0 - denom * inv)                         # Newton refine
            p = p * inv

            o_h = jnp.einsum('bqk,bkd->bqd', p, v_h,
                             preferred_element_type=jnp.float32)    # (B, N, hd)
            # project this head via a sublane slice of W_o and accumulate:
            # no lane-axis concat of head outputs.
            attn = attn + jnp.dot(o_h.reshape(T, hd),
                                  wo_full[hh * hd:(hh + 1) * hd, :],
                                  preferred_element_type=jnp.float32)
        h = h + attn + bo[...]

        # --- MLP --------------------------------------------------------------
        y = _layernorm(h, ln2_g[...], ln2_b[...])
        m = _gelu(jnp.dot(y, w1[...],
                          preferred_element_type=jnp.float32) + b1[...])
        m = jnp.dot(m, w2[...],
                    preferred_element_type=jnp.float32) + b2[...]
        h = h + m

    # --- post-net LayerNorm + PatchToImage linear (128-lane padded output) ---
    h = _layernorm(h, lnf_g_ref[...], lnf_b_ref[...])
    out_ref[...] = jnp.dot(h, wp_ref[...],
                           preferred_element_type=jnp.float32) + bp_ref[...]


# ---------------- cost estimate ----------------------------------------------
def _cost_estimate(batch, args, out_bytes):
    T = batch * NUM_PATCHES
    flops = 0
    trans = 0
    for nh in NUM_HEADS:
        flops += 2 * T * EMBED_DIM * (3 * EMBED_DIM)                    # fused QKV
        flops += 2 * 2 * batch * NUM_PATCHES * NUM_PATCHES * EMBED_DIM  # QK^T + PV
        flops += 2 * T * EMBED_DIM * EMBED_DIM                          # output proj
        flops += 2 * 2 * T * EMBED_DIM * HIDDEN                         # MLP
        trans += batch * NUM_PATCHES * NUM_PATCHES * nh                 # softmax exp
        trans += T * HIDDEN                                             # GELU tanh
        trans += 3 * T                                                  # rsqrt/recip
    flops += 2 * T * EMBED_DIM * OUT_PAD                                # final proj
    trans += T
    bytes_accessed = int(sum(a.size * a.dtype.itemsize for a in args)) + out_bytes
    return pl.CostEstimate(flops=flops, transcendentals=trans,
                           bytes_accessed=bytes_accessed)


# ---------------- wrapper -----------------------------------------------------
def _fold(tokens):
    """nn.Fold with stride == kernel_size: (B, L, C*p*p) -> (B, C, H, W)."""
    B = tokens.shape[0]
    pH, pW = PATCH_RES
    y = tokens.reshape(B, pH, pW, NUM_CHANNELS, PATCH, PATCH)
    return y.transpose(0, 3, 1, 4, 2, 5).reshape(B, NUM_CHANNELS, *INPUT_RES)


def prepare_kernel_params(p):
    """One-time transform of module-layout params into kernel-ready layout."""
    kp = {'pos': p['pos']}                                     # (1, N, D)
    blocks = []
    for blk, nh in enumerate(NUM_HEADS):
        hd = EMBED_DIM // nh
        scale = 1.0 / math.sqrt(hd)
        # fuse QKV and fold the attention scale into the Q weights/bias
        w_qkv = jnp.concatenate(
            [p['wq'][blk] * scale, p['wk'][blk], p['wv'][blk]], axis=1)   # (D, 3D)
        b_qkv = jnp.concatenate(
            [p['bq'][blk] * scale, p['bk'][blk], p['bv'][blk]])[None, :]  # (1, 3D)
        blocks.append(dict(
            ln1_g=p['ln1_g'][blk][None, :], ln1_b=p['ln1_b'][blk][None, :],
            w_qkv=w_qkv, b_qkv=b_qkv,
            wo=p['wo'][blk], bo=p['bo'][blk][None, :],
            ln2_g=p['ln2_g'][blk][None, :], ln2_b=p['ln2_b'][blk][None, :],
            w1=p['w1'][blk], b1=p['b1'][blk][None, :],
            w2=p['w2'][blk], b2=p['b2'][blk][None, :]))
    kp['blocks'] = blocks
    kp['lnf_g'] = p['lnf_g']
    kp['lnf_b'] = p['lnf_b']
    # pad PatchToImage weights to 128 output lanes (lane-dense stores)
    kp['wp'] = jnp.zeros((EMBED_DIM, OUT_PAD), jnp.float32).at[:, :PATCH_DIM].set(p['wp'])
    kp['bp'] = jnp.zeros((1, OUT_PAD), jnp.float32).at[:, :PATCH_DIM].set(p['bp'])
    return kp


def vit_decoder_forward(x, kp):
    B = x.shape[0]
    T = B * NUM_PATCHES

    args = [x, kp['pos']]
    for blk_params in kp['blocks']:
        args += [blk_params[k] for k in _BLOCK_KEYS]
    args += [kp['lnf_g'], kp['lnf_b'], kp['wp'], kp['bp']]

    cost = _cost_estimate(B, args, T * OUT_PAD * 4)

    # single invocation (no grid): the whole problem fits trivially in VMEM,
    # so there is no per-grid-step pipeline overhead or double-buffering.
    tokens = pl.pallas_call(
        vit_decoder_kernel,
        out_shape=jax.ShapeDtypeStruct((T, OUT_PAD), jnp.float32),
        cost_estimate=cost,
    )(*args)

    tokens = tokens[:, :PATCH_DIM].reshape(B, NUM_PATCHES, PATCH_DIM)
    return _fold(tokens)


# ---------------- pure-JAX reference (validates fusion/scaling/padding) -----
def reference_forward(x, params):
    def single(xs):
        h = xs + params['pos'][0]
        for blk, nh in enumerate(NUM_HEADS):
            hd = EMBED_DIM // nh
            scale = 1.0 / math.sqrt(hd)
            y = _layernorm(h, params['ln1_g'][blk], params['ln1_b'][blk])
            q = y @ params['wq'][blk] + params['bq'][blk]
            k = y @ params['wk'][blk] + params['bk'][blk]
            v = y @ params['wv'][blk] + params['bv'][blk]
            heads = []
            for hh in range(nh):
                sl = slice(hh * hd, (hh + 1) * hd)
                s = (q[:, sl] @ k[:, sl].T) * scale
                s = s - jnp.max(s, axis=-1, keepdims=True)
                p = jnp.exp(s)
                p = p / jnp.sum(p, axis=-1, keepdims=True)
                heads.append(p @ v[:, sl])
            attn = jnp.concatenate(heads, axis=-1) @ params['wo'][blk] + params['bo'][blk]
            h = h + attn
            y = _layernorm(h, params['ln2_g'][blk], params['ln2_b'][blk])
            m = _gelu(y @ params['w1'][blk] + params['b1'][blk])
            m = m @ params['w2'][blk] + params['b2'][blk]
            h = h + m
        h = _layernorm(h, params['lnf_g'][0], params['lnf_b'][0])
        return h @ params['wp'] + params['bp'][0]

    return _fold(jax.vmap(single)(x))


# ---------------- deterministic parameter init --------------------------------
def _xavier(key, fan_in, fan_out, shape):
    bound = math.sqrt(6.0 / (fan_in + fan_out))
    return jax.random.uniform(key, shape, jnp.float32, -bound, bound)


def init_params(key):
    keys = iter(jax.random.split(key, 64))
    nb, D = NUM_BLOCKS, EMBED_DIM
    p = {}
    # position embedding: randn * embed_dim**-0.5
    p['pos'] = jax.random.normal(next(keys), (1, NUM_PATCHES, D), jnp.float32) * D ** (-0.5)
    p['ln1_g'] = jnp.ones((nb, D), jnp.float32)
    p['ln1_b'] = jnp.zeros((nb, D), jnp.float32)
    p['ln2_g'] = jnp.ones((nb, D), jnp.float32)
    p['ln2_b'] = jnp.zeros((nb, D), jnp.float32)
    for name in ('wq', 'wk', 'wv', 'wo'):
        p[name] = jnp.stack([_xavier(next(keys), D, D, (D, D)) for _ in range(nb)])
    for name in ('bq', 'bk', 'bv', 'bo'):
        p[name] = jnp.zeros((nb, D), jnp.float32)
    p['w1'] = jnp.stack([_xavier(next(keys), D, HIDDEN, (D, HIDDEN)) for _ in range(nb)])
    p['b1'] = jnp.zeros((nb, HIDDEN), jnp.float32)
    p['w2'] = jnp.stack([_xavier(next(keys), HIDDEN, D, (HIDDEN, D)) for _ in range(nb)])
    p['b2'] = jnp.zeros((nb, D), jnp.float32)
    p['lnf_g'] = jnp.ones((1, D), jnp.float32)
    p['lnf_b'] = jnp.zeros((1, D), jnp.float32)
    p['wp'] = _xavier(next(keys), D, PATCH_DIM, (D, PATCH_DIM))
    p['bp'] = jnp.zeros((1, PATCH_DIM), jnp.float32)
    return p


if __name__ == "__main__":
    key = jax.random.PRNGKey(0)
    pkey, xkey = jax.random.split(key)
    params = init_params(pkey)
    kparams = prepare_kernel_params(params)      # one-time weight transform
    x = jax.random.normal(xkey, (BATCH, NUM_PATCHES, EMBED_DIM), jnp.float32)

    out = jax.jit(vit_decoder_forward)(x, kparams)
    out = jax.block_until_ready(out)

    assert out.shape == (BATCH, NUM_CHANNELS, INPUT_RES[0], INPUT_RES[1])
    ref = jax.block_until_ready(reference_forward(x, params))
    np.testing.assert_allclose(np.asarray(out), np.asarray(ref), rtol=1e-3, atol=1e-3)
    print("KERNEL_OK")
</pallas_src>

<mosaic_0001>
module attributes {stable_mosaic.version = 11 : i64} {
  func.func @vit_decoder_kernel(%arg0: memref<2x16x32xf32, #tpu.memory_space<vmem>>, %arg1: memref<1x16x32xf32, #tpu.memory_space<vmem>>, %arg2: memref<1x32xf32, #tpu.memory_space<vmem>>, %arg3: memref<1x32xf32, #tpu.memory_space<vmem>>, %arg4: memref<32x96xf32, #tpu.memory_space<vmem>>, %arg5: memref<1x96xf32, #tpu.memory_space<vmem>>, %arg6: memref<32x32xf32, #tpu.memory_space<vmem>>, %arg7: memref<1x32xf32, #tpu.memory_space<vmem>>, %arg8: memref<1x32xf32, #tpu.memory_space<vmem>>, %arg9: memref<1x32xf32, #tpu.memory_space<vmem>>, %arg10: memref<32x128xf32, #tpu.memory_space<vmem>>, %arg11: memref<1x128xf32, #tpu.memory_space<vmem>>, %arg12: memref<128x32xf32, #tpu.memory_space<vmem>>, %arg13: memref<1x32xf32, #tpu.memory_space<vmem>>, %arg14: memref<1x32xf32, #tpu.memory_space<vmem>>, %arg15: memref<1x32xf32, #tpu.memory_space<vmem>>, %arg16: memref<32x96xf32, #tpu.memory_space<vmem>>, %arg17: memref<1x96xf32, #tpu.memory_space<vmem>>, %arg18: memref<32x32xf32, #tpu.memory_space<vmem>>, %arg19: memref<1x32xf32, #tpu.memory_space<vmem>>, %arg20: memref<1x32xf32, #tpu.memory_space<vmem>>, %arg21: memref<1x32xf32, #tpu.memory_space<vmem>>, %arg22: memref<32x128xf32, #tpu.memory_space<vmem>>, %arg23: memref<1x128xf32, #tpu.memory_space<vmem>>, %arg24: memref<128x32xf32, #tpu.memory_space<vmem>>, %arg25: memref<1x32xf32, #tpu.memory_space<vmem>>, %arg26: memref<1x32xf32, #tpu.memory_space<vmem>>, %arg27: memref<1x32xf32, #tpu.memory_space<vmem>>, %arg28: memref<32x128xf32, #tpu.memory_space<vmem>>, %arg29: memref<1x128xf32, #tpu.memory_space<vmem>>, %arg30: memref<32x128xf32, #tpu.memory_space<vmem>>) attributes {dimension_semantics = [], scalar_prefetch = 0 : i64, scratch_operands = 0 : i64, tpu.core_type = #tpu.core_type<tc>} {
    %c0 = arith.constant 0 : index
    %c0_0 = arith.constant 0 : index
    %c0_1 = arith.constant 0 : index
    %0 = vector.load %arg0[%c0, %c0_0, %c0_1] : memref<2x16x32xf32, #tpu.memory_space<vmem>>, vector<2x16x32xf32>
    %c0_2 = arith.constant 0 : index
    %c0_3 = arith.constant 0 : index
    %c0_4 = arith.constant 0 : index
    %1 = vector.load %arg1[%c0_2, %c0_3, %c0_4] : memref<1x16x32xf32, #tpu.memory_space<vmem>>, vector<1x16x32xf32>
    %2 = vector.broadcast %1 : vector<1x16x32xf32> to vector<2x16x32xf32>
    %3 = arith.addf %0, %2 : vector<2x16x32xf32>
    %4 = vector.shape_cast %3 : vector<2x16x32xf32> to vector<32x32xf32>
    %c0_5 = arith.constant 0 : index
    %c0_6 = arith.constant 0 : index
    %5 = vector.load %arg2[%c0_5, %c0_6] : memref<1x32xf32, #tpu.memory_space<vmem>>, vector<1x32xf32>
    %c0_7 = arith.constant 0 : index
    %c0_8 = arith.constant 0 : index
    %6 = vector.load %arg3[%c0_7, %c0_8] : memref<1x32xf32, #tpu.memory_space<vmem>>, vector<1x32xf32>
    %cst = arith.constant dense<0.000000e+00> : vector<32xf32>
    %7 = vector.multi_reduction <add>, %4, %cst [1] : vector<32x32xf32> to vector<32xf32>
    %8 = vector.shape_cast %7 : vector<32xf32> to vector<32x1xf32>
    %cst_9 = arith.constant 3.200000e+01 : f32
    %9 = vector.broadcast %cst_9 : f32 to vector<32x1xf32>
    %10 = arith.divf %8, %9 : vector<32x1xf32>
    %11 = vector.broadcast %10 : vector<32x1xf32> to vector<32x32xf32>
    %12 = arith.subf %4, %11 : vector<32x32xf32>
    %13 = arith.mulf %12, %12 : vector<32x32xf32>
    %cst_10 = arith.constant dense<0.000000e+00> : vector<32xf32>
    %14 = vector.multi_reduction <add>, %13, %cst_10 [1] : vector<32x32xf32> to vector<32xf32>
    %15 = vector.shape_cast %14 : vector<32xf32> to vector<32x1xf32>
    %cst_11 = arith.constant 3.200000e+01 : f32
    %16 = vector.broadcast %cst_11 : f32 to vector<32x1xf32>
    %17 = arith.divf %15, %16 : vector<32x1xf32>
    %18 = vector.broadcast %10 : vector<32x1xf32> to vector<32x32xf32>
    %19 = arith.subf %4, %18 : vector<32x32xf32>
    %cst_12 = arith.constant 9.99999974E-6 : f32
    %20 = vector.broadcast %cst_12 : f32 to vector<32x1xf32>
    %21 = arith.addf %17, %20 : vector<32x1xf32>
    %22 = math.rsqrt %21 : vector<32x1xf32>
    %23 = vector.broadcast %22 : vector<32x1xf32> to vector<32x32xf32>
    %24 = arith.mulf %19, %23 : vector<32x32xf32>
    %25 = vector.broadcast %5 : vector<1x32xf32> to vector<32x32xf32>
    %26 = arith.mulf %24, %25 : vector<32x32xf32>
    %27 = vector.broadcast %6 : vector<1x32xf32> to vector<32x32xf32>
    %28 = arith.addf %26, %27 : vector<32x32xf32>
    %c0_13 = arith.constant 0 : index
    %c0_14 = arith.constant 0 : index
    %29 = vector.load %arg4[%c0_13, %c0_14] : memref<32x96xf32, #tpu.memory_space<vmem>>, vector<32x96xf32>
    %cst_15 = arith.constant dense<0.000000e+00> : vector<32x96xf32>
    %30 = tpu.matmul %28, %29, %cst_15 {dimension_numbers = #tpu.dot_dimension_numbers<[1], [0], [0], [1], [0, 0, 1, 1], [], []>} : vector<32x32xf32>, vector<32x96xf32>, vector<32x96xf32> -> vector<32x96xf32>
    %c0_16 = arith.constant 0 : index
    %c0_17 = arith.constant 0 : index
    %31 = vector.load %arg5[%c0_16, %c0_17] : memref<1x96xf32, #tpu.memory_space<vmem>>, vector<1x96xf32>
    %32 = vector.broadcast %31 : vector<1x96xf32> to vector<32x96xf32>
    %33 = arith.addf %30, %32 : vector<32x96xf32>
    %34 = vector.shape_cast %33 : vector<32x96xf32> to vector<2x16x96xf32>
    %c0_18 = arith.constant 0 : index
    %c0_19 = arith.constant 0 : index
    %35 = vector.load %arg6[%c0_18, %c0_19] : memref<32x32xf32, #tpu.memory_space<vmem>>, vector<32x32xf32>
    %cst_20 = arith.constant 0.000000e+00 : f32
    %36 = vector.broadcast %cst_20 : f32 to vector<32x32xf32>
    %37 = vector.extract_strided_slice %34 {offsets = [0, 0, 0], sizes = [2, 16, 16], strides = [1, 1, 1]} : vector<2x16x96xf32> to vector<2x16x16xf32>
    %38 = vector.extract_strided_slice %34 {offsets = [0, 0, 32], sizes = [2, 16, 16], strides = [1, 1, 1]} : vector<2x16x96xf32> to vector<2x16x16xf32>
    %39 = vector.extract_strided_slice %34 {offsets = [0, 0, 64], sizes = [2, 16, 16], strides = [1, 1, 1]} : vector<2x16x96xf32> to vector<2x16x16xf32>
    "tpu.trace_start"() <{level = 10 : i32, message = "bqd,bkd->bqk"}> : () -> ()
    %cst_21 = arith.constant dense<0.000000e+00> : vector<2x16x16xf32>
    %40 = tpu.matmul %37, %38, %cst_21 {dimension_numbers = #tpu.dot_dimension_numbers<[2], [2], [1], [1], [0, 0, 0, 1, 1, 1], [0], [0]>} : vector<2x16x16xf32>, vector<2x16x16xf32>, vector<2x16x16xf32> -> vector<2x16x16xf32>
    "tpu.trace_stop"() : () -> ()
    %cst_22 = arith.constant dense<0xFF800000> : vector<2x16xf32>
    %41 = vector.multi_reduction <maximumf>, %40, %cst_22 [2] : vector<2x16x16xf32> to vector<2x16xf32>
    %42 = vector.shape_cast %41 : vector<2x16xf32> to vector<2x16x1xf32>
    %43 = vector.broadcast %42 : vector<2x16x1xf32> to vector<2x16x16xf32>
    %44 = arith.subf %40, %43 : vector<2x16x16xf32>
    %45 = math.exp %44 : vector<2x16x16xf32>
    %cst_23 = arith.constant dense<0.000000e+00> : vector<2x16xf32>
    %46 = vector.multi_reduction <add>, %45, %cst_23 [2] : vector<2x16x16xf32> to vector<2x16xf32>
    %47 = vector.shape_cast %46 : vector<2x16xf32> to vector<2x16x1xf32>
    %48 = tpu.reciprocal %47 {approx = true} : vector<2x16x1xf32> -> vector<2x16x1xf32>
    %49 = arith.mulf %47, %48 : vector<2x16x1xf32>
    %cst_24 = arith.constant 2.000000e+00 : f32
    %50 = vector.broadcast %cst_24 : f32 to vector<2x16x1xf32>
    %51 = arith.subf %50, %49 : vector<2x16x1xf32>
    %52 = arith.mulf %48, %51 : vector<2x16x1xf32>
    %53 = vector.broadcast %52 : vector<2x16x1xf32> to vector<2x16x16xf32>
    %54 = arith.mulf %45, %53 : vector<2x16x16xf32>
    "tpu.trace_start"() <{level = 10 : i32, message = "bqk,bkd->bqd"}> : () -> ()
    %cst_25 = arith.constant dense<0.000000e+00> : vector<2x16x16xf32>
    %55 = tpu.matmul %54, %39, %cst_25 {dimension_numbers = #tpu.dot_dimension_numbers<[2], [1], [1], [2], [0, 0, 0, 1, 1, 2], [0], [0]>} : vector<2x16x16xf32>, vector<2x16x16xf32>, vector<2x16x16xf32> -> vector<2x16x16xf32>
    "tpu.trace_stop"() : () -> ()
    %56 = vector.shape_cast %55 : vector<2x16x16xf32> to vector<32x16xf32>
    %57 = vector.extract_strided_slice %35 {offsets = [0, 0], sizes = [16, 32], strides = [1, 1]} : vector<32x32xf32> to vector<16x32xf32>
    %cst_26 = arith.constant dense<0.000000e+00> : vector<32x32xf32>
    %58 = tpu.matmul %56, %57, %cst_26 {dimension_numbers = #tpu.dot_dimension_numbers<[1], [0], [0], [1], [0, 0, 1, 1], [], []>} : vector<32x16xf32>, vector<16x32xf32>, vector<32x32xf32> -> vector<32x32xf32>
    %59 = arith.addf %36, %58 : vector<32x32xf32>
    %60 = vector.extract_strided_slice %34 {offsets = [0, 0, 16], sizes = [2, 16, 16], strides = [1, 1, 1]} : vector<2x16x96xf32> to vector<2x16x16xf32>
    %61 = vector.extract_strided_slice %34 {offsets = [0, 0, 48], sizes = [2, 16, 16], strides = [1, 1, 1]} : vector<2x16x96xf32> to vector<2x16x16xf32>
    %62 = vector.extract_strided_slice %34 {offsets = [0, 0, 80], sizes = [2, 16, 16], strides = [1, 1, 1]} : vector<2x16x96xf32> to vector<2x16x16xf32>
    "tpu.trace_start"() <{level = 10 : i32, message = "bqd,bkd->bqk"}> : () -> ()
    %cst_27 = arith.constant dense<0.000000e+00> : vector<2x16x16xf32>
    %63 = tpu.matmul %60, %61, %cst_27 {dimension_numbers = #tpu.dot_dimension_numbers<[2], [2], [1], [1], [0, 0, 0, 1, 1, 1], [0], [0]>} : vector<2x16x16xf32>, vector<2x16x16xf32>, vector<2x16x16xf32> -> vector<2x16x16xf32>
    "tpu.trace_stop"() : () -> ()
    %cst_28 = arith.constant dense<0xFF800000> : vector<2x16xf32>
    %64 = vector.multi_reduction <maximumf>, %63, %cst_28 [2] : vector<2x16x16xf32> to vector<2x16xf32>
    %65 = vector.shape_cast %64 : vector<2x16xf32> to vector<2x16x1xf32>
    %66 = vector.broadcast %65 : vector<2x16x1xf32> to vector<2x16x16xf32>
    %67 = arith.subf %63, %66 : vector<2x16x16xf32>
    %68 = math.exp %67 : vector<2x16x16xf32>
    %cst_29 = arith.constant dense<0.000000e+00> : vector<2x16xf32>
    %69 = vector.multi_reduction <add>, %68, %cst_29 [2] : vector<2x16x16xf32> to vector<2x16xf32>
    %70 = vector.shape_cast %69 : vector<2x16xf32> to vector<2x16x1xf32>
    %71 = tpu.reciprocal %70 {approx = true} : vector<2x16x1xf32> -> vector<2x16x1xf32>
    %72 = arith.mulf %70, %71 : vector<2x16x1xf32>
    %cst_30 = arith.constant 2.000000e+00 : f32
    %73 = vector.broadcast %cst_30 : f32 to vector<2x16x1xf32>
    %74 = arith.subf %73, %72 : vector<2x16x1xf32>
    %75 = arith.mulf %71, %74 : vector<2x16x1xf32>
    %76 = vector.broadcast %75 : vector<2x16x1xf32> to vector<2x16x16xf32>
    %77 = arith.mulf %68, %76 : vector<2x16x16xf32>
    "tpu.trace_start"() <{level = 10 : i32, message = "bqk,bkd->bqd"}> : () -> ()
    %cst_31 = arith.constant dense<0.000000e+00> : vector<2x16x16xf32>
    %78 = tpu.matmul %77, %62, %cst_31 {dimension_numbers = #tpu.dot_dimension_numbers<[2], [1], [1], [2], [0, 0, 0, 1, 1, 2], [0], [0]>} : vector<2x16x16xf32>, vector<2x16x16xf32>, vector<2x16x16xf32> -> vector<2x16x16xf32>
    "tpu.trace_stop"() : () -> ()
    %79 = vector.shape_cast %78 : vector<2x16x16xf32> to vector<32x16xf32>
    %80 = vector.extract_strided_slice %35 {offsets = [16, 0], sizes = [16, 32], strides = [1, 1]} : vector<32x32xf32> to vector<16x32xf32>
    %cst_32 = arith.constant dense<0.000000e+00> : vector<32x32xf32>
    %81 = tpu.matmul %79, %80, %cst_32 {dimension_numbers = #tpu.dot_dimension_numbers<[1], [0], [0], [1], [0, 0, 1, 1], [], []>} : vector<32x16xf32>, vector<16x32xf32>, vector<32x32xf32> -> vector<32x32xf32>
    %82 = arith.addf %59, %81 : vector<32x32xf32>
    %83 = arith.addf %4, %82 : vector<32x32xf32>
    %c0_33 = arith.constant 0 : index
    %c0_34 = arith.constant 0 : index
    %84 = vector.load %arg7[%c0_33, %c0_34] : memref<1x32xf32, #tpu.memory_space<vmem>>, vector<1x32xf32>
    %85 = vector.broadcast %84 : vector<1x32xf32> to vector<32x32xf32>
    %86 = arith.addf %83, %85 : vector<32x32xf32>
    %c0_35 = arith.constant 0 : index
    %c0_36 = arith.constant 0 : index
    %87 = vector.load %arg8[%c0_35, %c0_36] : memref<1x32xf32, #tpu.memory_space<vmem>>, vector<1x32xf32>
    %c0_37 = arith.constant 0 : index
    %c0_38 = arith.constant 0 : index
    %88 = vector.load %arg9[%c0_37, %c0_38] : memref<1x32xf32, #tpu.memory_space<vmem>>, vector<1x32xf32>
    %cst_39 = arith.constant dense<0.000000e+00> : vector<32xf32>
    %89 = vector.multi_reduction <add>, %86, %cst_39 [1] : vector<32x32xf32> to vector<32xf32>
    %90 = vector.shape_cast %89 : vector<32xf32> to vector<32x1xf32>
    %cst_40 = arith.constant 3.200000e+01 : f32
    %91 = vector.broadcast %cst_40 : f32 to vector<32x1xf32>
    %92 = arith.divf %90, %91 : vector<32x1xf32>
    %93 = vector.broadcast %92 : vector<32x1xf32> to vector<32x32xf32>
    %94 = arith.subf %86, %93 : vector<32x32xf32>
    %95 = arith.mulf %94, %94 : vector<32x32xf32>
    %cst_41 = arith.constant dense<0.000000e+00> : vector<32xf32>
    %96 = vector.multi_reduction <add>, %95, %cst_41 [1] : vector<32x32xf32> to vector<32xf32>
    %97 = vector.shape_cast %96 : vector<32xf32> to vector<32x1xf32>
    %cst_42 = arith.constant 3.200000e+01 : f32
    %98 = vector.broadcast %cst_42 : f32 to vector<32x1xf32>
    %99 = arith.divf %97, %98 : vector<32x1xf32>
    %100 = vector.broadcast %92 : vector<32x1xf32> to vector<32x32xf32>
    %101 = arith.subf %86, %100 : vector<32x32xf32>
    %cst_43 = arith.constant 9.99999974E-6 : f32
    %102 = vector.broadcast %cst_43 : f32 to vector<32x1xf32>
    %103 = arith.addf %99, %102 : vector<32x1xf32>
    %104 = math.rsqrt %103 : vector<32x1xf32>
    %105 = vector.broadcast %104 : vector<32x1xf32> to vector<32x32xf32>
    %106 = arith.mulf %101, %105 : vector<32x32xf32>
    %107 = vector.broadcast %87 : vector<1x32xf32> to vector<32x32xf32>
    %108 = arith.mulf %106, %107 : vector<32x32xf32>
    %109 = vector.broadcast %88 : vector<1x32xf32> to vector<32x32xf32>
    %110 = arith.addf %108, %109 : vector<32x32xf32>
    %c0_44 = arith.constant 0 : index
    %c0_45 = arith.constant 0 : index
    %111 = vector.load %arg10[%c0_44, %c0_45] : memref<32x128xf32, #tpu.memory_space<vmem>>, vector<32x128xf32>
    %cst_46 = arith.constant dense<0.000000e+00> : vector<32x128xf32>
    %112 = tpu.matmul %110, %111, %cst_46 {dimension_numbers = #tpu.dot_dimension_numbers<[1], [0], [0], [1], [0, 0, 1, 1], [], []>} : vector<32x32xf32>, vector<32x128xf32>, vector<32x128xf32> -> vector<32x128xf32>
    %c0_47 = arith.constant 0 : index
    %c0_48 = arith.constant 0 : index
    %113 = vector.load %arg11[%c0_47, %c0_48] : memref<1x128xf32, #tpu.memory_space<vmem>>, vector<1x128xf32>
    %114 = vector.broadcast %113 : vector<1x128xf32> to vector<32x128xf32>
    %115 = arith.addf %112, %114 : vector<32x128xf32>
    %cst_49 = arith.constant 5.000000e-01 : f32
    %116 = vector.broadcast %cst_49 : f32 to vector<32x128xf32>
    %117 = arith.mulf %116, %115 : vector<32x128xf32>
    %cst_50 = arith.constant 4.471500e-02 : f32
    %118 = vector.broadcast %cst_50 : f32 to vector<32x128xf32>
    %119 = arith.mulf %118, %115 : vector<32x128xf32>
    %120 = arith.mulf %119, %115 : vector<32x128xf32>
    %121 = arith.mulf %120, %115 : vector<32x128xf32>
    %122 = arith.addf %115, %121 : vector<32x128xf32>
    %cst_51 = arith.constant 0.797884583 : f32
    %123 = vector.broadcast %cst_51 : f32 to vector<32x128xf32>
    %124 = arith.mulf %123, %122 : vector<32x128xf32>
    %125 = math.tanh %124 : vector<32x128xf32>
    %cst_52 = arith.constant 1.000000e+00 : f32
    %126 = vector.broadcast %cst_52 : f32 to vector<32x128xf32>
    %127 = arith.addf %126, %125 : vector<32x128xf32>
    %128 = arith.mulf %117, %127 : vector<32x128xf32>
    %c0_53 = arith.constant 0 : index
    %c0_54 = arith.constant 0 : index
    %129 = vector.load %arg12[%c0_53, %c0_54] : memref<128x32xf32, #tpu.memory_space<vmem>>, vector<128x32xf32>
    %cst_55 = arith.constant dense<0.000000e+00> : vector<32x32xf32>
    %130 = tpu.matmul %128, %129, %cst_55 {dimension_numbers = #tpu.dot_dimension_numbers<[1], [0], [0], [1], [0, 0, 1, 1], [], []>} : vector<32x128xf32>, vector<128x32xf32>, vector<32x32xf32> -> vector<32x32xf32>
    %c0_56 = arith.constant 0 : index
    %c0_57 = arith.constant 0 : index
    %131 = vector.load %arg13[%c0_56, %c0_57] : memref<1x32xf32, #tpu.memory_space<vmem>>, vector<1x32xf32>
    %132 = vector.broadcast %131 : vector<1x32xf32> to vector<32x32xf32>
    %133 = arith.addf %130, %132 : vector<32x32xf32>
    %134 = arith.addf %86, %133 : vector<32x32xf32>
    %c0_58 = arith.constant 0 : index
    %c0_59 = arith.constant 0 : index
    %135 = vector.load %arg14[%c0_58, %c0_59] : memref<1x32xf32, #tpu.memory_space<vmem>>, vector<1x32xf32>
    %c0_60 = arith.constant 0 : index
    %c0_61 = arith.constant 0 : index
    %136 = vector.load %arg15[%c0_60, %c0_61] : memref<1x32xf32, #tpu.memory_space<vmem>>, vector<1x32xf32>
    %cst_62 = arith.constant dense<0.000000e+00> : vector<32xf32>
    %137 = vector.multi_reduction <add>, %134, %cst_62 [1] : vector<32x32xf32> to vector<32xf32>
    %138 = vector.shape_cast %137 : vector<32xf32> to vector<32x1xf32>
    %cst_63 = arith.constant 3.200000e+01 : f32
    %139 = vector.broadcast %cst_63 : f32 to vector<32x1xf32>
    %140 = arith.divf %138, %139 : vector<32x1xf32>
    %141 = vector.broadcast %140 : vector<32x1xf32> to vector<32x32xf32>
    %142 = arith.subf %134, %141 : vector<32x32xf32>
    %143 = arith.mulf %142, %142 : vector<32x32xf32>
    %cst_64 = arith.constant dense<0.000000e+00> : vector<32xf32>
    %144 = vector.multi_reduction <add>, %143, %cst_64 [1] : vector<32x32xf32> to vector<32xf32>
    %145 = vector.shape_cast %144 : vector<32xf32> to vector<32x1xf32>
    %cst_65 = arith.constant 3.200000e+01 : f32
    %146 = vector.broadcast %cst_65 : f32 to vector<32x1xf32>
    %147 = arith.divf %145, %146 : vector<32x1xf32>
    %148 = vector.broadcast %140 : vector<32x1xf32> to vector<32x32xf32>
    %149 = arith.subf %134, %148 : vector<32x32xf32>
    %cst_66 = arith.constant 9.99999974E-6 : f32
    %150 = vector.broadcast %cst_66 : f32 to vector<32x1xf32>
    %151 = arith.addf %147, %150 : vector<32x1xf32>
    %152 = math.rsqrt %151 : vector<32x1xf32>
    %153 = vector.broadcast %152 : vector<32x1xf32> to vector<32x32xf32>
    %154 = arith.mulf %149, %153 : vector<32x32xf32>
    %155 = vector.broadcast %135 : vector<1x32xf32> to vector<32x32xf32>
    %156 = arith.mulf %154, %155 : vector<32x32xf32>
    %157 = vector.broadcast %136 : vector<1x32xf32> to vector<32x32xf32>
    %158 = arith.addf %156, %157 : vector<32x32xf32>
    %c0_67 = arith.constant 0 : index
    %c0_68 = arith.constant 0 : index
    %159 = vector.load %arg16[%c0_67, %c0_68] : memref<32x96xf32, #tpu.memory_space<vmem>>, vector<32x96xf32>
    %cst_69 = arith.constant dense<0.000000e+00> : vector<32x96xf32>
    %160 = tpu.matmul %158, %159, %cst_69 {dimension_numbers = #tpu.dot_dimension_numbers<[1], [0], [0], [1], [0, 0, 1, 1], [], []>} : vector<32x32xf32>, vector<32x96xf32>, vector<32x96xf32> -> vector<32x96xf32>
    %c0_70 = arith.constant 0 : index
    %c0_71 = arith.constant 0 : index
    %161 = vector.load %arg17[%c0_70, %c0_71] : memref<1x96xf32, #tpu.memory_space<vmem>>, vector<1x96xf32>
    %162 = vector.broadcast %161 : vector<1x96xf32> to vector<32x96xf32>
    %163 = arith.addf %160, %162 : vector<32x96xf32>
    %164 = vector.shape_cast %163 : vector<32x96xf32> to vector<2x16x96xf32>
    %c0_72 = arith.constant 0 : index
    %c0_73 = arith.constant 0 : index
    %165 = vector.load %arg18[%c0_72, %c0_73] : memref<32x32xf32, #tpu.memory_space<vmem>>, vector<32x32xf32>
    %cst_74 = arith.constant 0.000000e+00 : f32
    %166 = vector.broadcast %cst_74 : f32 to vector<32x32xf32>
    %167 = vector.extract_strided_slice %164 {offsets = [0, 0, 0], sizes = [2, 16, 8], strides = [1, 1, 1]} : vector<2x16x96xf32> to vector<2x16x8xf32>
    %168 = vector.extract_strided_slice %164 {offsets = [0, 0, 32], sizes = [2, 16, 8], strides = [1, 1, 1]} : vector<2x16x96xf32> to vector<2x16x8xf32>
    %169 = vector.extract_strided_slice %164 {offsets = [0, 0, 64], sizes = [2, 16, 8], strides = [1, 1, 1]} : vector<2x16x96xf32> to vector<2x16x8xf32>
    "tpu.trace_start"() <{level = 10 : i32, message = "bqd,bkd->bqk"}> : () -> ()
    %cst_75 = arith.constant dense<0.000000e+00> : vector<2x16x16xf32>
    %170 = tpu.matmul %167, %168, %cst_75 {dimension_numbers = #tpu.dot_dimension_numbers<[2], [2], [1], [1], [0, 0, 0, 1, 1, 1], [0], [0]>} : vector<2x16x8xf32>, vector<2x16x8xf32>, vector<2x16x16xf32> -> vector<2x16x16xf32>
    "tpu.trace_stop"() : () -> ()
    %cst_76 = arith.constant dense<0xFF800000> : vector<2x16xf32>
    %171 = vector.multi_reduction <maximumf>, %170, %cst_76 [2] : vector<2x16x16xf32> to vector<2x16xf32>
    %172 = vector.shape_cast %171 : vector<2x16xf32> to vector<2x16x1xf32>
    %173 = vector.broadcast %172 : vector<2x16x1xf32> to vector<2x16x16xf32>
    %174 = arith.subf %170, %173 : vector<2x16x16xf32>
    %175 = math.exp %174 : vector<2x16x16xf32>
    %cst_77 = arith.constant dense<0.000000e+00> : vector<2x16xf32>
    %176 = vector.multi_reduction <add>, %175, %cst_77 [2] : vector<2x16x16xf32> to vector<2x16xf32>
    %177 = vector.shape_cast %176 : vector<2x16xf32> to vector<2x16x1xf32>
    %178 = tpu.reciprocal %177 {approx = true} : vector<2x16x1xf32> -> vector<2x16x1xf32>
    %179 = arith.mulf %177, %178 : vector<2x16x1xf32>
    %cst_78 = arith.constant 2.000000e+00 : f32
    %180 = vector.broadcast %cst_78 : f32 to vector<2x16x1xf32>
    %181 = arith.subf %180, %179 : vector<2x16x1xf32>
    %182 = arith.mulf %178, %181 : vector<2x16x1xf32>
    %183 = vector.broadcast %182 : vector<2x16x1xf32> to vector<2x16x16xf32>
    %184 = arith.mulf %175, %183 : vector<2x16x16xf32>
    "tpu.trace_start"() <{level = 10 : i32, message = "bqk,bkd->bqd"}> : () -> ()
    %cst_79 = arith.constant dense<0.000000e+00> : vector<2x16x8xf32>
    %185 = tpu.matmul %184, %169, %cst_79 {dimension_numbers = #tpu.dot_dimension_numbers<[2], [1], [1], [2], [0, 0, 0, 1, 1, 2], [0], [0]>} : vector<2x16x16xf32>, vector<2x16x8xf32>, vector<2x16x8xf32> -> vector<2x16x8xf32>
    "tpu.trace_stop"() : () -> ()
    %186 = vector.shape_cast %185 : vector<2x16x8xf32> to vector<32x8xf32>
    %187 = vector.extract_strided_slice %165 {offsets = [0, 0], sizes = [8, 32], strides = [1, 1]} : vector<32x32xf32> to vector<8x32xf32>
    %cst_80 = arith.constant dense<0.000000e+00> : vector<32x32xf32>
    %188 = tpu.matmul %186, %187, %cst_80 {dimension_numbers = #tpu.dot_dimension_numbers<[1], [0], [0], [1], [0, 0, 1, 1], [], []>} : vector<32x8xf32>, vector<8x32xf32>, vector<32x32xf32> -> vector<32x32xf32>
    %189 = arith.addf %166, %188 : vector<32x32xf32>
    %190 = vector.extract_strided_slice %164 {offsets = [0, 0, 8], sizes = [2, 16, 8], strides = [1, 1, 1]} : vector<2x16x96xf32> to vector<2x16x8xf32>
    %191 = vector.extract_strided_slice %164 {offsets = [0, 0, 40], sizes = [2, 16, 8], strides = [1, 1, 1]} : vector<2x16x96xf32> to vector<2x16x8xf32>
    %192 = vector.extract_strided_slice %164 {offsets = [0, 0, 72], sizes = [2, 16, 8], strides = [1, 1, 1]} : vector<2x16x96xf32> to vector<2x16x8xf32>
    "tpu.trace_start"() <{level = 10 : i32, message = "bqd,bkd->bqk"}> : () -> ()
    %cst_81 = arith.constant dense<0.000000e+00> : vector<2x16x16xf32>
    %193 = tpu.matmul %190, %191, %cst_81 {dimension_numbers = #tpu.dot_dimension_numbers<[2], [2], [1], [1], [0, 0, 0, 1, 1, 1], [0], [0]>} : vector<2x16x8xf32>, vector<2x16x8xf32>, vector<2x16x16xf32> -> vector<2x16x16xf32>
    "tpu.trace_stop"() : () -> ()
    %cst_82 = arith.constant dense<0xFF800000> : vector<2x16xf32>
    %194 = vector.multi_reduction <maximumf>, %193, %cst_82 [2] : vector<2x16x16xf32> to vector<2x16xf32>
    %195 = vector.shape_cast %194 : vector<2x16xf32> to vector<2x16x1xf32>
    %196 = vector.broadcast %195 : vector<2x16x1xf32> to vector<2x16x16xf32>
    %197 = arith.subf %193, %196 : vector<2x16x16xf32>
    %198 = math.exp %197 : vector<2x16x16xf32>
    %cst_83 = arith.constant dense<0.000000e+00> : vector<2x16xf32>
    %199 = vector.multi_reduction <add>, %198, %cst_83 [2] : vector<2x16x16xf32> to vector<2x16xf32>
    %200 = vector.shape_cast %199 : vector<2x16xf32> to vector<2x16x1xf32>
    %201 = tpu.reciprocal %200 {approx = true} : vector<2x16x1xf32> -> vector<2x16x1xf32>
    %202 = arith.mulf %200, %201 : vector<2x16x1xf32>
    %cst_84 = arith.constant 2.000000e+00 : f32
    %203 = vector.broadcast %cst_84 : f32 to vector<2x16x1xf32>
    %204 = arith.subf %203, %202 : vector<2x16x1xf32>
    %205 = arith.mulf %201, %204 : vector<2x16x1xf32>
    %206 = vector.broadcast %205 : vector<2x16x1xf32> to vector<2x16x16xf32>
    %207 = arith.mulf %198, %206 : vector<2x16x16xf32>
    "tpu.trace_start"() <{level = 10 : i32, message = "bqk,bkd->bqd"}> : () -> ()
    %cst_85 = arith.constant dense<0.000000e+00> : vector<2x16x8xf32>
    %208 = tpu.matmul %207, %192, %cst_85 {dimension_numbers = #tpu.dot_dimension_numbers<[2], [1], [1], [2], [0, 0, 0, 1, 1, 2], [0], [0]>} : vector<2x16x16xf32>, vector<2x16x8xf32>, vector<2x16x8xf32> -> vector<2x16x8xf32>
    "tpu.trace_stop"() : () -> ()
    %209 = vector.shape_cast %208 : vector<2x16x8xf32> to vector<32x8xf32>
    %210 = vector.extract_strided_slice %165 {offsets = [8, 0], sizes = [8, 32], strides = [1, 1]} : vector<32x32xf32> to vector<8x32xf32>
    %cst_86 = arith.constant dense<0.000000e+00> : vector<32x32xf32>
    %211 = tpu.matmul %209, %210, %cst_86 {dimension_numbers = #tpu.dot_dimension_numbers<[1], [0], [0], [1], [0, 0, 1, 1], [], []>} : vector<32x8xf32>, vector<8x32xf32>, vector<32x32xf32> -> vector<32x32xf32>
    %212 = arith.addf %189, %211 : vector<32x32xf32>
    %213 = vector.extract_strided_slice %164 {offsets = [0, 0, 16], sizes = [2, 16, 8], strides = [1, 1, 1]} : vector<2x16x96xf32> to vector<2x16x8xf32>
    %214 = vector.extract_strided_slice %164 {offsets = [0, 0, 48], sizes = [2, 16, 8], strides = [1, 1, 1]} : vector<2x16x96xf32> to vector<2x16x8xf32>
    %215 = vector.extract_strided_slice %164 {offsets = [0, 0, 80], sizes = [2, 16, 8], strides = [1, 1, 1]} : vector<2x16x96xf32> to vector<2x16x8xf32>
    "tpu.trace_start"() <{level = 10 : i32, message = "bqd,bkd->bqk"}> : () -> ()
    %cst_87 = arith.constant dense<0.000000e+00> : vector<2x16x16xf32>
    %216 = tpu.matmul %213, %214, %cst_87 {dimension_numbers = #tpu.dot_dimension_numbers<[2], [2], [1], [1], [0, 0, 0, 1, 1, 1], [0], [0]>} : vector<2x16x8xf32>, vector<2x16x8xf32>, vector<2x16x16xf32> -> vector<2x16x16xf32>
    "tpu.trace_stop"() : () -> ()
    %cst_88 = arith.constant dense<0xFF800000> : vector<2x16xf32>
    %217 = vector.multi_reduction <maximumf>, %216, %cst_88 [2] : vector<2x16x16xf32> to vector<2x16xf32>
    %218 = vector.shape_cast %217 : vector<2x16xf32> to vector<2x16x1xf32>
    %219 = vector.broadcast %218 : vector<2x16x1xf32> to vector<2x16x16xf32>
    %220 = arith.subf %216, %219 : vector<2x16x16xf32>
    %221 = math.exp %220 : vector<2x16x16xf32>
    %cst_89 = arith.constant dense<0.000000e+00> : vector<2x16xf32>
    %222 = vector.multi_reduction <add>, %221, %cst_89 [2] : vector<2x16x16xf32> to vector<2x16xf32>
    %223 = vector.shape_cast %222 : vector<2x16xf32> to vector<2x16x1xf32>
    %224 = tpu.reciprocal %223 {approx = true} : vector<2x16x1xf32> -> vector<2x16x1xf32>
    %225 = arith.mulf %223, %224 : vector<2x16x1xf32>
    %cst_90 = arith.constant 2.000000e+00 : f32
    %226 = vector.broadcast %cst_90 : f32 to vector<2x16x1xf32>
    %227 = arith.subf %226, %225 : vector<2x16x1xf32>
    %228 = arith.mulf %224, %227 : vector<2x16x1xf32>
    %229 = vector.broadcast %228 : vector<2x16x1xf32> to vector<2x16x16xf32>
    %230 = arith.mulf %221, %229 : vector<2x16x16xf32>
    "tpu.trace_start"() <{level = 10 : i32, message = "bqk,bkd->bqd"}> : () -> ()
    %cst_91 = arith.constant dense<0.000000e+00> : vector<2x16x8xf32>
    %231 = tpu.matmul %230, %215, %cst_91 {dimension_numbers = #tpu.dot_dimension_numbers<[2], [1], [1], [2], [0, 0, 0, 1, 1, 2], [0], [0]>} : vector<2x16x16xf32>, vector<2x16x8xf32>, vector<2x16x8xf32> -> vector<2x16x8xf32>
    "tpu.trace_stop"() : () -> ()
    %232 = vector.shape_cast %231 : vector<2x16x8xf32> to vector<32x8xf32>
    %233 = vector.extract_strided_slice %165 {offsets = [16, 0], sizes = [8, 32], strides = [1, 1]} : vector<32x32xf32> to vector<8x32xf32>
    %cst_92 = arith.constant dense<0.000000e+00> : vector<32x32xf32>
    %234 = tpu.matmul %232, %233, %cst_92 {dimension_numbers = #tpu.dot_dimension_numbers<[1], [0], [0], [1], [0, 0, 1, 1], [], []>} : vector<32x8xf32>, vector<8x32xf32>, vector<32x32xf32> -> vector<32x32xf32>
    %235 = arith.addf %212, %234 : vector<32x32xf32>
    %236 = vector.extract_strided_slice %164 {offsets = [0, 0, 24], sizes = [2, 16, 8], strides = [1, 1, 1]} : vector<2x16x96xf32> to vector<2x16x8xf32>
    %237 = vector.extract_strided_slice %164 {offsets = [0, 0, 56], sizes = [2, 16, 8], strides = [1, 1, 1]} : vector<2x16x96xf32> to vector<2x16x8xf32>
    %238 = vector.extract_strided_slice %164 {offsets = [0, 0, 88], sizes = [2, 16, 8], strides = [1, 1, 1]} : vector<2x16x96xf32> to vector<2x16x8xf32>
    "tpu.trace_start"() <{level = 10 : i32, message = "bqd,bkd->bqk"}> : () -> ()
    %cst_93 = arith.constant dense<0.000000e+00> : vector<2x16x16xf32>
    %239 = tpu.matmul %236, %237, %cst_93 {dimension_numbers = #tpu.dot_dimension_numbers<[2], [2], [1], [1], [0, 0, 0, 1, 1, 1], [0], [0]>} : vector<2x16x8xf32>, vector<2x16x8xf32>, vector<2x16x16xf32> -> vector<2x16x16xf32>
    "tpu.trace_stop"() : () -> ()
    %cst_94 = arith.constant dense<0xFF800000> : vector<2x16xf32>
    %240 = vector.multi_reduction <maximumf>, %239, %cst_94 [2] : vector<2x16x16xf32> to vector<2x16xf32>
    %241 = vector.shape_cast %240 : vector<2x16xf32> to vector<2x16x1xf32>
    %242 = vector.broadcast %241 : vector<2x16x1xf32> to vector<2x16x16xf32>
    %243 = arith.subf %239, %242 : vector<2x16x16xf32>
    %244 = math.exp %243 : vector<2x16x16xf32>
    %cst_95 = arith.constant dense<0.000000e+00> : vector<2x16xf32>
    %245 = vector.multi_reduction <add>, %244, %cst_95 [2] : vector<2x16x16xf32> to vector<2x16xf32>
    %246 = vector.shape_cast %245 : vector<2x16xf32> to vector<2x16x1xf32>
    %247 = tpu.reciprocal %246 {approx = true} : vector<2x16x1xf32> -> vector<2x16x1xf32>
    %248 = arith.mulf %246, %247 : vector<2x16x1xf32>
    %cst_96 = arith.constant 2.000000e+00 : f32
    %249 = vector.broadcast %cst_96 : f32 to vector<2x16x1xf32>
    %250 = arith.subf %249, %248 : vector<2x16x1xf32>
    %251 = arith.mulf %247, %250 : vector<2x16x1xf32>
    %252 = vector.broadcast %251 : vector<2x16x1xf32> to vector<2x16x16xf32>
    %253 = arith.mulf %244, %252 : vector<2x16x16xf32>
    "tpu.trace_start"() <{level = 10 : i32, message = "bqk,bkd->bqd"}> : () -> ()
    %cst_97 = arith.constant dense<0.000000e+00> : vector<2x16x8xf32>
    %254 = tpu.matmul %253, %238, %cst_97 {dimension_numbers = #tpu.dot_dimension_numbers<[2], [1], [1], [2], [0, 0, 0, 1, 1, 2], [0], [0]>} : vector<2x16x16xf32>, vector<2x16x8xf32>, vector<2x16x8xf32> -> vector<2x16x8xf32>
    "tpu.trace_stop"() : () -> ()
    %255 = vector.shape_cast %254 : vector<2x16x8xf32> to vector<32x8xf32>
    %256 = vector.extract_strided_slice %165 {offsets = [24, 0], sizes = [8, 32], strides = [1, 1]} : vector<32x32xf32> to vector<8x32xf32>
    %cst_98 = arith.constant dense<0.000000e+00> : vector<32x32xf32>
    %257 = tpu.matmul %255, %256, %cst_98 {dimension_numbers = #tpu.dot_dimension_numbers<[1], [0], [0], [1], [0, 0, 1, 1], [], []>} : vector<32x8xf32>, vector<8x32xf32>, vector<32x32xf32> -> vector<32x32xf32>
    %258 = arith.addf %235, %257 : vector<32x32xf32>
    %259 = arith.addf %134, %258 : vector<32x32xf32>
    %c0_99 = arith.constant 0 : index
    %c0_100 = arith.constant 0 : index
    %260 = vector.load %arg19[%c0_99, %c0_100] : memref<1x32xf32, #tpu.memory_space<vmem>>, vector<1x32xf32>
    %261 = vector.broadcast %260 : vector<1x32xf32> to vector<32x32xf32>
    %262 = arith.addf %259, %261 : vector<32x32xf32>
    %c0_101 = arith.constant 0 : index
    %c0_102 = arith.constant 0 : index
    %263 = vector.load %arg20[%c0_101, %c0_102] : memref<1x32xf32, #tpu.memory_space<vmem>>, vector<1x32xf32>
    %c0_103 = arith.constant 0 : index
    %c0_104 = arith.constant 0 : index
    %264 = vector.load %arg21[%c0_103, %c0_104] : memref<1x32xf32, #tpu.memory_space<vmem>>, vector<1x32xf32>
    %cst_105 = arith.constant dense<0.000000e+00> : vector<32xf32>
    %265 = vector.multi_reduction <add>, %262, %cst_105 [1] : vector<32x32xf32> to vector<32xf32>
    %266 = vector.shape_cast %265 : vector<32xf32> to vector<32x1xf32>
    %cst_106 = arith.constant 3.200000e+01 : f32
    %267 = vector.broadcast %cst_106 : f32 to vector<32x1xf32>
    %268 = arith.divf %266, %267 : vector<32x1xf32>
    %269 = vector.broadcast %268 : vector<32x1xf32> to vector<32x32xf32>
    %270 = arith.subf %262, %269 : vector<32x32xf32>
    %271 = arith.mulf %270, %270 : vector<32x32xf32>
    %cst_107 = arith.constant dense<0.000000e+00> : vector<32xf32>
    %272 = vector.multi_reduction <add>, %271, %cst_107 [1] : vector<32x32xf32> to vector<32xf32>
    %273 = vector.shape_cast %272 : vector<32xf32> to vector<32x1xf32>
    %cst_108 = arith.constant 3.200000e+01 : f32
    %274 = vector.broadcast %cst_108 : f32 to vector<32x1xf32>
    %275 = arith.divf %273, %274 : vector<32x1xf32>
    %276 = vector.broadcast %268 : vector<32x1xf32> to vector<32x32xf32>
    %277 = arith.subf %262, %276 : vector<32x32xf32>
    %cst_109 = arith.constant 9.99999974E-6 : f32
    %278 = vector.broadcast %cst_109 : f32 to vector<32x1xf32>
    %279 = arith.addf %275, %278 : vector<32x1xf32>
    %280 = math.rsqrt %279 : vector<32x1xf32>
    %281 = vector.broadcast %280 : vector<32x1xf32> to vector<32x32xf32>
    %282 = arith.mulf %277, %281 : vector<32x32xf32>
    %283 = vector.broadcast %263 : vector<1x32xf32> to vector<32x32xf32>
    %284 = arith.mulf %282, %283 : vector<32x32xf32>
    %285 = vector.broadcast %264 : vector<1x32xf32> to vector<32x32xf32>
    %286 = arith.addf %284, %285 : vector<32x32xf32>
    %c0_110 = arith.constant 0 : index
    %c0_111 = arith.constant 0 : index
    %287 = vector.load %arg22[%c0_110, %c0_111] : memref<32x128xf32, #tpu.memory_space<vmem>>, vector<32x128xf32>
    %cst_112 = arith.constant dense<0.000000e+00> : vector<32x128xf32>
    %288 = tpu.matmul %286, %287, %cst_112 {dimension_numbers = #tpu.dot_dimension_numbers<[1], [0], [0], [1], [0, 0, 1, 1], [], []>} : vector<32x32xf32>, vector<32x128xf32>, vector<32x128xf32> -> vector<32x128xf32>
    %c0_113 = arith.constant 0 : index
    %c0_114 = arith.constant 0 : index
    %289 = vector.load %arg23[%c0_113, %c0_114] : memref<1x128xf32, #tpu.memory_space<vmem>>, vector<1x128xf32>
    %290 = vector.broadcast %289 : vector<1x128xf32> to vector<32x128xf32>
    %291 = arith.addf %288, %290 : vector<32x128xf32>
    %cst_115 = arith.constant 5.000000e-01 : f32
    %292 = vector.broadcast %cst_115 : f32 to vector<32x128xf32>
    %293 = arith.mulf %292, %291 : vector<32x128xf32>
    %cst_116 = arith.constant 4.471500e-02 : f32
    %294 = vector.broadcast %cst_116 : f32 to vector<32x128xf32>
    %295 = arith.mulf %294, %291 : vector<32x128xf32>
    %296 = arith.mulf %295, %291 : vector<32x128xf32>
    %297 = arith.mulf %296, %291 : vector<32x128xf32>
    %298 = arith.addf %291, %297 : vector<32x128xf32>
    %cst_117 = arith.constant 0.797884583 : f32
    %299 = vector.broadcast %cst_117 : f32 to vector<32x128xf32>
    %300 = arith.mulf %299, %298 : vector<32x128xf32>
    %301 = math.tanh %300 : vector<32x128xf32>
    %cst_118 = arith.constant 1.000000e+00 : f32
    %302 = vector.broadcast %cst_118 : f32 to vector<32x128xf32>
    %303 = arith.addf %302, %301 : vector<32x128xf32>
    %304 = arith.mulf %293, %303 : vector<32x128xf32>
    %c0_119 = arith.constant 0 : index
    %c0_120 = arith.constant 0 : index
    %305 = vector.load %arg24[%c0_119, %c0_120] : memref<128x32xf32, #tpu.memory_space<vmem>>, vector<128x32xf32>
    %cst_121 = arith.constant dense<0.000000e+00> : vector<32x32xf32>
    %306 = tpu.matmul %304, %305, %cst_121 {dimension_numbers = #tpu.dot_dimension_numbers<[1], [0], [0], [1], [0, 0, 1, 1], [], []>} : vector<32x128xf32>, vector<128x32xf32>, vector<32x32xf32> -> vector<32x32xf32>
    %c0_122 = arith.constant 0 : index
    %c0_123 = arith.constant 0 : index
    %307 = vector.load %arg25[%c0_122, %c0_123] : memref<1x32xf32, #tpu.memory_space<vmem>>, vector<1x32xf32>
    %308 = vector.broadcast %307 : vector<1x32xf32> to vector<32x32xf32>
    %309 = arith.addf %306, %308 : vector<32x32xf32>
    %310 = arith.addf %262, %309 : vector<32x32xf32>
    %c0_124 = arith.constant 0 : index
    %c0_125 = arith.constant 0 : index
    %311 = vector.load %arg26[%c0_124, %c0_125] : memref<1x32xf32, #tpu.memory_space<vmem>>, vector<1x32xf32>
    %c0_126 = arith.constant 0 : index
    %c0_127 = arith.constant 0 : index
    %312 = vector.load %arg27[%c0_126, %c0_127] : memref<1x32xf32, #tpu.memory_space<vmem>>, vector<1x32xf32>
    %cst_128 = arith.constant dense<0.000000e+00> : vector<32xf32>
    %313 = vector.multi_reduction <add>, %310, %cst_128 [1] : vector<32x32xf32> to vector<32xf32>
    %314 = vector.shape_cast %313 : vector<32xf32> to vector<32x1xf32>
    %cst_129 = arith.constant 3.200000e+01 : f32
    %315 = vector.broadcast %cst_129 : f32 to vector<32x1xf32>
    %316 = arith.divf %314, %315 : vector<32x1xf32>
    %317 = vector.broadcast %316 : vector<32x1xf32> to vector<32x32xf32>
    %318 = arith.subf %310, %317 : vector<32x32xf32>
    %319 = arith.mulf %318, %318 : vector<32x32xf32>
    %cst_130 = arith.constant dense<0.000000e+00> : vector<32xf32>
    %320 = vector.multi_reduction <add>, %319, %cst_130 [1] : vector<32x32xf32> to vector<32xf32>
    %321 = vector.shape_cast %320 : vector<32xf32> to vector<32x1xf32>
    %cst_131 = arith.constant 3.200000e+01 : f32
    %322 = vector.broadcast %cst_131 : f32 to vector<32x1xf32>
    %323 = arith.divf %321, %322 : vector<32x1xf32>
    %324 = vector.broadcast %316 : vector<32x1xf32> to vector<32x32xf32>
    %325 = arith.subf %310, %324 : vector<32x32xf32>
    %cst_132 = arith.constant 9.99999974E-6 : f32
    %326 = vector.broadcast %cst_132 : f32 to vector<32x1xf32>
    %327 = arith.addf %323, %326 : vector<32x1xf32>
    %328 = math.rsqrt %327 : vector<32x1xf32>
    %329 = vector.broadcast %328 : vector<32x1xf32> to vector<32x32xf32>
    %330 = arith.mulf %325, %329 : vector<32x32xf32>
    %331 = vector.broadcast %311 : vector<1x32xf32> to vector<32x32xf32>
    %332 = arith.mulf %330, %331 : vector<32x32xf32>
    %333 = vector.broadcast %312 : vector<1x32xf32> to vector<32x32xf32>
    %334 = arith.addf %332, %333 : vector<32x32xf32>
    %c0_133 = arith.constant 0 : index
    %c0_134 = arith.constant 0 : index
    %335 = vector.load %arg28[%c0_133, %c0_134] : memref<32x128xf32, #tpu.memory_space<vmem>>, vector<32x128xf32>
    %cst_135 = arith.constant dense<0.000000e+00> : vector<32x128xf32>
    %336 = tpu.matmul %334, %335, %cst_135 {dimension_numbers = #tpu.dot_dimension_numbers<[1], [0], [0], [1], [0, 0, 1, 1], [], []>} : vector<32x32xf32>, vector<32x128xf32>, vector<32x128xf32> -> vector<32x128xf32>
    %c0_136 = arith.constant 0 : index
    %c0_137 = arith.constant 0 : index
    %337 = vector.load %arg29[%c0_136, %c0_137] : memref<1x128xf32, #tpu.memory_space<vmem>>, vector<1x128xf32>
    %338 = vector.broadcast %337 : vector<1x128xf32> to vector<32x128xf32>
    %339 = arith.addf %336, %338 : vector<32x128xf32>
    %c0_138 = arith.constant 0 : index
    %c0_139 = arith.constant 0 : index
    %340 = vector.load %arg30[%c0_138, %c0_139] : memref<32x128xf32, #tpu.memory_space<vmem>>, vector<32x128xf32>
    tpu.vector_store %arg30[%c0_138, %c0_139], %339 {strides = array<i32>} : memref<32x128xf32, #tpu.memory_space<vmem>>, vector<32x128xf32>,
    return
  }
}

</mosaic_0001>

<bundles_post_ra>
// kernel: vit_decoder_forward.1
= control target key start
LH: loop header
LB: loop body
LE: loop exit
PB: predicated region body
PF: predicated region fallthrough
CT: control target
= control target key end

     0   :  { %s5378_s6 = smov 1   ;;  %vm138_vm0 = vcmask 261120   ;;  %s5379_s10 = smov 4   ;;  %vm330_vm1 = vcmask 130048   ;;  %vm1876_vm2 = vcmask 64512   ;;  %s6093_s0 = inlined_call_operand.smem [shape: u32[31], index: -1, kind: input, shape index: {}] }
   0x1   :  { %s1_s5 = sld [smem:[%s6093_s0]]   ;;  %s5380_s14 = smov 2  }
   0x2   :  { %s4446_s9 = sld [smem:[%s6093_s0 + %s5378_s6]]   ;;  %s5381_s18 = smov 3  }
   0x3   :  { %s4449_s13 = sld [smem:[%s6093_s0 + %s5379_s10]]   ;;  %s5382_s22 = smov 5  }
   0x4   :  { %s4447_s17 = sld [smem:[%s6093_s0 + %s5380_s14]]   ;;  %s5383_s26 = smov 96  }
   0x5   :  { %s4448_s21 = sld [smem:[%s6093_s0 + %s5381_s18]]   ;;  %s5384_s27 = smov 80  }
   0x6   :  { %s4450_s25 = sld [smem:[%s6093_s0 + %s5382_s22]]   ;;  %s5385_s28 = smov 64  }
   0x7   :  { %v126_v0 = vld [vmem:[%s1_s5] sm:$0xff]  ;;  %v128_v1 = vld [vmem:[%s1_s5 + $0x10] sm:$0xff]  ;;  %v127_v2 = vld [vmem:[%s1_s5 + $0x8] sm:$0xff]  ;;  %s5386_s29 = smov 112   ;;  %s5387_s30 = smov 48  }
   0x8   :  { %v130_v3 = vld [vmem:[%s4446_s9] sm:$0xff]  ;;  %v131_v4 = vld [vmem:[%s4446_s9 + $0x8] sm:$0xff]  ;;  %v129_v5 = vld [vmem:[%s1_s5 + $0x18] sm:$0xff]  ;;  %s5388_s1 = smov 6   ;;  %s5389_s5 = smov 7  }
   0x9   :  { %v5430_v6 = vadd.f32 %v130_v3, %v126_v0  ;;  %v5432_v7 = vadd.f32 %v130_v3, %v128_v1  ;;  %v5434_v8 = vadd.f32 %v131_v4, %v127_v2  ;;  %v5436_v9 = vadd.f32 %v131_v4, %v129_v5  ;;  %v215_v34 = vld [vmem:[%s4449_s13 + $0x18] sm:$0xff]  ;;  %v214_v35 = vld [vmem:[%s4449_s13 + $0x10] sm:$0xff]  ;;  %v213_v36 = vld [vmem:[%s4449_s13 + $0x8] sm:$0xff]  ;;  %s5578_s4 = sld [smem:[%s6093_s0 + %s5388_s1]]   ;;  %s5390_s9 = smov 10  }
   0xa   :  { %4819 = vmatprep.subr.mxu0 %v215_v34  ;;  %v212_v37 = vld [vmem:[%s4449_s13] sm:$0xff]  ;;  %s4452_s8 = sld [smem:[%s6093_s0 + %s5389_s5]]   ;;  %s5391_s13 = smov 8  }
   0xb   :  { %v139_v10 = vsel %vm138_vm0, %v5430_v6, 0.0  ;;  %v145_v11 = vsel %vm138_vm0, %v5432_v7, 0.0  ;;  %v142_v12 = vsel %vm138_vm0, %v5434_v8, 0.0  ;;  %v148_v13 = vsel %vm138_vm0, %v5436_v9, 0.0  ;;  %4820 = vmatpush3.msra.mxu0 %v215_v34  ;;  %v4476_v51 = vld [vmem:[%s4447_s17] ss:$0 sm:$0xff]  ;;  %s4455_s12 = sld [smem:[%s6093_s0 + %s5390_s9]]  }
   0xc   :  { %140 = vadd.xlane.f32.xlu0 %v139_v10  ;;  %146 = vadd.xlane.f32.xlu1 %v145_v11  ;;  %v4477_v53 = vld [vmem:[%s4448_s21] ss:$0 sm:$0xff]  ;;  %s4453_s16 = sld [smem:[%s6093_s0 + %s5391_s13]]   ;;  %s5392_s17 = smov 9  }
   0xd   :  { %4821 = vmatprep.subr.mxu0 %v214_v35  ;;  %v4478_v4 = vld [vmem:[%s4450_s25] ss:$0 sm:$0xff]  ;;  %s4454_s20 = sld [smem:[%s6093_s0 + %s5392_s17]]   ;;  %s5393_s21 = smov 12  }
   0xe   :  { %4822 = vmatpush3.msra.mxu0 %v214_v35  ;;  %s5646_s24 = sld [smem:[%s6093_s0 + %s5393_s21]]   ;;  %s5394_s25 = smov 11  }
   0xf   :  { %4823 = vmatprep.subr.mxu0 %v213_v36  ;;  %s4456_s3 = sld [smem:[%s6093_s0 + %s5394_s25]]   ;;  %s5413_s1 = smov 25  }
  0x10   :  { %143 = vadd.xlane.f32.xlu0 %v142_v12  ;;  %149 = vadd.xlane.f32.xlu1 %v148_v13  ;;  %s5415_s6 = smov 26   ;;  %s5416_s10 = smov 27  }
  0x11   :  { %4824 = vmatpush3.msra.mxu0 %v213_v36  ;;  %s4471_s9 = sld [smem:[%s6093_s0 + %s5415_s6]]   ;;  %s5417_s14 = smov 29  }
  0x12   :  { %4825 = vmatprep.subr.mxu0 %v212_v37  ;;  %s4472_s13 = sld [smem:[%s6093_s0 + %s5416_s10]]   ;;  %s5418_s18 = smov 30  }
  0x13   :  { %4826 = vmatpush3.msra.mxu0 %v212_v37  ;;  %s4474_s17 = sld [smem:[%s6093_s0 + %s5417_s14]]  }
  0x14   :  { %s4475_s21 = sld [smem:[%s6093_s0 + %s5418_s18]]  }
  0x95   :  { %v141_v14 = vpop.xlane.xlu0 %140  ;;  %v147_v15 = vpop.xlane.xlu1 %146 }
  0x96   :  { %v152_v16 = vmul.f32 0.03125, %v141_v14  ;;  %v154_v17 = vmul.f32 0.03125, %v147_v15 }
  0x98   :  { %v156_v18 = vsub.f32 %v5430_v6, %v152_v16  ;;  %v158_v19 = vsub.f32 %v5432_v7, %v154_v17 }
  0x99   :  { %v144_v20 = vpop.xlane.xlu0 %143  ;;  %v150_v21 = vpop.xlane.xlu1 %149 }
  0x9a   :  { %v153_v22 = vmul.f32 0.03125, %v144_v20  ;;  %v155_v23 = vmul.f32 0.03125, %v150_v21  ;;  %v160_v24 = vmul.f32 %v156_v18, %v156_v18  ;;  %v162_v25 = vmul.f32 %v158_v19, %v158_v19 }
  0x9c   :  { %v157_v26 = vsub.f32 %v5434_v8, %v153_v22  ;;  %v159_v27 = vsub.f32 %v5436_v9, %v155_v23  ;;  %v164_v28 = vsel %vm138_vm0, %v160_v24, 0.0  ;;  %v170_v29 = vsel %vm138_vm0, %v162_v25, 0.0 }
  0x9d   :  { %165 = vadd.xlane.f32.xlu0 %v164_v28 }
  0x9e   :  { %v161_v30 = vmul.f32 %v157_v26, %v157_v26  ;;  %v163_v31 = vmul.f32 %v159_v27, %v159_v27 }
  0xa0   :  { %v167_v32 = vsel %vm138_vm0, %v161_v30, 0.0  ;;  %v173_v33 = vsel %vm138_vm0, %v163_v31, 0.0 }
  0xa1   :  { %171 = vadd.xlane.f32.xlu0 %v170_v29  ;;  %168 = vadd.xlane.f32.xlu1 %v167_v32 }
  0xa5   :  { %174 = vadd.xlane.f32.xlu1 %v173_v33 }
 0x126   :  { %v166_v38 = vpop.xlane.xlu0 %165 }
 0x127   :  { %v176_v39 = vmul.f32 0.03125, %v166_v38 }
 0x129   :  { %v180_v40 = vadd.f32 1e-05, %v176_v39 }
 0x12a   :  { %v169_v41 = vpop.xlane.xlu1 %168  ;;  %v172_v42 = vpop.xlane.xlu0 %171 }
 0x12b   :  { %5226 = vrsqrt.f32 %v180_v40  ;;  %v177_v43 = vmul.f32 0.03125, %v169_v41  ;;  %v178_v44 = vmul.f32 0.03125, %v172_v42 }
 0x12d   :  { %v181_v45 = vadd.f32 1e-05, %v177_v43  ;;  %v182_v46 = vadd.f32 1e-05, %v178_v44 }
 0x12e   :  { %v175_v47 = vpop.xlane.xlu1 %174 }
 0x12f   :  { %5228 = vrsqrt.f32 %v181_v45  ;;  %v179_v48 = vmul.f32 0.03125, %v175_v47 }
 0x130   :  { %5230 = vrsqrt.f32 %v182_v46 }
 0x131   :  { %v183_v49 = vadd.f32 1e-05, %v179_v48 }
 0x133   :  { %5232 = vrsqrt.f32 %v183_v49 }
 0x138   :  { %v5227_v50 = vpop.eup %5226 }
 0x139   :  { %v188_v52 = vmul.f32 %v5227_v50, %v156_v18 }
 0x13b   :  { %v198_v54 = vmul.f32 %v4476_v51, %v188_v52 }
 0x13c   :  { %v5229_v55 = vpop.eup %5228 }
 0x13d   :  { %v5231_v56 = vpop.eup %5230  ;;  %v208_v57 = vadd.f32 %v4477_v53, %v198_v54  ;;  %v189_v58 = vmul.f32 %v5229_v55, %v157_v26 }
 0x13e   :  { %v190_v59 = vmul.f32 %v5231_v56, %v158_v19 }
 0x13f   :  { %4827 = vmatprep.mubr.msk.f32.mxu0 %vm138_vm0, %v208_v57  ;;  %v199_v60 = vmul.f32 %v4476_v51, %v189_v58 }
 0x140   :  { %v5233_v61 = vpop.eup %5232  ;;  %v200_v62 = vmul.f32 %v4476_v51, %v190_v59 }
 0x141   :  { %v209_v63 = vadd.f32 %v4477_v53, %v199_v60  ;;  %v191_v0 = vmul.f32 %v5233_v61, %v159_v27 }
 0x142   :  { %v210_v1 = vadd.f32 %v4477_v53, %v200_v62 }
 0x143   :  { %4828 = vmatmul.mubr.msk.f32.vlgmr.msra.gmra.mxu0 %vm138_vm0, %v209_v63  ;;  %v201_v2 = vmul.f32 %v4476_v51, %v191_v0 }
 0x144   :  { %4830 = vmatprep.mubr.msk.f32.mxu0 %vm138_vm0, %v210_v1 }
 0x145   :  { %v211_v3 = vadd.f32 %v4477_v53, %v201_v2 }
 0x147   :  { %4831 = vmatmul.mubr.msk.f32.gmra.mxu0 %vm138_vm0, %v211_v3 }
 0x203   :  { %v4829_v5 = vpop.f32.mrf.mxu0 }
 0x204   :  { %v5470_v10 = vadd.f32 %v4829_v5, %v4478_v4 }
 0x205   :  { %v301_v11 = vpop.f32.mrf.mxu0 }
 0x206   :  { %v5472_v12 = vadd.f32 %v4478_v4, %v301_v11  ;;  %328 = vrot.lane.b32.xlu0 %v5470_v10, %s5383_s26 }
 0x207   :  { %v4832_v13 = vpop.f32.mrf.mxu0 }
 0x208   :  { %326 = vrot.lane.b32.xlu1 %v5472_v12, %s5383_s26  ;;  %4837 = vmatprep.mubr.msk.f32.mxu0 %vm330_vm1, %v5472_v12  ;;  %v5480_v14 = vadd.f32 %v4832_v13, %v4478_v4 }
 0x209   :  { %v311_v15 = vpop.f32.mrf.mxu0 }
 0x20a   :  { %v5484_v16 = vadd.f32 %v4478_v4, %v311_v15 }
 0x20c   :  { %418 = vrot.lane.b32.xlu1 %v5480_v14, %s5383_s26 }
 0x210   :  { %416 = vrot.lane.b32.xlu1 %v5484_v16, %s5383_s26 }
 0x278   :  { %v329_v17 = vpop.permute.xlu0 %328 }
 0x279   :  { %4833 = vmatprep.subr.msk.mxu0 %vm330_vm1, %v329_v17 }
 0x27a   :  { %v327_v18 = vpop.permute.xlu1 %326  ;;  %4834 = vmatpush3.xpose.msk.msra.mxu0 %vm330_vm1, %v329_v17 }
 0x27b   :  { %4835 = vmatprep.subr.msk.mxu0 %vm330_vm1, %v327_v18 }
 0x27e   :  { %v419_v19 = vpop.permute.xlu1 %418  ;;  %4836 = vmatpush3.xpose.msk.msra.mxu0 %vm330_vm1, %v327_v18 }
 0x27f   :  { %4840 = vmatprep.subr.msk.mxu0 %vm330_vm1, %v419_v19 }
 0x281   :  { %4838 = vmatmul.mubr.msk.f32.vlgmr.msra.gmra.mxu0 %vm330_vm1, %v5470_v10 }
 0x282   :  { %v417_v20 = vpop.permute.xlu1 %416  ;;  %4841 = vmatpush3.xpose.msk.msra.mxu0 %vm330_vm1, %v419_v19  ;;  %4844 = vmatprep.mubr.msk.f32.mxu0 %vm330_vm1, %v5484_v16 }
 0x283   :  { %4842 = vmatprep.subr.msk.mxu0 %vm330_vm1, %v417_v20 }
 0x286   :  { %4843 = vmatpush3.xpose.msk.msra.mxu0 %vm330_vm1, %v417_v20 }
 0x289   :  { %4845 = vmatmul.mubr.msk.f32.vlgmr.msra.gmra.mxu0 %vm330_vm1, %v5480_v14 }
 0x341   :  { %v4839_v21 = vpop.f32.mrf.mxu0 }
 0x342   :  { %v506_v22 = vsel %vm330_vm1, %v4839_v21, -inf }
 0x343   :  { %507 = vmax.xlane.f32.xlu1 %v506_v22  ;;  %v405_v23 = vpop.f32.mrf.mxu0 }
 0x344   :  { %v503_v24 = vsel %vm330_vm1, %v405_v23, -inf }
 0x345   :  { %504 = vmax.xlane.f32.xlu0 %v503_v24 }
 0x349   :  { %v4846_v25 = vpop.f32.mrf.mxu0 }
 0x34a   :  { %v512_v28 = vsel %vm330_vm1, %v4846_v25, -inf }
 0x34b   :  { %v494_v26 = vpop.f32.mrf.mxu0 }
 0x34c   :  { %v509_v27 = vsel %vm330_vm1, %v494_v26, -inf }
 0x34d   :  { %510 = vmax.xlane.f32.xlu0 %v509_v27 }
 0x351   :  { %513 = vmax.xlane.f32.xlu0 %v512_v28 }
 0x354   :  { %739 = vrot.lane.b32.xlu1 %v5470_v10, %s5384_s27 }
 0x358   :  { %559 = vrot.lane.b32.xlu1 %v5472_v12, %s5385_s28 }
 0x35c   :  { %648 = vrot.lane.b32.xlu1 %v5480_v14, %s5385_s28 }
 0x360   :  { %646 = vrot.lane.b32.xlu1 %v5484_v16, %s5385_s28 }
 0x367   :  { %561 = vrot.lane.b32.xlu0 %v5470_v10, %s5385_s28 }
 0x36b   :  { %737 = vrot.lane.b32.xlu0 %v5472_v12, %s5384_s27 }
 0x3cc   :  { %v508_v29 = vpop.xlane.xlu1 %507 }
 0x3cd   :  { %v516_v30 = vsub.f32 %v4839_v21, %v508_v29 }
 0x3ce   :  { %v505_v31 = vpop.xlane.xlu0 %504 }
 0x3cf   :  { %v521_v32 = vmul.f32 1.442695, %v516_v30  ;;  %v515_v33 = vsub.f32 %v405_v23, %v505_v31 }
 0x3d0   :  { %v740_v34 = vpop.permute.xlu1 %739 }
 0x3d1   :  { %5234 = vpow2.f32 %v521_v32  ;;  %v519_v35 = vmul.f32 1.442695, %v515_v33  ;;  %4861 = vmatprep.subr.msk.mxu0 %vm330_vm1, %v740_v34 }
 0x3d2   :  { %4862 = vmatpush3.xpose.msk.msra.mxu0 %vm330_vm1, %v740_v34 }
 0x3d3   :  { %5236 = vpow2.f32 %v519_v35 }
 0x3d4   :  { %v560_v41 = vpop.permute.xlu1 %559 }
 0x3d6   :  { %v511_v36 = vpop.xlane.xlu0 %510 }
 0x3d7   :  { %v517_v37 = vsub.f32 %v494_v26, %v511_v36 }
 0x3d8   :  { %v649_v48 = vpop.permute.xlu1 %648 }
 0x3d9   :  { %v523_v38 = vmul.f32 1.442695, %v517_v37 }
 0x3da   :  { %v514_v39 = vpop.xlane.xlu0 %513 }
 0x3db   :  { %5238 = vpow2.f32 %v523_v38  ;;  %v518_v40 = vsub.f32 %v4846_v25, %v514_v39 }
 0x3dc   :  { %v647_v54 = vpop.permute.xlu1 %646 }
 0x3dd   :  { %v525_v42 = vmul.f32 1.442695, %v518_v40 }
 0x3de   :  { %v5235_v43 = vpop.eup %5234  ;;  %v562_v44 = vpop.permute.xlu0 %561 }
 0x3df   :  { %5240 = vpow2.f32 %v525_v42  ;;  %4847 = vmatprep.subr.mxu1 %v562_v44  ;;  %v530_v45 = vsel %vm330_vm1, %v5235_v43, 0.0 }
 0x3e0   :  { %v5237_v46 = vpop.eup %5236  ;;  %531 = vadd.xlane.f32.xlu1 %v530_v45  ;;  %4848 = vmatpush3.msra.mxu1 %v562_v44 }
 0x3e1   :  { %4849 = vmatprep.subr.mxu1 %v560_v41  ;;  %v527_v47 = vsel %vm330_vm1, %v5237_v46, 0.0 }
 0x3e2   :  { %528 = vadd.xlane.f32.xlu0 %v527_v47  ;;  %4850 = vmatpush3.msra.mxu1 %v560_v41  ;;  %v738_v49 = vpop.permute.xlu0 %737 }
 0x3e3   :  { %4854 = vmatprep.subr.mxu1 %v649_v48  ;;  %4863 = vmatprep.subr.msk.mxu0 %vm330_vm1, %v738_v49 }
 0x3e4   :  { %4864 = vmatpush3.xpose.msk.msra.mxu0 %vm330_vm1, %v738_v49 }
 0x3e8   :  { %v5239_v50 = vpop.eup %5238 }
 0x3e9   :  { %v533_v51 = vsel %vm330_vm1, %v5239_v50, 0.0 }
 0x3ea   :  { %534 = vadd.xlane.f32.xlu0 %v533_v51 }
 0x3ec   :  { %v5241_v52 = vpop.eup %5240 }
 0x3ed   :  { %v536_v53 = vsel %vm330_vm1, %v5241_v52, 0.0 }
 0x3ee   :  { %537 = vadd.xlane.f32.xlu1 %v536_v53 }
 0x3ff   :  { %735 = vrot.lane.b32.xlu1 %v5470_v10, %s5386_s29 }
 0x400   :  { %733 = vrot.lane.b32.xlu0 %v5472_v12, %s5386_s29 }
 0x403   :  { %828 = vrot.lane.b32.xlu1 %v5484_v16, %s5384_s27 }
 0x404   :  { %830 = vrot.lane.b32.xlu0 %v5480_v14, %s5384_s27 }
 0x407   :  { %826 = vrot.lane.b32.xlu1 %v5480_v14, %s5386_s29 }
 0x408   :  { %824 = vrot.lane.b32.xlu0 %v5484_v16, %s5386_s29 }
 0x469   :  { %v532_v55 = vpop.xlane.xlu1 %531 }
 0x46a   :  { %5242 = vrcp.f32 %v532_v55 }
 0x46b   :  { %v529_v56 = vpop.xlane.xlu0 %528 }
 0x46c   :  { %5244 = vrcp.f32 %v529_v56 }
 0x473   :  { %v535_v57 = vpop.xlane.xlu0 %534 }
 0x474   :  { %5246 = vrcp.f32 %v535_v57 }
 0x477   :  { %v5243_v58 = vpop.eup %5242  ;;  %v538_v59 = vpop.xlane.xlu1 %537 }
 0x478   :  { %v734_v60 = vpop.permute.xlu0 %733  ;;  %v544_v61 = vmul.f32 %v5243_v58, %v532_v55  ;;  %5248 = vrcp.f32 %v538_v59 }
 0x479   :  { %4865 = vmatprep.mubr.msk.f32.mxu0 %vm330_vm1, %v734_v60  ;;  %v5245_v62 = vpop.eup %5244 }
 0x47a   :  { %v548_v63 = vsub.f32 2.0, %v544_v61  ;;  %v543_v0 = vmul.f32 %v5245_v62, %v529_v56 }
 0x47b   :  { %v736_v1 = vpop.permute.xlu1 %735 }
 0x47c   :  { %v547_v2 = vsub.f32 2.0, %v543_v0  ;;  %4866 = vmatmul.mubr.msk.f32.vlgmr.msra.gmra.mxu0 %vm330_vm1, %v736_v1  ;;  %v552_v3 = vmul.f32 %v5243_v58, %v548_v63  ;;  %v831_v21 = vpop.permute.xlu0 %830 }
 0x47e   :  { %v551_v4 = vmul.f32 %v5245_v62, %v547_v2  ;;  %v556_v13 = vmul.f32 %v5235_v43, %v552_v3 }
 0x47f   :  { %v829_v27 = vpop.permute.xlu1 %828 }
 0x480   :  { %v555_v5 = vmul.f32 %v5237_v46, %v551_v4  ;;  %v825_v26 = vpop.permute.xlu0 %824 }
 0x481   :  { %v5247_v11 = vpop.eup %5246 }
 0x482   :  { %v545_v15 = vmul.f32 %v5247_v11, %v535_v57  ;;  %4851 = vmatprep.mubr.msk.f32.mxu1 %vm330_vm1, %v555_v5 }
 0x483   :  { %4852 = vmatmul.mubr.msk.f32.vlgmr.msra.gmra.mxu1 %vm330_vm1, %v556_v13  ;;  %v827_v28 = vpop.permute.xlu1 %826 }
 0x484   :  { %v549_v17 = vsub.f32 2.0, %v545_v15  ;;  %4855 = vmatpush3.msra.mxu1 %v649_v48 }
 0x485   :  { %v5249_v18 = vpop.eup %5248  ;;  %4856 = vmatprep.subr.mxu1 %v647_v54 }
 0x486   :  { %v553_v19 = vmul.f32 %v5247_v11, %v549_v17  ;;  %v546_v20 = vmul.f32 %v5249_v18, %v538_v59  ;;  %4857 = vmatpush3.msra.mxu1 %v647_v54 }
 0x487   :  { %4868 = vmatprep.subr.msk.mxu1 %vm330_vm1, %v831_v21 }
 0x488   :  { %v550_v22 = vsub.f32 2.0, %v546_v20  ;;  %v557_v23 = vmul.f32 %v5239_v50, %v553_v19 }
 0x48a   :  { %v554_v24 = vmul.f32 %v5249_v18, %v550_v22  ;;  %4858 = vmatprep.mubr.msk.f32.mxu1 %vm330_vm1, %v557_v23 }
 0x48c   :  { %v558_v25 = vmul.f32 %v5241_v52, %v554_v24 }
 0x48e   :  { %4859 = vmatmul.mubr.msk.f32.vlgmr.msra.gmra.mxu1 %vm330_vm1, %v558_v25 }
 0x48f   :  { %4869 = vmatpush3.xpose.msk.msra.mxu1 %vm330_vm1, %v831_v21  ;;  %4872 = vmatprep.mubr.msk.f32.mxu1 %vm330_vm1, %v825_v26  ;;  %v321_v21 = vld [vmem:[%s5578_s4 + $0x8] sm:$0xff] }
 0x490   :  { %4870 = vmatprep.subr.msk.mxu1 %vm330_vm1, %v829_v27 }
 0x493   :  { %4871 = vmatpush3.xpose.msk.msra.mxu1 %vm330_vm1, %v829_v27 }
 0x496   :  { %4873 = vmatmul.mubr.msk.f32.vlgmr.msra.gmra.mxu1 %vm330_vm1, %v827_v28 }
 0x53c   :  { %v4867_v29 = vpop.f32.mrf.mxu0 }
 0x53d   :  { %v918_v30 = vsel %vm330_vm1, %v4867_v29, -inf }
 0x53e   :  { %919 = vmax.xlane.f32.xlu1 %v918_v30  ;;  %v815_v31 = vpop.f32.mrf.mxu0  ;;  %v320_v30 = vld [vmem:[%s5578_s4] sm:$0xff] }
 0x53f   :  { %v915_v32 = vsel %vm330_vm1, %v815_v31, -inf }
 0x540   :  { %916 = vmax.xlane.f32.xlu0 %v915_v32  ;;  %v322_v32 = vld [vmem:[%s5578_s4 + $0x10] sm:$0xff] }
 0x543   :  { %v5552_v33 = vpop.f32.mrf.mxu1 }
 0x545   :  { %v5554_v34 = vpop.f32.mrf.mxu1 }
 0x54e   :  { %v5556_v35 = vpop.f32.mrf.mxu1 }
 0x550   :  { %v5558_v36 = vpop.f32.mrf.mxu1 }
 0x556   :  { %v4874_v37 = vpop.f32.mrf.mxu1 }
 0x557   :  { %v924_v40 = vsel %vm330_vm1, %v4874_v37, -inf }
 0x558   :  { %v906_v38 = vpop.f32.mrf.mxu1 }
 0x559   :  { %v921_v39 = vsel %vm330_vm1, %v906_v38, -inf }
 0x55a   :  { %922 = vmax.xlane.f32.xlu0 %v921_v39 }
 0x55e   :  { %925 = vmax.xlane.f32.xlu0 %v924_v40 }
 0x5c7   :  { %v920_v41 = vpop.xlane.xlu1 %919 }
 0x5c8   :  { %v928_v42 = vsub.f32 %v4867_v29, %v920_v41  ;;  %v4515_v41 = vld [vmem:[%s4452_s8] ss:$0 sm:$0xff]  ;;  %s5396_s8 = smov 16  }
 0x5c9   :  { %v917_v43 = vpop.xlane.xlu0 %916  ;;  %s4461_s11 = sld [smem:[%s6093_s0 + %s5396_s8]]   ;;  %s5408_s8 = smov 22  }
 0x5ca   :  { %v933_v44 = vmul.f32 1.442695, %v928_v42  ;;  %v927_v45 = vsub.f32 %v815_v31, %v917_v43  ;;  %v323_v31 = vld [vmem:[%s5578_s4 + $0x18] sm:$0xff]  ;;  %s5395_s4 = smov 13  }
 0x5cb   :  { %s4458_s7 = sld [smem:[%s6093_s0 + %s5395_s4]]   ;;  %s5407_s4 = smov 19  }
 0x5cc   :  { %5250 = vpow2.f32 %v933_v44  ;;  %v931_v46 = vmul.f32 1.442695, %v927_v45 }
 0x5ce   :  { %5252 = vpow2.f32 %v931_v46 }
 0x5d9   :  { %v5251_v47 = vpop.eup %5250 }
 0x5da   :  { %v942_v48 = vsel %vm330_vm1, %v5251_v47, 0.0 }
 0x5db   :  { %v5253_v49 = vpop.eup %5252  ;;  %943 = vadd.xlane.f32.xlu1 %v942_v48 }
 0x5dc   :  { %v939_v50 = vsel %vm330_vm1, %v5253_v49, 0.0 }
 0x5dd   :  { %940 = vadd.xlane.f32.xlu0 %v939_v50 }
 0x5e3   :  { %v923_v51 = vpop.xlane.xlu0 %922 }
 0x5e4   :  { %v929_v52 = vsub.f32 %v906_v38, %v923_v51 }
 0x5e6   :  { %v935_v53 = vmul.f32 1.442695, %v929_v52 }
 0x5e7   :  { %v926_v54 = vpop.xlane.xlu0 %925 }
 0x5e8   :  { %5254 = vpow2.f32 %v935_v53  ;;  %v930_v55 = vsub.f32 %v4874_v37, %v926_v54 }
 0x5ea   :  { %v937_v56 = vmul.f32 1.442695, %v930_v55 }
 0x5ec   :  { %5256 = vpow2.f32 %v937_v56 }
 0x5f5   :  { %v5255_v57 = vpop.eup %5254 }
 0x5f6   :  { %v945_v58 = vsel %vm330_vm1, %v5255_v57, 0.0 }
 0x5f7   :  { %946 = vadd.xlane.f32.xlu0 %v945_v58 }
 0x5f9   :  { %v5257_v59 = vpop.eup %5256 }
 0x5fa   :  { %v948_v60 = vsel %vm330_vm1, %v5257_v59, 0.0 }
 0x5fb   :  { %949 = vadd.xlane.f32.xlu1 %v948_v60 }
 0x60c   :  { %971 = vrot.lane.b32.xlu1 %v5472_v12, %s5387_s30 }
 0x60d   :  { %973 = vrot.lane.b32.xlu0 %v5470_v10, %s5387_s30 }
 0x610   :  { %1060 = vrot.lane.b32.xlu1 %v5480_v14, %s5387_s30 }
 0x614   :  { %1058 = vrot.lane.b32.xlu1 %v5484_v16, %s5387_s30 }
 0x664   :  { %v944_v62 = vpop.xlane.xlu1 %943 }
 0x666   :  { %v941_v61 = vpop.xlane.xlu0 %940 }
 0x667   :  { %5258 = vrcp.f32 %v941_v61 }
 0x668   :  { %5260 = vrcp.f32 %v944_v62 }
 0x674   :  { %v5259_v63 = vpop.eup %5258 }
 0x675   :  { %v955_v0 = vmul.f32 %v5259_v63, %v941_v61  ;;  %v5261_v3 = vpop.eup %5260 }
 0x676   :  { %v956_v12 = vmul.f32 %v5261_v3, %v944_v62 }
 0x677   :  { %v959_v1 = vsub.f32 2.0, %v955_v0 }
 0x678   :  { %v960_v5 = vsub.f32 2.0, %v956_v12 }
 0x679   :  { %v963_v2 = vmul.f32 %v5259_v63, %v959_v1 }
 0x67a   :  { %v964_v13 = vmul.f32 %v5261_v3, %v960_v5 }
 0x67b   :  { %v967_v4 = vmul.f32 %v5253_v49, %v963_v2 }
 0x67c   :  { %v968_v15 = vmul.f32 %v5251_v47, %v964_v13 }
 0x67d   :  { %4879 = vmatprep.mubr.msk.f32.mxu0 %vm330_vm1, %v967_v4 }
 0x680   :  { %v947_v10 = vpop.xlane.xlu0 %946 }
 0x681   :  { %5262 = vrcp.f32 %v947_v10 }
 0x684   :  { %v950_v14 = vpop.xlane.xlu1 %949  ;;  %v974_v11 = vpop.permute.xlu0 %973 }
 0x685   :  { %5264 = vrcp.f32 %v950_v14  ;;  %4875 = vmatprep.subr.mxu0 %v974_v11 }
 0x686   :  { %4876 = vmatpush3.msra.mxu0 %v974_v11 }
 0x688   :  { %v972_v16 = vpop.permute.xlu1 %971 }
 0x689   :  { %4877 = vmatprep.subr.mxu0 %v972_v16 }
 0x68a   :  { %4878 = vmatpush3.msra.mxu0 %v972_v16 }
 0x68b   :  { %4880 = vmatmul.mubr.msk.f32.vlgmr.msra.gmra.mxu0 %vm330_vm1, %v968_v15  ;;  %4889 = vmatprep.subr.mxu0 %v323_v31 }
 0x68c   :  { %v1061_v17 = vpop.permute.xlu1 %1060  ;;  %4890 = vmatpush3.msra.mxu0 %v323_v31 }
 0x68d   :  { %4882 = vmatprep.subr.mxu1 %v1061_v17  ;;  %4891 = vmatprep.subr.mxu0 %v322_v32 }
 0x68e   :  { %v5263_v18 = vpop.eup %5262  ;;  %4883 = vmatpush3.msra.mxu1 %v1061_v17  ;;  %4892 = vmatpush3.msra.mxu0 %v322_v32  ;;  %v4516_v32 = vld [vmem:[%s4453_s16] ss:$0 sm:$0xff]  ;;  %s5398_s16 = smov 15  }
 0x68f   :  { %v957_v19 = vmul.f32 %v5263_v18, %v947_v10  ;;  %s4460_s19 = sld [smem:[%s6093_s0 + %s5398_s16]]   ;;  %s5410_s16 = smov 21  }
 0x690   :  { %v1059_v20 = vpop.permute.xlu1 %1058 }
 0x691   :  { %v961_v22 = vsub.f32 2.0, %v957_v19  ;;  %4884 = vmatprep.subr.mxu1 %v1059_v20  ;;  %v1430_v19 = vld [vmem:[%s4455_s12 + $0x10] sm:$0xff] }
 0x692   :  { %v5265_v23 = vpop.eup %5264  ;;  %4885 = vmatpush3.msra.mxu1 %v1059_v20  ;;  %v1429_v20 = vld [vmem:[%s4455_s12 + $0x8] sm:$0xff] }
 0x693   :  { %v965_v24 = vmul.f32 %v5263_v18, %v961_v22  ;;  %v958_v25 = vmul.f32 %v5265_v23, %v950_v14  ;;  %4899 = vmatprep.subr.mxu1 %v321_v21  ;;  %v1431_v18 = vld [vmem:[%s4455_s12 + $0x18] sm:$0xff] }
 0x694   :  { %4909 = vmatprep.subr.mxu0 %v1431_v18 }
 0x695   :  { %v962_v26 = vsub.f32 2.0, %v958_v25  ;;  %v969_v27 = vmul.f32 %v5255_v57, %v965_v24 }
 0x697   :  { %v966_v28 = vmul.f32 %v5265_v23, %v962_v26  ;;  %4886 = vmatprep.mubr.msk.f32.mxu1 %vm330_vm1, %v969_v27 }
 0x699   :  { %v970_v29 = vmul.f32 %v5257_v59, %v966_v28 }
 0x69b   :  { %4887 = vmatmul.mubr.msk.f32.vlgmr.msra.gmra.mxu1 %vm330_vm1, %v970_v29 }
 0x69c   :  { %4900 = vmatpush3.msra.mxu1 %v321_v21  ;;  %4903 = vmatprep.mubr.msk.f32.mxu1 %vm330_vm1, %v5554_v34  ;;  %v1428_v21 = vld [vmem:[%s4455_s12] sm:$0xff]  ;;  %s5397_s12 = smov 14  }
 0x69d   :  { %4901 = vmatprep.subr.mxu1 %v320_v30  ;;  %s4459_s15 = sld [smem:[%s6093_s0 + %s5397_s12]]   ;;  %s5409_s12 = smov 20  }
 0x69e   :  { %4902 = vmatpush3.msra.mxu1 %v320_v30 }
 0x69f   :  { %4904 = vmatmul.mubr.msk.f32.vlgmr.msra.gmra.mxu1 %vm330_vm1, %v5552_v33 }
 0x6a0   :  { %4906 = vmatprep.mubr.msk.f32.mxu1 %vm330_vm1, %v5558_v36 }
 0x6a3   :  { %4907 = vmatmul.mubr.msk.f32.gmra.mxu1 %vm330_vm1, %v5556_v35 }
 0x74b   :  { %v4881_v37 = vpop.f32.mrf.mxu0 }
 0x74d   :  { %v1049_v38 = vpop.f32.mrf.mxu0 }
 0x74e   :  { %4893 = vmatprep.mubr.msk.f32.mxu0 %vm330_vm1, %v1049_v38 }
 0x74f   :  { %4894 = vmatmul.mubr.msk.f32.vlgmr.msra.gmra.mxu0 %vm330_vm1, %v4881_v37 }
 0x750   :  { %4910 = vmatpush3.msra.mxu0 %v1431_v18 }
 0x751   :  { %4911 = vmatprep.subr.mxu0 %v1430_v19 }
 0x752   :  { %4912 = vmatpush3.msra.mxu0 %v1430_v19 }
 0x753   :  { %4913 = vmatprep.subr.mxu0 %v1429_v20 }
 0x754   :  { %4914 = vmatpush3.msra.mxu0 %v1429_v20 }
 0x755   :  { %4915 = vmatprep.subr.mxu0 %v1428_v21 }
 0x756   :  { %4916 = vmatpush3.msra.mxu0 %v1428_v21 }
 0x75b   :  { %v4888_v34 = vpop.f32.mrf.mxu1 }
 0x75d   :  { %v1136_v33 = vpop.f32.mrf.mxu1 }
 0x75e   :  { %4896 = vmatprep.mubr.msk.f32.mxu0 %vm330_vm1, %v1136_v33 }
 0x75f   :  { %4897 = vmatmul.mubr.msk.f32.gmra.mxu0 %vm330_vm1, %v4888_v34  ;;  %v4905_v35 = vpop.f32.mrf.mxu1 }
 0x761   :  { %v1320_v40 = vpop.f32.mrf.mxu1 }
 0x763   :  { %v4908_v50 = vpop.f32.mrf.mxu1 }
 0x765   :  { %v1330_v53 = vpop.f32.mrf.mxu1 }
 0x80f   :  { %v4895_v36 = vpop.f32.mrf.mxu0 }
 0x810   :  { %v1326_v39 = vadd.f32 %v4905_v35, %v4895_v36 }
 0x811   :  { %v1223_v42 = vpop.f32.mrf.mxu0 }
 0x812   :  { %v1340_v43 = vadd.f32 %v1326_v39, %v5434_v8  ;;  %v1321_v44 = vadd.f32 %v1320_v40, %v1223_v42  ;;  %v4517_v39 = vld [vmem:[%s4454_s20] ss:$0 sm:$0xff]  ;;  %s5399_s20 = smov 17  }
 0x813   :  { %s4462_s23 = sld [smem:[%s6093_s0 + %s5399_s20]]   ;;  %s5411_s20 = smov 24  }
 0x814   :  { %v5603_v45 = vadd.f32 %v4515_v41, %v1340_v43  ;;  %v1339_v46 = vadd.f32 %v1321_v44, %v5430_v6 }
 0x816   :  { %v5606_v47 = vadd.f32 %v4515_v41, %v1339_v46  ;;  %v1359_v48 = vsel %vm138_vm0, %v5603_v45, 0.0 }
 0x817   :  { %1360 = vadd.xlane.f32.xlu1 %v1359_v48 }
 0x818   :  { %v1356_v49 = vsel %vm138_vm0, %v5606_v47, 0.0 }
 0x819   :  { %1357 = vadd.xlane.f32.xlu0 %v1356_v49 }
 0x81f   :  { %v4898_v51 = vpop.f32.mrf.mxu0 }
 0x820   :  { %v1336_v52 = vadd.f32 %v4908_v50, %v4898_v51 }
 0x821   :  { %v1233_v8 = vpop.f32.mrf.mxu0 }
 0x822   :  { %v1331_v54 = vadd.f32 %v1330_v53, %v1233_v8  ;;  %v1342_v55 = vadd.f32 %v1336_v52, %v5436_v9  ;;  %v1587_v8 = vld [vmem:[%s5646_s24 + $0x78] sm:$0xff] }
 0x823   :  { %4923 = vmatprep.subr.mxu1 %v1587_v8 }
 0x824   :  { %v1341_v6 = vadd.f32 %v1331_v54, %v5432_v7  ;;  %v5616_v57 = vadd.f32 %v4515_v41, %v1342_v55  ;;  %4924 = vmatpush3.msra.mxu1 %v1587_v8  ;;  %v1586_v54 = vld [vmem:[%s5646_s24 + $0x70] sm:$0xff]  ;;  %v1585_v55 = vld [vmem:[%s5646_s24 + $0x68] sm:$0xff] }
 0x825   :  { %4925 = vmatprep.subr.mxu1 %v1586_v54 }
 0x826   :  { %v5614_v56 = vadd.f32 %v4515_v41, %v1341_v6  ;;  %v1365_v59 = vsel %vm138_vm0, %v5616_v57, 0.0  ;;  %4926 = vmatpush3.msra.mxu1 %v1586_v54  ;;  %v1584_v6 = vld [vmem:[%s5646_s24 + $0x60] sm:$0xff] }
 0x827   :  { %4927 = vmatprep.subr.mxu1 %v1585_v55  ;;  %v4523_v54 = vld [vmem:[%s4458_s7] ss:$0 sm:$0xff]  ;;  %s4464_s7 = sld [smem:[%s6093_s0 + %s5407_s4]]  }
 0x828   :  { %v1362_v58 = vsel %vm138_vm0, %v5614_v56, 0.0  ;;  %4928 = vmatpush3.msra.mxu1 %v1585_v55 }
 0x829   :  { %1363 = vadd.xlane.f32.xlu0 %v1362_v58  ;;  %4929 = vmatprep.subr.mxu1 %v1584_v6  ;;  %v1583_v58 = vld [vmem:[%s5646_s24 + $0x58] sm:$0xff] }
 0x82a   :  { %4930 = vmatpush3.msra.mxu1 %v1584_v6 }
 0x82b   :  { %4931 = vmatprep.subr.mxu1 %v1583_v58 }
 0x82c   :  { %4932 = vmatpush3.msra.mxu1 %v1583_v58 }
 0x82d   :  { %1366 = vadd.xlane.f32.xlu0 %v1365_v59  ;;  %v1582_v59 = vld [vmem:[%s5646_s24 + $0x50] sm:$0xff] }
 0x82e   :  { %4933 = vmatprep.subr.mxu1 %v1582_v59 }
 0x82f   :  { %4934 = vmatpush3.msra.mxu1 %v1582_v59 }
 0x8a0   :  { %v1361_v60 = vpop.xlane.xlu1 %1360 }
 0x8a1   :  { %v1369_v61 = vmul.f32 0.03125, %v1361_v60  ;;  %v1581_v60 = vld [vmem:[%s5646_s24 + $0x48] sm:$0xff] }
 0x8a2   :  { %v1358_v62 = vpop.xlane.xlu0 %1357  ;;  %4935 = vmatprep.subr.mxu1 %v1581_v60 }
 0x8a3   :  { %v1373_v63 = vsub.f32 %v5603_v45, %v1369_v61  ;;  %v1368_v9 = vmul.f32 0.03125, %v1358_v62  ;;  %v1580_v61 = vld [vmem:[%s5646_s24 + $0x40] sm:$0xff]  ;;  %4936 = vmatpush3.msra.mxu1 %v1581_v60  ;;  %v1579_v62 = vld [vmem:[%s5646_s24 + $0x38] sm:$0xff] }
 0x8a4   :  { %4937 = vmatprep.subr.mxu1 %v1580_v61 }
 0x8a5   :  { %v1372_v7 = vsub.f32 %v5606_v47, %v1368_v9  ;;  %v1377_v0 = vmul.f32 %v1373_v63, %v1373_v63  ;;  %4938 = vmatpush3.msra.mxu1 %v1580_v61  ;;  %v1577_v9 = vld [vmem:[%s5646_s24 + $0x28] sm:$0xff] }
 0x8a6   :  { %4939 = vmatprep.subr.mxu1 %v1579_v62 }
 0x8a7   :  { %v1383_v1 = vsel %vm138_vm0, %v1377_v0, 0.0  ;;  %v1376_v2 = vmul.f32 %v1372_v7, %v1372_v7  ;;  %4940 = vmatpush3.msra.mxu1 %v1579_v62  ;;  %v1575_v0 = vld [vmem:[%s5646_s24 + $0x18] sm:$0xff] }
 0x8a8   :  { %1384 = vadd.xlane.f32.xlu1 %v1383_v1  ;;  %v1574_v1 = vld [vmem:[%s5646_s24 + $0x10] sm:$0xff] }
 0x8a9   :  { %v1380_v3 = vsel %vm138_vm0, %v1376_v2, 0.0  ;;  %v1573_v2 = vld [vmem:[%s5646_s24 + $0x8] sm:$0xff] }
 0x8aa   :  { %1381 = vadd.xlane.f32.xlu0 %v1380_v3  ;;  %v1572_v3 = vld [vmem:[%s5646_s24] sm:$0xff] }
 0x8b2   :  { %v1364_v4 = vpop.xlane.xlu0 %1363 }
 0x8b3   :  { %v1370_v12 = vmul.f32 0.03125, %v1364_v4  ;;  %v4518_v4 = vld [vmem:[%s4456_s3] ss:$0 sm:$0xff]  ;;  %s5403_s3 = smov 56  }
 0x8b5   :  { %v1374_v10 = vsub.f32 %v5614_v56, %v1370_v12 }
 0x8b6   :  { %v1367_v5 = vpop.xlane.xlu0 %1366 }
 0x8b7   :  { %v1371_v14 = vmul.f32 0.03125, %v1367_v5  ;;  %v1378_v11 = vmul.f32 %v1374_v10, %v1374_v10 }
 0x8b9   :  { %v1375_v13 = vsub.f32 %v5616_v57, %v1371_v14  ;;  %v1386_v16 = vsel %vm138_vm0, %v1378_v11, 0.0 }
 0x8ba   :  { %1387 = vadd.xlane.f32.xlu0 %v1386_v16 }
 0x8bb   :  { %v1379_v15 = vmul.f32 %v1375_v13, %v1375_v13 }
 0x8bd   :  { %v1389_v17 = vsel %vm138_vm0, %v1379_v15, 0.0 }
 0x8be   :  { %1390 = vadd.xlane.f32.xlu1 %v1389_v17 }
 0x931   :  { %v1385_v22 = vpop.xlane.xlu1 %1384 }
 0x932   :  { %v1393_v23 = vmul.f32 0.03125, %v1385_v22 }
 0x933   :  { %v1382_v24 = vpop.xlane.xlu0 %1381 }
 0x934   :  { %v1397_v25 = vadd.f32 1e-05, %v1393_v23  ;;  %v1392_v26 = vmul.f32 0.03125, %v1382_v24 }
 0x936   :  { %5266 = vrsqrt.f32 %v1397_v25  ;;  %v1396_v27 = vadd.f32 1e-05, %v1392_v26 }
 0x938   :  { %5268 = vrsqrt.f32 %v1396_v27 }
 0x943   :  { %v5267_v28 = vpop.eup %5266  ;;  %v1388_v29 = vpop.xlane.xlu0 %1387 }
 0x944   :  { %v1405_v30 = vmul.f32 %v5267_v28, %v1373_v63  ;;  %v1394_v31 = vmul.f32 0.03125, %v1388_v29  ;;  %v1578_v63 = vld [vmem:[%s5646_s24 + $0x30] sm:$0xff] }
 0x945   :  { %v5269_v37 = vpop.eup %5268  ;;  %4941 = vmatprep.subr.mxu1 %v1578_v63 }
 0x946   :  { %v1398_v38 = vadd.f32 1e-05, %v1394_v31  ;;  %v1404_v34 = vmul.f32 %v5269_v37, %v1372_v7  ;;  %v1415_v35 = vmul.f32 %v4516_v32, %v1405_v30  ;;  %4942 = vmatpush3.msra.mxu1 %v1578_v63  ;;  %v1576_v7 = vld [vmem:[%s5646_s24 + $0x20] sm:$0xff]  ;;  %s5401_s24 = smov 120  }
 0x947   :  { %v1391_v33 = vpop.xlane.xlu1 %1390  ;;  %4943 = vmatprep.subr.mxu1 %v1577_v9 }
 0x948   :  { %5270 = vrsqrt.f32 %v1398_v38  ;;  %v1395_v36 = vmul.f32 0.03125, %v1391_v33  ;;  %v1414_v40 = vmul.f32 %v4516_v32, %v1404_v34  ;;  %v1425_v43 = vadd.f32 %v4517_v39, %v1415_v35  ;;  %4944 = vmatpush3.msra.mxu1 %v1577_v9 }
 0x949   :  { %4945 = vmatprep.subr.mxu1 %v1576_v7 }
 0x94a   :  { %v1399_v41 = vadd.f32 1e-05, %v1395_v36  ;;  %v1424_v42 = vadd.f32 %v4517_v39, %v1414_v40  ;;  %4946 = vmatpush3.msra.mxu1 %v1576_v7 }
 0x94b   :  { %4947 = vmatprep.subr.mxu1 %v1575_v0 }
 0x94c   :  { %5272 = vrsqrt.f32 %v1399_v41  ;;  %4917 = vmatprep.mubr.msk.f32.mxu0 %vm138_vm0, %v1424_v42  ;;  %4948 = vmatpush3.msra.mxu1 %v1575_v0 }
 0x94d   :  { %4918 = vmatmul.mubr.msk.f32.vlgmr.msra.gmra.mxu0 %vm138_vm0, %v1425_v43  ;;  %4949 = vmatprep.subr.mxu1 %v1574_v1 }
 0x94e   :  { %4950 = vmatpush3.msra.mxu1 %v1574_v1 }
 0x94f   :  { %4951 = vmatprep.subr.mxu1 %v1573_v2 }
 0x950   :  { %4952 = vmatpush3.msra.mxu1 %v1573_v2 }
 0x951   :  { %4953 = vmatprep.subr.mxu1 %v1572_v3 }
 0x952   :  { %4954 = vmatpush3.msra.mxu1 %v1572_v3 }
 0x955   :  { %v5271_v44 = vpop.eup %5270 }
 0x956   :  { %v1406_v46 = vmul.f32 %v5271_v44, %v1374_v10 }
 0x958   :  { %v1416_v48 = vmul.f32 %v4516_v32, %v1406_v46 }
 0x959   :  { %v5273_v49 = vpop.eup %5272 }
 0x95a   :  { %v1426_v50 = vadd.f32 %v4517_v39, %v1416_v48  ;;  %v1407_v51 = vmul.f32 %v5273_v49, %v1375_v13 }
 0x95c   :  { %4920 = vmatprep.mubr.msk.f32.mxu0 %vm138_vm0, %v1426_v50  ;;  %v1417_v52 = vmul.f32 %v4516_v32, %v1407_v51 }
 0x95e   :  { %v1427_v53 = vadd.f32 %v4517_v39, %v1417_v52 }
 0x960   :  { %4921 = vmatmul.mubr.msk.f32.gmra.mxu0 %vm138_vm0, %v1427_v53 }
 0xa0d   :  { %v4919_v12 = vpop.f32.mrf.mxu0 }
 0xa0e   :  { %v1523_v10 = vadd.f32 %v4919_v12, %v4518_v4 }
 0xa0f   :  { %v1517_v5 = vpop.f32.mrf.mxu0 }
 0xa10   :  { %v1541_v14 = vmul.f32 0.044715, %v1523_v10  ;;  %v1518_v11 = vadd.f32 %v4518_v4, %v1517_v5  ;;  %v1537_v39 = vmul.f32 0.5, %v1523_v10 }
 0xa12   :  { %v1545_v13 = vmul.f32 %v1541_v14, %v1523_v10  ;;  %v1540_v16 = vmul.f32 0.044715, %v1518_v11  ;;  %v1536_v35 = vmul.f32 0.5, %v1518_v11 }
 0xa14   :  { %v1549_v15 = vmul.f32 %v1545_v13, %v1523_v10  ;;  %v1544_v17 = vmul.f32 %v1540_v16, %v1518_v11 }
 0xa16   :  { %v1553_v18 = vadd.f32 %v1549_v15, %v1523_v10  ;;  %v1548_v19 = vmul.f32 %v1544_v17, %v1518_v11 }
 0xa18   :  { %v1557_v20 = vmul.f32 0.7978846, %v1553_v18  ;;  %v1552_v21 = vadd.f32 %v1548_v19, %v1518_v11 }
 0xa1a   :  { %5274 = vtanh.f32 %v1557_v20  ;;  %v1556_v22 = vmul.f32 0.7978846, %v1552_v21 }
 0xa1c   :  { %5276 = vtanh.f32 %v1556_v22 }
 0xa20   :  { %v4922_v23 = vpop.f32.mrf.mxu0 }
 0xa21   :  { %v1533_v24 = vadd.f32 %v4922_v23, %v4518_v4 }
 0xa22   :  { %v1527_v25 = vpop.f32.mrf.mxu0 }
 0xa23   :  { %v1543_v26 = vmul.f32 0.044715, %v1533_v24  ;;  %v1528_v27 = vadd.f32 %v4518_v4, %v1527_v25  ;;  %v1539_v52 = vmul.f32 0.5, %v1533_v24 }
 0xa25   :  { %v1547_v28 = vmul.f32 %v1543_v26, %v1533_v24  ;;  %v1542_v29 = vmul.f32 0.044715, %v1528_v27  ;;  %v1538_v50 = vmul.f32 0.5, %v1528_v27  ;;  %v1761_v26 = vld [vmem:[%s4461_s11 + $0x18] sm:$0xff] }
 0xa26   :  { %4961 = vmatprep.subr.mxu0 %v1761_v26 }
 0xa27   :  { %v5275_v30 = vpop.eup %5274  ;;  %v1546_v31 = vmul.f32 %v1542_v29, %v1528_v27  ;;  %v1551_v32 = vmul.f32 %v1547_v28, %v1533_v24  ;;  %4962 = vmatpush3.msra.mxu0 %v1761_v26  ;;  %v1759_v28 = vld [vmem:[%s4461_s11 + $0x8] sm:$0xff]  ;;  %v1758_v29 = vld [vmem:[%s4461_s11] sm:$0xff] }
 0xa28   :  { %v1565_v38 = vadd.f32 1.0, %v5275_v30 }
 0xa29   :  { %v5277_v37 = vpop.eup %5276  ;;  %v1550_v34 = vmul.f32 %v1546_v31, %v1528_v27  ;;  %v1555_v33 = vadd.f32 %v1551_v32, %v1533_v24 }
 0xa2a   :  { %v1564_v36 = vadd.f32 1.0, %v5277_v37  ;;  %v1569_v43 = vmul.f32 %v1565_v38, %v1537_v39  ;;  %v4524_v39 = vld [vmem:[%s4459_s15] ss:$0 sm:$0xff]  ;;  %s4465_s15 = sld [smem:[%s6093_s0 + %s5409_s12]]  }
 0xa2b   :  { %v1554_v40 = vadd.f32 %v1550_v34, %v1528_v27  ;;  %v1559_v41 = vmul.f32 0.7978846, %v1555_v33  ;;  %v1760_v27 = vld [vmem:[%s4461_s11 + $0x10] sm:$0xff]  ;;  %s4467_s11 = sld [smem:[%s6093_s0 + %s5408_s8]]  }
 0xa2c   :  { %v1568_v42 = vmul.f32 %v1564_v36, %v1536_v35  ;;  %4963 = vmatprep.subr.mxu0 %v1760_v27 }
 0xa2d   :  { %v1558_v44 = vmul.f32 0.7978846, %v1554_v40  ;;  %5278 = vtanh.f32 %v1559_v41  ;;  %4964 = vmatpush3.msra.mxu0 %v1760_v27 }
 0xa2e   :  { %4955 = vmatprep.mubr.f32.mxu1 %v1568_v42  ;;  %4965 = vmatprep.subr.mxu0 %v1759_v28 }
 0xa2f   :  { %4956 = vmatmul.mubr.f32.vlgmr.msra.gmra.mxu1 %v1569_v43  ;;  %5280 = vtanh.f32 %v1558_v44  ;;  %4966 = vmatpush3.msra.mxu0 %v1759_v28 }
 0xa30   :  { %4967 = vmatprep.subr.mxu0 %v1758_v29 }
 0xa31   :  { %4968 = vmatpush3.msra.mxu0 %v1758_v29 }
 0xa3a   :  { %v5279_v46 = vpop.eup %5278 }
 0xa3b   :  { %v1567_v49 = vadd.f32 1.0, %v5279_v46 }
 0xa3c   :  { %v5281_v48 = vpop.eup %5280 }
 0xa3d   :  { %v1566_v51 = vadd.f32 1.0, %v5281_v48  ;;  %v1571_v8 = vmul.f32 %v1567_v49, %v1539_v52  ;;  %v4525_v49 = vld [vmem:[%s4460_s19] ss:$0 sm:$0xff]  ;;  %s4466_s19 = sld [smem:[%s6093_s0 + %s5410_s16]]  }
 0xa3f   :  { %v1570_v53 = vmul.f32 %v1566_v51, %v1538_v50 }
 0xa41   :  { %4958 = vmatprep.mubr.f32.mxu1 %v1570_v53 }
 0xa42   :  { %4959 = vmatmul.mubr.f32.gmra.mxu1 %v1571_v8 }
 0xaef   :  { %v4957_v55 = vpop.f32.mrf.mxu1 }
 0xaf0   :  { %v1667_v6 = vadd.f32 %v4957_v55, %v4523_v54 }
 0xaf1   :  { %v1661_v58 = vpop.f32.mrf.mxu1 }
 0xaf2   :  { %v5671_v59 = vadd.f32 %v1667_v6, %v5603_v45  ;;  %v1662_v60 = vadd.f32 %v4523_v54, %v1661_v58 }
 0xaf4   :  { %v5674_v61 = vadd.f32 %v1662_v60, %v5606_v47  ;;  %v1689_v62 = vsel %vm138_vm0, %v5671_v59, 0.0 }
 0xaf5   :  { %1690 = vadd.xlane.f32.xlu1 %v1689_v62 }
 0xaf6   :  { %v1686_v63 = vsel %vm138_vm0, %v5674_v61, 0.0 }
 0xaf7   :  { %1687 = vadd.xlane.f32.xlu0 %v1686_v63 }
 0xb02   :  { %v4960_v9 = vpop.f32.mrf.mxu1 }
 0xb03   :  { %v1677_v7 = vadd.f32 %v4960_v9, %v4523_v54  ;;  %v4526_v9 = vld [vmem:[%s4462_s23] ss:$0 sm:$0xff]  ;;  %s6038_s23 = sld [smem:[%s6093_s0 + %s5411_s20]]  }
 0xb04   :  { %v1671_v0 = vpop.f32.mrf.mxu1 }
 0xb05   :  { %v5681_v1 = vadd.f32 %v1677_v7, %v5616_v57  ;;  %v1672_v45 = vadd.f32 %v4523_v54, %v1671_v0 }
 0xb07   :  { %v5684_v2 = vadd.f32 %v1672_v45, %v5614_v56  ;;  %v1695_v47 = vsel %vm138_vm0, %v5681_v1, 0.0 }
 0xb08   :  { %1696 = vadd.xlane.f32.xlu1 %v1695_v47 }
 0xb09   :  { %v1692_v3 = vsel %vm138_vm0, %v5684_v2, 0.0 }
 0xb0a   :  { %1693 = vadd.xlane.f32.xlu0 %v1692_v3 }
 0xb7e   :  { %v1691_v4 = vpop.xlane.xlu1 %1690 }
 0xb7f   :  { %v1699_v12 = vmul.f32 0.03125, %v1691_v4 }
 0xb80   :  { %v1688_v10 = vpop.xlane.xlu0 %1687 }
 0xb81   :  { %v1703_v5 = vsub.f32 %v5671_v59, %v1699_v12  ;;  %v1698_v14 = vmul.f32 0.03125, %v1688_v10 }
 0xb83   :  { %v1702_v57 = vsub.f32 %v5674_v61, %v1698_v14  ;;  %v1707_v11 = vmul.f32 %v1703_v5, %v1703_v5 }
 0xb85   :  { %v1713_v56 = vsel %vm138_vm0, %v1707_v11, 0.0  ;;  %v1706_v13 = vmul.f32 %v1702_v57, %v1702_v57 }
 0xb86   :  { %1714 = vadd.xlane.f32.xlu1 %v1713_v56 }
 0xb87   :  { %v1710_v16 = vsel %vm138_vm0, %v1706_v13, 0.0 }
 0xb88   :  { %1711 = vadd.xlane.f32.xlu0 %v1710_v16 }
 0xb91   :  { %v1697_v15 = vpop.xlane.xlu1 %1696 }
 0xb92   :  { %v1701_v17 = vmul.f32 0.03125, %v1697_v15 }
 0xb93   :  { %v1694_v18 = vpop.xlane.xlu0 %1693 }
 0xb94   :  { %v1705_v19 = vsub.f32 %v5681_v1, %v1701_v17  ;;  %v1700_v20 = vmul.f32 0.03125, %v1694_v18 }
 0xb96   :  { %v1704_v21 = vsub.f32 %v5684_v2, %v1700_v20  ;;  %v1709_v22 = vmul.f32 %v1705_v19, %v1705_v19 }
 0xb98   :  { %v1719_v23 = vsel %vm138_vm0, %v1709_v22, 0.0  ;;  %v1708_v24 = vmul.f32 %v1704_v21, %v1704_v21 }
 0xb99   :  { %1720 = vadd.xlane.f32.xlu1 %v1719_v23 }
 0xb9a   :  { %v1716_v25 = vsel %vm138_vm0, %v1708_v24, 0.0 }
 0xb9b   :  { %1717 = vadd.xlane.f32.xlu0 %v1716_v25 }
 0xc0f   :  { %v1715_v30 = vpop.xlane.xlu1 %1714 }
 0xc10   :  { %v1723_v31 = vmul.f32 0.03125, %v1715_v30 }
 0xc11   :  { %v1712_v32 = vpop.xlane.xlu0 %1711 }
 0xc12   :  { %v1727_v37 = vadd.f32 1e-05, %v1723_v31  ;;  %v1722_v38 = vmul.f32 0.03125, %v1712_v32 }
 0xc14   :  { %5282 = vrsqrt.f32 %v1727_v37  ;;  %v1726_v34 = vadd.f32 1e-05, %v1722_v38 }
 0xc16   :  { %5284 = vrsqrt.f32 %v1726_v34 }
 0xc21   :  { %v5283_v33 = vpop.eup %5282 }
 0xc22   :  { %v1735_v35 = vmul.f32 %v5283_v33, %v1703_v5  ;;  %v1721_v36 = vpop.xlane.xlu1 %1720 }
 0xc23   :  { %v5285_v40 = vpop.eup %5284  ;;  %v1725_v41 = vmul.f32 0.03125, %v1721_v36 }
 0xc24   :  { %v1718_v42 = vpop.xlane.xlu0 %1717  ;;  %v1734_v43 = vmul.f32 %v5285_v40, %v1702_v57  ;;  %v1745_v48 = vmul.f32 %v4524_v39, %v1735_v35 }
 0xc25   :  { %v1729_v44 = vadd.f32 1e-05, %v1725_v41  ;;  %v1724_v46 = vmul.f32 0.03125, %v1718_v42 }
 0xc26   :  { %v1744_v50 = vmul.f32 %v4524_v39, %v1734_v43  ;;  %v1755_v53 = vadd.f32 %v4525_v49, %v1745_v48 }
 0xc27   :  { %5286 = vrsqrt.f32 %v1729_v44  ;;  %v1728_v51 = vadd.f32 1e-05, %v1724_v46 }
 0xc28   :  { %v1754_v52 = vadd.f32 %v4525_v49, %v1744_v50 }
 0xc29   :  { %5288 = vrsqrt.f32 %v1728_v51 }
 0xc2a   :  { %4969 = vmatprep.mubr.msk.f32.mxu0 %vm138_vm0, %v1754_v52 }
 0xc2b   :  { %4970 = vmatmul.mubr.msk.f32.vlgmr.msra.gmra.mxu0 %vm138_vm0, %v1755_v53 }
 0xc34   :  { %v5287_v8 = vpop.eup %5286 }
 0xc35   :  { %v1737_v54 = vmul.f32 %v5287_v8, %v1705_v19 }
 0xc36   :  { %v5289_v55 = vpop.eup %5288 }
 0xc37   :  { %v1736_v6 = vmul.f32 %v5289_v55, %v1704_v21  ;;  %v1747_v58 = vmul.f32 %v4524_v39, %v1737_v54 }
 0xc39   :  { %v1746_v60 = vmul.f32 %v4524_v39, %v1736_v6  ;;  %v1757_v63 = vadd.f32 %v4525_v49, %v1747_v58 }
 0xc3b   :  { %v1756_v62 = vadd.f32 %v4525_v49, %v1746_v60 }
 0xc3d   :  { %4972 = vmatprep.mubr.msk.f32.mxu0 %vm138_vm0, %v1756_v62 }
 0xc3e   :  { %4973 = vmatmul.mubr.msk.f32.gmra.mxu0 %vm138_vm0, %v1757_v63 }
 0xceb   :  { %v4971_v7 = vpop.f32.mrf.mxu0 }
 0xcec   :  { %v5714_v0 = vadd.f32 %v4971_v7, %v4526_v9 }
 0xced   :  { %v1847_v45 = vpop.f32.mrf.mxu0 }
 0xcee   :  { %v5716_v47 = vadd.f32 %v4526_v9, %v1847_v45  ;;  %1874 = vrot.lane.b32.xlu0 %v5714_v0, %s5383_s26 }
 0xcf0   :  { %1872 = vrot.lane.b32.xlu1 %v5716_v47, %s5383_s26  ;;  %4979 = vmatprep.mubr.msk.f32.mxu0 %vm1876_vm2, %v5716_v47 }
 0xcfe   :  { %v4974_v3 = vpop.f32.mrf.mxu0 }
 0xcff   :  { %v5724_v4 = vadd.f32 %v4974_v3, %v4526_v9 }
 0xd00   :  { %v1857_v12 = vpop.f32.mrf.mxu0 }
 0xd01   :  { %1964 = vrot.lane.b32.xlu1 %v5724_v4, %s5383_s26  ;;  %v5728_v10 = vadd.f32 %v4526_v9, %v1857_v12 }
 0xd05   :  { %1962 = vrot.lane.b32.xlu1 %v5728_v10, %s5383_s26  ;;  %s5400_s26 = smov 88  }
 0xd60   :  { %v1875_v5 = vpop.permute.xlu0 %1874 }
 0xd61   :  { %4975 = vmatprep.subr.msk.mxu0 %vm1876_vm2, %v1875_v5 }
 0xd62   :  { %v1873_v14 = vpop.permute.xlu1 %1872  ;;  %4976 = vmatpush3.xpose.msk.msra.mxu0 %vm1876_vm2, %v1875_v5 }
 0xd63   :  { %4977 = vmatprep.subr.msk.mxu0 %vm1876_vm2, %v1873_v14 }
 0xd66   :  { %4978 = vmatpush3.xpose.msk.msra.mxu0 %vm1876_vm2, %v1873_v14 }
 0xd69   :  { %4980 = vmatmul.mubr.msk.f32.vlgmr.msra.gmra.mxu0 %vm1876_vm2, %v5714_v0 }
 0xd6a   :  { %4986 = vmatprep.mubr.msk.f32.mxu0 %vm1876_vm2, %v5728_v10 }
 0xd73   :  { %v1965_v57 = vpop.permute.xlu1 %1964 }
 0xd74   :  { %4982 = vmatprep.subr.msk.mxu0 %vm1876_vm2, %v1965_v57 }
 0xd75   :  { %4983 = vmatpush3.xpose.msk.msra.mxu0 %vm1876_vm2, %v1965_v57 }
 0xd77   :  { %v1963_v11 = vpop.permute.xlu1 %1962 }
 0xd78   :  { %4984 = vmatprep.subr.msk.mxu0 %vm1876_vm2, %v1963_v11 }
 0xd79   :  { %4985 = vmatpush3.xpose.msk.msra.mxu0 %vm1876_vm2, %v1963_v11 }
 0xd7c   :  { %4987 = vmatmul.mubr.msk.f32.vlgmr.msra.gmra.mxu0 %vm1876_vm2, %v5724_v4 }
 0xe29   :  { %v4981_v56 = vpop.f32.mrf.mxu0 }
 0xe2a   :  { %v2052_v13 = vsel %vm330_vm1, %v4981_v56, -inf }
 0xe2b   :  { %2053 = vmax.xlane.f32.xlu1 %v2052_v13  ;;  %v1951_v16 = vpop.f32.mrf.mxu0 }
 0xe2c   :  { %v2049_v15 = vsel %vm330_vm1, %v1951_v16, -inf }
 0xe2d   :  { %2050 = vmax.xlane.f32.xlu0 %v2049_v15 }
 0xe3c   :  { %v4988_v17 = vpop.f32.mrf.mxu0 }
 0xe3d   :  { %v2058_v20 = vsel %vm330_vm1, %v4988_v17, -inf }
 0xe3e   :  { %v2040_v18 = vpop.f32.mrf.mxu0 }
 0xe3f   :  { %v2055_v19 = vsel %vm330_vm1, %v2040_v18, -inf }
 0xe40   :  { %2056 = vmax.xlane.f32.xlu0 %v2055_v19 }
 0xe44   :  { %2059 = vmax.xlane.f32.xlu0 %v2058_v20 }
 0xeb4   :  { %v2054_v21 = vpop.xlane.xlu1 %2053 }
 0xeb5   :  { %v2062_v22 = vsub.f32 %v4981_v56, %v2054_v21 }
 0xeb6   :  { %v2051_v23 = vpop.xlane.xlu0 %2050 }
 0xeb7   :  { %v2067_v24 = vmul.f32 1.442695, %v2062_v22  ;;  %v2061_v25 = vsub.f32 %v1951_v16, %v2051_v23 }
 0xeb9   :  { %5290 = vpow2.f32 %v2067_v24  ;;  %v2065_v26 = vmul.f32 1.442695, %v2061_v25 }
 0xebb   :  { %5292 = vpow2.f32 %v2065_v26 }
 0xec6   :  { %v5291_v27 = vpop.eup %5290 }
 0xec7   :  { %v2076_v28 = vsel %vm330_vm1, %v5291_v27, 0.0 }
 0xec8   :  { %v5293_v29 = vpop.eup %5292  ;;  %2077 = vadd.xlane.f32.xlu1 %v2076_v28 }
 0xec9   :  { %v2073_v30 = vsel %vm330_vm1, %v5293_v29, 0.0  ;;  %v2057_v31 = vpop.xlane.xlu0 %2056 }
 0xeca   :  { %2074 = vadd.xlane.f32.xlu0 %v2073_v30  ;;  %v2063_v32 = vsub.f32 %v2040_v18, %v2057_v31 }
 0xecc   :  { %v2069_v38 = vmul.f32 1.442695, %v2063_v32 }
 0xecd   :  { %v2060_v37 = vpop.xlane.xlu0 %2059 }
 0xece   :  { %v2064_v34 = vsub.f32 %v4988_v17, %v2060_v37  ;;  %5294 = vpow2.f32 %v2069_v38 }
 0xed0   :  { %v2071_v33 = vmul.f32 1.442695, %v2064_v34 }
 0xed2   :  { %5296 = vpow2.f32 %v2071_v33 }
 0xed9   :  { %2105 = vrot.lane.b32.xlu1 %v5716_v47, %s5385_s28 }
 0xedb   :  { %v5759_v35 = vpop.eup %5294 }
 0xedc   :  { %v2079_v36 = vsel %vm330_vm1, %v5759_v35, 0.0 }
 0xedd   :  { %2194 = vrot.lane.b32.xlu1 %v5724_v4, %s5385_s28 }
 0xedf   :  { %v5763_v39 = vpop.eup %5296 }
 0xee0   :  { %2107 = vrot.lane.b32.xlu0 %v5714_v0, %s5385_s28  ;;  %v2082_v40 = vsel %vm330_vm1, %v5763_v39, 0.0 }
 0xee1   :  { %2285 = vrot.lane.b32.xlu1 %v5714_v0, %s5400_s26 }
 0xeff   :  { %2080 = vadd.xlane.f32.xlu0 %v2079_v36 }
 0xf05   :  { %2083 = vadd.xlane.f32.xlu1 %v2082_v40 }
 0xf15   :  { %2192 = vrot.lane.b32.xlu0 %v5728_v10, %s5385_s28  ;;  %s5402_s28 = smov 18  }
 0xf16   :  { %2283 = vrot.lane.b32.xlu1 %v5716_v47, %s5400_s26  ;;  %s5819_s2 = sld [smem:[%s6093_s0 + %s5402_s28]]  }
 0xf19   :  { %2376 = vrot.lane.b32.xlu0 %v5724_v4, %s5400_s26 }
 0xf1a   :  { %2279 = vrot.lane.b32.xlu1 %v5716_v47, %s5401_s24 }
 0xf1d   :  { %2281 = vrot.lane.b32.xlu0 %v5714_v0, %s5401_s24 }
 0xf1e   :  { %2374 = vrot.lane.b32.xlu1 %v5728_v10, %s5400_s26  ;;  %s5412_s26 = smov 23  }
 0xf1f   :  { %s4468_s25 = sld [smem:[%s6093_s0 + %s5412_s26]]  }
 0xf21   :  { %2370 = vrot.lane.b32.xlu0 %v5728_v10, %s5401_s24 }
 0xf22   :  { %2372 = vrot.lane.b32.xlu1 %v5724_v4, %s5401_s24 }
 0xf51   :  { %v2078_v41 = vpop.xlane.xlu1 %2077 }
 0xf52   :  { %5298 = vrcp.f32 %v2078_v41 }
 0xf53   :  { %v2075_v42 = vpop.xlane.xlu0 %2074 }
 0xf54   :  { %5300 = vrcp.f32 %v2075_v42 }
 0xf55   :  { %v2106_v43 = vpop.permute.xlu1 %2105 }
 0xf57   :  { %v2108_v44 = vpop.permute.xlu0 %2107 }
 0xf58   :  { %4989 = vmatprep.subr.mxu0 %v2108_v44 }
 0xf59   :  { %v2195_v46 = vpop.permute.xlu1 %2194  ;;  %4990 = vmatpush3.msra.mxu0 %v2108_v44 }
 0xf5a   :  { %4991 = vmatprep.subr.mxu0 %v2106_v43 }
 0xf5b   :  { %4992 = vmatpush3.msra.mxu0 %v2106_v43 }
 0xf5c   :  { %4996 = vmatprep.subr.mxu0 %v2195_v46 }
 0xf5d   :  { %v2286_v48 = vpop.permute.xlu1 %2285 }
 0xf5e   :  { %5003 = vmatprep.subr.msk.mxu1 %vm1876_vm2, %v2286_v48 }
 0xf5f   :  { %v5299_v49 = vpop.eup %5298  ;;  %5004 = vmatpush3.xpose.msk.msra.mxu1 %vm1876_vm2, %v2286_v48 }
 0xf60   :  { %v2090_v50 = vmul.f32 %v5299_v49, %v2078_v41 }
 0xf61   :  { %v5301_v51 = vpop.eup %5300 }
 0xf62   :  { %v2094_v52 = vsub.f32 2.0, %v2090_v50  ;;  %v2089_v53 = vmul.f32 %v5301_v51, %v2075_v42 }
 0xf64   :  { %v2093_v8 = vsub.f32 2.0, %v2089_v53  ;;  %v2098_v54 = vmul.f32 %v5299_v49, %v2094_v52 }
 0xf66   :  { %v2097_v55 = vmul.f32 %v5301_v51, %v2093_v8  ;;  %v2102_v58 = vmul.f32 %v5291_v27, %v2098_v54  ;;  %v1867_v54 = vld [vmem:[%s5819_s2 + $0x8] sm:$0xff] }
 0xf68   :  { %v2101_v6 = vmul.f32 %v5293_v29, %v2097_v55 }
 0xf6a   :  { %4993 = vmatprep.mubr.msk.f32.mxu0 %vm330_vm1, %v2101_v6 }
 0xf6b   :  { %4994 = vmatmul.mubr.msk.f32.vlgmr.msra.gmra.mxu0 %vm330_vm1, %v2102_v58 }
 0xf6c   :  { %4997 = vmatpush3.msra.mxu0 %v2195_v46 }
 0xf88   :  { %v2081_v60 = vpop.xlane.xlu0 %2080 }
 0xf89   :  { %5302 = vrcp.f32 %v2081_v60 }
 0xf8c   :  { %v2193_v62 = vpop.permute.xlu0 %2192 }
 0xf8d   :  { %4998 = vmatprep.subr.mxu0 %v2193_v62 }
 0xf8e   :  { %v2084_v63 = vpop.xlane.xlu1 %2083  ;;  %4999 = vmatpush3.msra.mxu0 %v2193_v62 }
 0xf8f   :  { %5304 = vrcp.f32 %v2084_v63 }
 0xf90   :  { %v2377_v9 = vpop.permute.xlu0 %2376 }
 0xf91   :  { %5010 = vmatprep.subr.msk.mxu0 %vm1876_vm2, %v2377_v9 }
 0xf92   :  { %v2284_v7 = vpop.permute.xlu1 %2283 }
 0xf93   :  { %5005 = vmatprep.subr.msk.mxu1 %vm1876_vm2, %v2284_v7 }
 0xf94   :  { %5006 = vmatpush3.xpose.msk.msra.mxu1 %vm1876_vm2, %v2284_v7  ;;  %v2282_v5 = vpop.permute.xlu0 %2281 }
 0xf96   :  { %v5303_v45 = vpop.eup %5302  ;;  %v2280_v3 = vpop.permute.xlu1 %2279 }
 0xf97   :  { %v2091_v12 = vmul.f32 %v5303_v45, %v2081_v60  ;;  %5007 = vmatprep.mubr.msk.f32.mxu1 %vm1876_vm2, %v2280_v3 }
 0xf98   :  { %5008 = vmatmul.mubr.msk.f32.vlgmr.msra.gmra.mxu1 %vm1876_vm2, %v2282_v5  ;;  %v2371_v18 = vpop.permute.xlu0 %2370 }
 0xf99   :  { %v2095_v14 = vsub.f32 2.0, %v2091_v12 }
 0xf9a   :  { %v2375_v19 = vpop.permute.xlu1 %2374 }
 0xf9b   :  { %v2099_v57 = vmul.f32 %v5303_v45, %v2095_v14 }
 0xf9c   :  { %v5305_v11 = vpop.eup %5304 }
 0xf9d   :  { %v2103_v56 = vmul.f32 %v5759_v35, %v2099_v57  ;;  %v2092_v13 = vmul.f32 %v5305_v11, %v2084_v63 }
 0xf9e   :  { %v2373_v20 = vpop.permute.xlu1 %2372 }
 0xf9f   :  { %v2096_v16 = vsub.f32 2.0, %v2092_v13  ;;  %5000 = vmatprep.mubr.msk.f32.mxu0 %vm330_vm1, %v2103_v56 }
 0xfa1   :  { %v2100_v15 = vmul.f32 %v5305_v11, %v2096_v16 }
 0xfa3   :  { %v2104_v17 = vmul.f32 %v5763_v39, %v2100_v15 }
 0xfa5   :  { %5001 = vmatmul.mubr.msk.f32.vlgmr.msra.gmra.mxu0 %vm330_vm1, %v2104_v17 }
 0xfa6   :  { %5011 = vmatpush3.xpose.msk.msra.mxu0 %vm1876_vm2, %v2377_v9  ;;  %5014 = vmatprep.mubr.msk.f32.mxu0 %vm1876_vm2, %v2371_v18 }
 0xfa7   :  { %5012 = vmatprep.subr.msk.mxu0 %vm1876_vm2, %v2375_v19 }
 0xfaa   :  { %5013 = vmatpush3.xpose.msk.msra.mxu0 %vm1876_vm2, %v2375_v19  ;;  %v1866_v19 = vld [vmem:[%s5819_s2] sm:$0xff] }
 0xfab   :  { %5031 = vmatprep.subr.mxu0 %v1867_v54 }
 0xfad   :  { %5015 = vmatmul.mubr.msk.f32.vlgmr.msra.gmra.mxu0 %vm1876_vm2, %v2373_v20 }
 0xfae   :  { %5032 = vmatpush3.msra.mxu0 %v1867_v54 }
0x102b   :  { %v5796_v25 = vpop.f32.mrf.mxu0 }
0x102d   :  { %v5798_v26 = vpop.f32.mrf.mxu0 }
0x1058   :  { %v5009_v21 = vpop.f32.mrf.mxu1 }
0x1059   :  { %v2464_v22 = vsel %vm330_vm1, %v5009_v21, -inf }
0x105a   :  { %2465 = vmax.xlane.f32.xlu1 %v2464_v22  ;;  %v2361_v23 = vpop.f32.mrf.mxu1 }
0x105b   :  { %v2461_v24 = vsel %vm330_vm1, %v2361_v23, -inf }
0x105c   :  { %2462 = vmax.xlane.f32.xlu0 %v2461_v24 }
0x1065   :  { %v5800_v27 = vpop.f32.mrf.mxu0 }
0x1067   :  { %v5802_v28 = vpop.f32.mrf.mxu0 }
0x106d   :  { %v5016_v29 = vpop.f32.mrf.mxu0 }
0x106e   :  { %v2470_v32 = vsel %vm330_vm1, %v5016_v29, -inf }
0x106f   :  { %v2452_v30 = vpop.f32.mrf.mxu0 }
0x1070   :  { %v2467_v31 = vsel %vm330_vm1, %v2452_v30, -inf }
0x1071   :  { %2468 = vmax.xlane.f32.xlu0 %v2467_v31 }
0x1075   :  { %2471 = vmax.xlane.f32.xlu0 %v2470_v32 }
0x10e3   :  { %v2466_v37 = vpop.xlane.xlu1 %2465 }
0x10e4   :  { %v2474_v38 = vsub.f32 %v5009_v21, %v2466_v37 }
0x10e5   :  { %v2463_v34 = vpop.xlane.xlu0 %2462 }
0x10e6   :  { %v2479_v33 = vmul.f32 1.442695, %v2474_v38  ;;  %v2473_v35 = vsub.f32 %v2361_v23, %v2463_v34 }
0x10e8   :  { %5306 = vpow2.f32 %v2479_v33  ;;  %v2477_v36 = vmul.f32 1.442695, %v2473_v35 }
0x10ea   :  { %5308 = vpow2.f32 %v2477_v36 }
0x10f5   :  { %v5307_v39 = vpop.eup %5306 }
0x10f6   :  { %v2488_v40 = vsel %vm330_vm1, %v5307_v39, 0.0 }
0x10f7   :  { %v5309_v41 = vpop.eup %5308  ;;  %2489 = vadd.xlane.f32.xlu1 %v2488_v40 }
0x10f8   :  { %v2485_v42 = vsel %vm330_vm1, %v5309_v41, 0.0 }
0x10f9   :  { %2486 = vadd.xlane.f32.xlu0 %v2485_v42 }
0x10fa   :  { %v2469_v43 = vpop.xlane.xlu0 %2468 }
0x10fb   :  { %v2475_v44 = vsub.f32 %v2452_v30, %v2469_v43 }
0x10fd   :  { %v2481_v46 = vmul.f32 1.442695, %v2475_v44 }
0x10fe   :  { %v2472_v48 = vpop.xlane.xlu0 %2471 }
0x10ff   :  { %5310 = vpow2.f32 %v2481_v46  ;;  %v2476_v49 = vsub.f32 %v5016_v29, %v2472_v48 }
0x1101   :  { %v2483_v50 = vmul.f32 1.442695, %v2476_v49 }
0x1103   :  { %5312 = vpow2.f32 %v2483_v50 }
0x110c   :  { %v5808_v51 = vpop.eup %5310 }
0x110d   :  { %v2491_v52 = vsel %vm330_vm1, %v5808_v51, 0.0 }
0x110e   :  { %2492 = vadd.xlane.f32.xlu0 %v2491_v52 }
0x1110   :  { %v5812_v53 = vpop.eup %5312 }
0x1111   :  { %v2494_v8 = vsel %vm330_vm1, %v5812_v53, 0.0 }
0x1112   :  { %2495 = vadd.xlane.f32.xlu1 %v2494_v8 }
0x1123   :  { %2517 = vrot.lane.b32.xlu1 %v5716_v47, %s5403_s3 }
0x1124   :  { %2519 = vrot.lane.b32.xlu0 %v5714_v0, %s5403_s3 }
0x1127   :  { %2606 = vrot.lane.b32.xlu1 %v5724_v4, %s5403_s3 }
0x1128   :  { %2891 = vrot.lane.b32.xlu0 %v5714_v0, %s5384_s27 }
0x112b   :  { %2604 = vrot.lane.b32.xlu1 %v5728_v10, %s5403_s3 }
0x112c   :  { %2982 = vrot.lane.b32.xlu0 %v5724_v4, %s5384_s27 }
0x112f   :  { %2889 = vrot.lane.b32.xlu1 %v5716_v47, %s5384_s27 }
0x1130   :  { %2887 = vrot.lane.b32.xlu0 %v5714_v0, %s5386_s29 }
0x1133   :  { %2885 = vrot.lane.b32.xlu1 %v5716_v47, %s5386_s29 }
0x1134   :  { %2976 = vrot.lane.b32.xlu0 %v5728_v10, %s5386_s29 }
0x1137   :  { %2980 = vrot.lane.b32.xlu1 %v5728_v10, %s5384_s27  ;;  %s5404_s27 = smov 72  }
0x113b   :  { %2978 = vrot.lane.b32.xlu1 %v5724_v4, %s5386_s29  ;;  %s5405_s29 = smov 104  }
0x1180   :  { %v2490_v55 = vpop.xlane.xlu1 %2489 }
0x1182   :  { %v2487_v6 = vpop.xlane.xlu0 %2486 }
0x1183   :  { %5314 = vrcp.f32 %v2487_v6 }
0x1184   :  { %5316 = vrcp.f32 %v2490_v55 }
0x1190   :  { %v5315_v58 = vpop.eup %5314 }
0x1191   :  { %v5317_v60 = vpop.eup %5316  ;;  %v2501_v62 = vmul.f32 %v5315_v58, %v2487_v6 }
0x1192   :  { %v2502_v9 = vmul.f32 %v5317_v60, %v2490_v55 }
0x1193   :  { %v2505_v63 = vsub.f32 2.0, %v2501_v62 }
0x1194   :  { %v2506_v12 = vsub.f32 2.0, %v2502_v9 }
0x1195   :  { %v2509_v7 = vmul.f32 %v5315_v58, %v2505_v63 }
0x1196   :  { %v2510_v57 = vmul.f32 %v5317_v60, %v2506_v12 }
0x1197   :  { %v2513_v45 = vmul.f32 %v5309_v41, %v2509_v7  ;;  %v2493_v3 = vpop.xlane.xlu0 %2492 }
0x1198   :  { %5318 = vrcp.f32 %v2493_v3  ;;  %v2514_v13 = vmul.f32 %v5307_v39, %v2510_v57 }
0x1199   :  { %5021 = vmatprep.mubr.msk.f32.mxu1 %vm330_vm1, %v2513_v45 }
0x119b   :  { %v2496_v5 = vpop.xlane.xlu1 %2495  ;;  %v2520_v14 = vpop.permute.xlu0 %2519 }
0x119c   :  { %5320 = vrcp.f32 %v2496_v5  ;;  %5017 = vmatprep.subr.mxu1 %v2520_v14 }
0x119d   :  { %5018 = vmatpush3.msra.mxu1 %v2520_v14 }
0x119f   :  { %v2518_v11 = vpop.permute.xlu1 %2517  ;;  %v2892_v56 = vpop.permute.xlu0 %2891 }
0x11a0   :  { %5019 = vmatprep.subr.mxu1 %v2518_v11  ;;  %5047 = vmatprep.subr.msk.mxu0 %vm1876_vm2, %v2892_v56 }
0x11a1   :  { %5020 = vmatpush3.msra.mxu1 %v2518_v11 }
0x11a2   :  { %5022 = vmatmul.mubr.msk.f32.vlgmr.msra.gmra.mxu1 %vm330_vm1, %v2514_v13 }
0x11a3   :  { %v2607_v16 = vpop.permute.xlu1 %2606  ;;  %v2983_v32 = vpop.permute.xlu0 %2982 }
0x11a4   :  { %5024 = vmatprep.subr.mxu1 %v2607_v16 }
0x11a5   :  { %v5319_v15 = vpop.eup %5318  ;;  %5025 = vmatpush3.msra.mxu1 %v2607_v16 }
0x11a6   :  { %v2503_v17 = vmul.f32 %v5319_v15, %v2493_v3 }
0x11a7   :  { %v2605_v18 = vpop.permute.xlu1 %2604  ;;  %v2888_v34 = vpop.permute.xlu0 %2887 }
0x11a8   :  { %v2507_v20 = vsub.f32 2.0, %v2503_v17  ;;  %5026 = vmatprep.subr.mxu1 %v2605_v18 }
0x11a9   :  { %v5321_v21 = vpop.eup %5320  ;;  %5027 = vmatpush3.msra.mxu1 %v2605_v18 }
0x11aa   :  { %v2511_v22 = vmul.f32 %v5319_v15, %v2507_v20  ;;  %v2504_v23 = vmul.f32 %v5321_v21, %v2496_v5  ;;  %5039 = vmatprep.subr.mxu1 %v1866_v19 }
0x11ab   :  { %v2890_v24 = vpop.permute.xlu1 %2889  ;;  %v2977_v35 = vpop.permute.xlu0 %2976 }
0x11ac   :  { %v2515_v29 = vmul.f32 %v5808_v51, %v2511_v22  ;;  %v2508_v30 = vsub.f32 2.0, %v2504_v23 }
0x11ae   :  { %v2512_v31 = vmul.f32 %v5321_v21, %v2508_v30  ;;  %5028 = vmatprep.mubr.msk.f32.mxu1 %vm330_vm1, %v2515_v29  ;;  %v1868_v29 = vld [vmem:[%s5819_s2 + $0x10] sm:$0xff] }
0x11af   :  { %v2886_v38 = vpop.permute.xlu1 %2885 }
0x11b0   :  { %v2516_v37 = vmul.f32 %v5812_v53, %v2512_v31 }
0x11b2   :  { %5029 = vmatmul.mubr.msk.f32.vlgmr.msra.gmra.mxu1 %vm330_vm1, %v2516_v37 }
0x11b3   :  { %5040 = vmatpush3.msra.mxu1 %v1866_v19  ;;  %5041 = vmatprep.mubr.msk.f32.mxu1 %vm1876_vm2, %v5798_v26  ;;  %v2981_v33 = vpop.permute.xlu1 %2980 }
0x11b4   :  { %5054 = vmatprep.subr.msk.mxu1 %vm1876_vm2, %v2983_v32 }
0x11b6   :  { %5042 = vmatmul.mubr.msk.f32.vlgmr.msra.gmra.mxu1 %vm1876_vm2, %v5796_v25 }
0x11b7   :  { %5055 = vmatpush3.xpose.msk.msra.mxu1 %vm1876_vm2, %v2983_v32  ;;  %5044 = vmatprep.mubr.msk.f32.mxu1 %vm1876_vm2, %v5802_v28  ;;  %v2979_v26 = vpop.permute.xlu1 %2978 }
0x11b8   :  { %5056 = vmatprep.subr.msk.mxu1 %vm1876_vm2, %v2981_v33 }
0x11ba   :  { %5045 = vmatmul.mubr.msk.f32.gmra.mxu1 %vm1876_vm2, %v5800_v27 }
0x11bb   :  { %5057 = vmatpush3.xpose.msk.msra.mxu1 %vm1876_vm2, %v2981_v33  ;;  %5058 = vmatprep.mubr.msk.f32.mxu1 %vm1876_vm2, %v2977_v35 }
0x11be   :  { %5059 = vmatmul.mubr.msk.f32.vlgmr.msra.gmra.mxu1 %vm1876_vm2, %v2979_v26 }
0x1262   :  { %v5023_v25 = vpop.f32.mrf.mxu1 }
0x1264   :  { %v2595_v36 = vpop.f32.mrf.mxu1 }
0x1265   :  { %5033 = vmatprep.mubr.msk.f32.mxu0 %vm1876_vm2, %v2595_v36 }
0x1266   :  { %5034 = vmatmul.mubr.msk.f32.vlgmr.msra.gmra.mxu0 %vm1876_vm2, %v5023_v25 }
0x1267   :  { %5048 = vmatpush3.xpose.msk.msra.mxu0 %vm1876_vm2, %v2892_v56 }
0x1268   :  { %5049 = vmatprep.subr.msk.mxu0 %vm1876_vm2, %v2890_v24 }
0x126b   :  { %5050 = vmatpush3.xpose.msk.msra.mxu0 %vm1876_vm2, %v2890_v24 }
0x1272   :  { %v5030_v27 = vpop.f32.mrf.mxu1 }
0x1274   :  { %v2682_v28 = vpop.f32.mrf.mxu1 }
0x1275   :  { %5036 = vmatprep.mubr.msk.f32.mxu0 %vm1876_vm2, %v2682_v28 }
0x1276   :  { %5037 = vmatmul.mubr.msk.f32.gmra.mxu0 %vm1876_vm2, %v5030_v27  ;;  %v5873_v39 = vpop.f32.mrf.mxu1 }
0x1277   :  { %5051 = vmatprep.mubr.msk.f32.mxu0 %vm1876_vm2, %v2886_v38 }
0x1278   :  { %v5875_v40 = vpop.f32.mrf.mxu1 }
0x127a   :  { %5052 = vmatmul.mubr.msk.f32.vlgmr.msra.gmra.mxu0 %vm1876_vm2, %v2888_v34  ;;  %v5879_v42 = vpop.f32.mrf.mxu1 }
0x127c   :  { %v5883_v44 = vpop.f32.mrf.mxu1 }
0x127e   :  { %v5060_v49 = vpop.f32.mrf.mxu1 }
0x127f   :  { %v3076_v55 = vsel %vm330_vm1, %v5060_v49, -inf }
0x1280   :  { %v3058_v8 = vpop.f32.mrf.mxu1 }
0x1281   :  { %v3073_v54 = vsel %vm330_vm1, %v3058_v8, -inf }
0x1326   :  { %v5877_v41 = vpop.f32.mrf.mxu0 }
0x1328   :  { %v5881_v43 = vpop.f32.mrf.mxu0 }
0x1336   :  { %v5885_v46 = vpop.f32.mrf.mxu0 }
0x1338   :  { %v5887_v48 = vpop.f32.mrf.mxu0 }
0x133a   :  { %v5053_v50 = vpop.f32.mrf.mxu0 }
0x133b   :  { %v3070_v51 = vsel %vm330_vm1, %v5053_v50, -inf }
0x133c   :  { %3071 = vmax.xlane.f32.xlu1 %v3070_v51  ;;  %v2967_v52 = vpop.f32.mrf.mxu0 }
0x133d   :  { %v3067_v53 = vsel %vm330_vm1, %v2967_v52, -inf }
0x133e   :  { %3068 = vmax.xlane.f32.xlu0 %v3067_v53 }
0x1342   :  { %3074 = vmax.xlane.f32.xlu0 %v3073_v54 }
0x1346   :  { %3077 = vmax.xlane.f32.xlu0 %v3076_v55 }
0x13c5   :  { %v3072_v60 = vpop.xlane.xlu1 %3071 }
0x13c6   :  { %v3080_v9 = vsub.f32 %v5053_v50, %v3072_v60 }
0x13c7   :  { %v3069_v6 = vpop.xlane.xlu0 %3068 }
0x13c8   :  { %v3079_v58 = vsub.f32 %v2967_v52, %v3069_v6  ;;  %v3085_v5 = vmul.f32 1.442695, %v3080_v9 }
0x13ca   :  { %v3083_v7 = vmul.f32 1.442695, %v3079_v58 }
0x13cb   :  { %v3075_v62 = vpop.xlane.xlu0 %3074 }
0x13cc   :  { %v3081_v63 = vsub.f32 %v3058_v8, %v3075_v62 }
0x13ce   :  { %v3087_v45 = vmul.f32 1.442695, %v3081_v63 }
0x13cf   :  { %v3078_v3 = vpop.xlane.xlu0 %3077 }
0x13d0   :  { %5322 = vpow2.f32 %v3087_v45  ;;  %v3082_v12 = vsub.f32 %v5060_v49, %v3078_v3 }
0x13d1   :  { %5324 = vpow2.f32 %v3083_v7 }
0x13d2   :  { %v3089_v14 = vmul.f32 1.442695, %v3082_v12 }
0x13d4   :  { %5326 = vpow2.f32 %v3089_v14 }
0x13d5   :  { %5328 = vpow2.f32 %v3085_v5 }
0x13dd   :  { %v5323_v57 = vpop.eup %5322 }
0x13de   :  { %v3097_v11 = vsel %vm330_vm1, %v5323_v57, 0.0  ;;  %v5894_v56 = vpop.eup %5324 }
0x13df   :  { %3098 = vadd.xlane.f32.xlu0 %v3097_v11  ;;  %v3091_v16 = vsel %vm330_vm1, %v5894_v56, 0.0 }
0x13e1   :  { %v5896_v13 = vpop.eup %5326 }
0x13e2   :  { %v3100_v15 = vsel %vm330_vm1, %v5896_v13, 0.0  ;;  %v5902_v17 = vpop.eup %5328 }
0x13e3   :  { %3092 = vadd.xlane.f32.xlu0 %v3091_v16  ;;  %3101 = vadd.xlane.f32.xlu1 %v3100_v15  ;;  %v3094_v18 = vsel %vm330_vm1, %v5902_v17, 0.0 }
0x13e7   :  { %3095 = vadd.xlane.f32.xlu1 %v3094_v18 }
0x13f8   :  { %3123 = vrot.lane.b32.xlu1 %v5716_v47, %s5387_s30 }
0x13f9   :  { %3125 = vrot.lane.b32.xlu0 %v5714_v0, %s5387_s30 }
0x13fc   :  { %3212 = vrot.lane.b32.xlu1 %v5724_v4, %s5387_s30 }
0x13fd   :  { %3404 = vrot.lane.b32.xlu0 %v5714_v0, %s5404_s27 }
0x1400   :  { %3210 = vrot.lane.b32.xlu1 %v5728_v10, %s5387_s30  ;;  %s5406_s30 = smov 40  }
0x1401   :  { %3495 = vrot.lane.b32.xlu0 %v5724_v4, %s5404_s27 }
0x1404   :  { %3402 = vrot.lane.b32.xlu1 %v5716_v47, %s5404_s27 }
0x1405   :  { %3400 = vrot.lane.b32.xlu0 %v5714_v0, %s5405_s29 }
0x1408   :  { %3398 = vrot.lane.b32.xlu1 %v5716_v47, %s5405_s29 }
0x1409   :  { %3489 = vrot.lane.b32.xlu0 %v5728_v10, %s5405_s29 }
0x140c   :  { %3493 = vrot.lane.b32.xlu1 %v5728_v10, %s5404_s27  ;;  %s4470_s27 = sld [smem:[%s6093_s0 + %s5413_s1]]  }
0x1410   :  { %3491 = vrot.lane.b32.xlu1 %v5724_v4, %s5405_s29  ;;  %s5414_s29 = smov 28  }
0x1411   :  { %s4473_s5 = sld [smem:[%s6093_s0 + %s5414_s29]]  }
0x1468   :  { %v3099_v19 = vpop.xlane.xlu0 %3098 }
0x1469   :  { %5330 = vrcp.f32 %v3099_v19 }
0x146c   :  { %v3102_v20 = vpop.xlane.xlu1 %3101  ;;  %v3093_v21 = vpop.xlane.xlu0 %3092 }
0x146d   :  { %5332 = vrcp.f32 %v3102_v20 }
0x146e   :  { %5334 = vrcp.f32 %v3093_v21 }
0x1470   :  { %v3096_v22 = vpop.xlane.xlu1 %3095  ;;  %v3126_v23 = vpop.permute.xlu0 %3125 }
0x1471   :  { %5336 = vrcp.f32 %v3096_v22  ;;  %5061 = vmatprep.subr.mxu0 %v3126_v23 }
0x1472   :  { %5062 = vmatpush3.msra.mxu0 %v3126_v23  ;;  %v2872_v23 = vadd.f32 %v5873_v39, %v5877_v41 }
0x1474   :  { %v3124_v24 = vpop.permute.xlu1 %3123  ;;  %v3405_v50 = vpop.permute.xlu0 %3404 }
0x1475   :  { %5063 = vmatprep.subr.mxu0 %v3124_v24 }
0x1476   :  { %v5331_v30 = vpop.eup %5330  ;;  %5064 = vmatpush3.msra.mxu0 %v3124_v24 }
0x1477   :  { %v3109_v31 = vmul.f32 %v5331_v30, %v3099_v19  ;;  %5075 = vmatprep.subr.mxu0 %v1868_v29 }
0x1478   :  { %v3213_v32 = vpop.permute.xlu1 %3212  ;;  %v3496_v60 = vpop.permute.xlu0 %3495 }
0x1479   :  { %v3113_v37 = vsub.f32 2.0, %v3109_v31  ;;  %5068 = vmatprep.subr.mxu1 %v3213_v32 }
0x147a   :  { %v5333_v38 = vpop.eup %5332  ;;  %5069 = vmatpush3.msra.mxu1 %v3213_v32 }
0x147b   :  { %v5335_v34 = vpop.eup %5334  ;;  %v3117_v33 = vmul.f32 %v5331_v30, %v3113_v37  ;;  %v3110_v35 = vmul.f32 %v5333_v38, %v3102_v20  ;;  %v2867_v30 = vadd.f32 %v5875_v40, %v5881_v43  ;;  %v2882_v37 = vadd.f32 %v5879_v42, %v5885_v46 }
0x147c   :  { %v3107_v26 = vmul.f32 %v5335_v34, %v3093_v21  ;;  %v3211_v25 = vpop.permute.xlu1 %3210  ;;  %v3401_v9 = vpop.permute.xlu0 %3400 }
0x147d   :  { %v3121_v36 = vmul.f32 %v5323_v57, %v3117_v33  ;;  %v3114_v27 = vsub.f32 2.0, %v3110_v35  ;;  %5070 = vmatprep.subr.mxu1 %v3211_v25  ;;  %v2877_v33 = vadd.f32 %v5883_v44, %v5887_v48 }
0x147e   :  { %v5337_v28 = vpop.eup %5336  ;;  %v3111_v49 = vsub.f32 2.0, %v3107_v26  ;;  %5071 = vmatpush3.msra.mxu1 %v3211_v25 }
0x147f   :  { %v3118_v51 = vmul.f32 %v5333_v38, %v3114_v27  ;;  %v3108_v52 = vmul.f32 %v5337_v28, %v3096_v22  ;;  %5072 = vmatprep.mubr.msk.f32.mxu1 %vm330_vm1, %v3121_v36  ;;  %5083 = vmatprep.subr.msk.mxu1 %vm1876_vm2, %v3405_v50 }
0x1480   :  { %v3115_v53 = vmul.f32 %v5335_v34, %v3111_v49  ;;  %v3403_v8 = vpop.permute.xlu1 %3402 }
0x1481   :  { %v3122_v54 = vmul.f32 %v5896_v13, %v3118_v51  ;;  %v3112_v55 = vsub.f32 2.0, %v3108_v52  ;;  %v3490_v13 = vpop.permute.xlu0 %3489 }
0x1482   :  { %v3119_v6 = vmul.f32 %v5894_v56, %v3115_v53 }
0x1483   :  { %v3116_v58 = vmul.f32 %v5337_v28, %v3112_v55  ;;  %5073 = vmatmul.mubr.msk.f32.vlgmr.msra.gmra.mxu1 %vm330_vm1, %v3122_v54 }
0x1484   :  { %5065 = vmatprep.mubr.msk.f32.mxu0 %vm330_vm1, %v3119_v6  ;;  %5084 = vmatpush3.xpose.msk.msra.mxu1 %vm1876_vm2, %v3405_v50  ;;  %v3399_v62 = vpop.permute.xlu1 %3398 }
0x1485   :  { %v3120_v63 = vmul.f32 %v5902_v17, %v3116_v58  ;;  %5085 = vmatprep.subr.msk.mxu1 %vm1876_vm2, %v3403_v8  ;;  %5087 = vmatprep.mubr.msk.f32.mxu1 %vm1876_vm2, %v3399_v62 }
0x1487   :  { %5066 = vmatmul.mubr.msk.f32.vlgmr.msra.gmra.mxu0 %vm330_vm1, %v3120_v63 }
0x1488   :  { %5076 = vmatpush3.msra.mxu0 %v1868_v29  ;;  %5086 = vmatpush3.xpose.msk.msra.mxu1 %vm1876_vm2, %v3403_v8  ;;  %v3494_v14 = vpop.permute.xlu1 %3493 }
0x1489   :  { %5090 = vmatprep.subr.msk.mxu0 %vm1876_vm2, %v3496_v60 }
0x148b   :  { %5088 = vmatmul.mubr.msk.f32.vlgmr.msra.gmra.mxu1 %vm1876_vm2, %v3401_v9 }
0x148c   :  { %v3492_v16 = vpop.permute.xlu1 %3491 }
0x1543   :  { %v5074_v7 = vpop.f32.mrf.mxu1 }
0x1545   :  { %v3288_v3 = vpop.f32.mrf.mxu1 }
0x1547   :  { %v5067_v45 = vpop.f32.mrf.mxu0 }
0x1549   :  { %v3201_v12 = vpop.f32.mrf.mxu0 }
0x154a   :  { %5077 = vmatprep.mubr.msk.f32.mxu0 %vm1876_vm2, %v3201_v12 }
0x154b   :  { %v5089_v5 = vpop.f32.mrf.mxu1  ;;  %5078 = vmatmul.mubr.msk.f32.vlgmr.msra.gmra.mxu0 %vm1876_vm2, %v5067_v45 }
0x154c   :  { %5091 = vmatpush3.xpose.msk.msra.mxu0 %vm1876_vm2, %v3496_v60  ;;  %5080 = vmatprep.mubr.msk.f32.mxu0 %vm1876_vm2, %v3288_v3  ;;  %v3583_v57 = vsel %vm330_vm1, %v5089_v5, -inf }
0x154d   :  { %5092 = vmatprep.subr.msk.mxu0 %vm1876_vm2, %v3494_v14  ;;  %3584 = vmax.xlane.f32.xlu1 %v3583_v57  ;;  %v3480_v11 = vpop.f32.mrf.mxu1 }
0x154e   :  { %v3580_v56 = vsel %vm330_vm1, %v3480_v11, -inf }
0x154f   :  { %3581 = vmax.xlane.f32.xlu0 %v3580_v56  ;;  %5081 = vmatmul.mubr.msk.f32.gmra.mxu0 %vm1876_vm2, %v5074_v7 }
0x1550   :  { %5093 = vmatpush3.xpose.msk.msra.mxu0 %vm1876_vm2, %v3494_v14  ;;  %5094 = vmatprep.mubr.msk.f32.mxu0 %vm1876_vm2, %v3490_v13 }
0x1553   :  { %5095 = vmatmul.mubr.msk.f32.vlgmr.msra.gmra.mxu0 %vm1876_vm2, %v3492_v16 }
0x15d6   :  { %v3585_v15 = vpop.xlane.xlu1 %3584 }
0x15d7   :  { %v3593_v17 = vsub.f32 %v5089_v5, %v3585_v15 }
0x15d8   :  { %v3582_v21 = vpop.xlane.xlu0 %3581 }
0x15d9   :  { %v3598_v18 = vmul.f32 1.442695, %v3593_v17  ;;  %v3592_v22 = vsub.f32 %v3480_v11, %v3582_v21 }
0x15db   :  { %5338 = vpow2.f32 %v3598_v18  ;;  %v3596_v24 = vmul.f32 1.442695, %v3592_v22 }
0x15dd   :  { %5340 = vpow2.f32 %v3596_v24 }
0x15e8   :  { %v5948_v19 = vpop.eup %5338 }
0x15e9   :  { %v3607_v20 = vsel %vm330_vm1, %v5948_v19, 0.0 }
0x15ea   :  { %3608 = vadd.xlane.f32.xlu1 %v3607_v20  ;;  %v5341_v42 = vpop.eup %5340  ;;  %v1869_v20 = vld [vmem:[%s5819_s2 + $0x18] sm:$0xff] }
0x15eb   :  { %v3604_v46 = vsel %vm330_vm1, %v5341_v42, 0.0 }
0x160b   :  { %v5079_v29 = vpop.f32.mrf.mxu0 }
0x160c   :  { %v5956_v31 = vadd.f32 %v5079_v29, %v2872_v23 }
0x160d   :  { %v3375_v32 = vpop.f32.mrf.mxu0 }
0x160e   :  { %v5960_v38 = vadd.f32 %v3375_v32, %v2867_v30  ;;  %v4595_v32 = vld [vmem:[%s4464_s7] ss:$0 sm:$0xff] }
0x160f   :  { %v5082_v34 = vpop.f32.mrf.mxu0 }
0x1610   :  { %v5964_v35 = vadd.f32 %v5082_v34, %v2882_v37 }
0x1611   :  { %v3385_v39 = vpop.f32.mrf.mxu0 }
0x1612   :  { %v5966_v41 = vadd.f32 %v3385_v39, %v2877_v33 }
0x1613   :  { %v5096_v26 = vpop.f32.mrf.mxu0 }
0x1614   :  { %v3589_v25 = vsel %vm330_vm1, %v5096_v26, -inf }
0x1615   :  { %v3571_v40 = vpop.f32.mrf.mxu0 }
0x1616   :  { %v3586_v43 = vsel %vm330_vm1, %v3571_v40, -inf }
0x1617   :  { %3587 = vmax.xlane.f32.xlu0 %v3586_v43 }
0x161b   :  { %3590 = vmax.xlane.f32.xlu0 %v3589_v25 }
0x161f   :  { %3605 = vadd.xlane.f32.xlu0 %v3604_v46 }
0x1673   :  { %v3609_v62 = vpop.xlane.xlu1 %3608 }
0x16a0   :  { %v3588_v36 = vpop.xlane.xlu0 %3587 }
0x16a1   :  { %v3594_v27 = vsub.f32 %v3571_v40, %v3588_v36 }
0x16a3   :  { %v3600_v44 = vmul.f32 1.442695, %v3594_v27 }
0x16a4   :  { %v3591_v48 = vpop.xlane.xlu0 %3590 }
0x16a5   :  { %5342 = vpow2.f32 %v3600_v44  ;;  %v3595_v28 = vsub.f32 %v5096_v26, %v3591_v48 }
0x16a7   :  { %v3602_v49 = vmul.f32 1.442695, %v3595_v28 }
0x16a8   :  { %v3606_v50 = vpop.xlane.xlu0 %3605 }
0x16a9   :  { %5344 = vpow2.f32 %v3602_v49 }
0x16aa   :  { %5346 = vrcp.f32 %v3606_v50 }
0x16ab   :  { %5348 = vrcp.f32 %v3609_v62 }
0x16b2   :  { %v5343_v51 = vpop.eup %5342 }
0x16b3   :  { %v3610_v52 = vsel %vm330_vm1, %v5343_v51, 0.0 }
0x16b4   :  { %3611 = vadd.xlane.f32.xlu0 %v3610_v52 }
0x16b6   :  { %v5345_v53 = vpop.eup %5344 }
0x16b7   :  { %v5347_v8 = vpop.eup %5346  ;;  %v3613_v54 = vsel %vm330_vm1, %v5345_v53, 0.0 }
0x16b8   :  { %v3620_v55 = vmul.f32 %v5347_v8, %v3606_v50  ;;  %3614 = vadd.xlane.f32.xlu1 %v3613_v54  ;;  %v5349_v63 = vpop.eup %5348 }
0x16b9   :  { %v3621_v9 = vmul.f32 %v5349_v63, %v3609_v62 }
0x16ba   :  { %v3624_v6 = vsub.f32 2.0, %v3620_v55 }
0x16bb   :  { %v3625_v45 = vsub.f32 2.0, %v3621_v9 }
0x16bc   :  { %v3628_v58 = vmul.f32 %v5347_v8, %v3624_v6 }
0x16bd   :  { %v3629_v5 = vmul.f32 %v5349_v63, %v3625_v45  ;;  %v4003_v45 = vld [vmem:[%s4467_s11 + $0x18] sm:$0xff] }
0x16be   :  { %v3632_v60 = vmul.f32 %v5341_v42, %v3628_v58 }
0x16c0   :  { %5101 = vmatprep.mubr.msk.f32.mxu1 %vm330_vm1, %v3632_v60 }
0x16c9   :  { %3636 = vrot.lane.b32.xlu1 %v5716_v47, %s5406_s30 }
0x16ca   :  { %3638 = vrot.lane.b32.xlu0 %v5714_v0, %s5406_s30  ;;  %v3633_v0 = vmul.f32 %v5948_v19, %v3629_v5  ;;  %v4000_v5 = vld [vmem:[%s4467_s11] sm:$0xff] }
0x16cd   :  { %3725 = vrot.lane.b32.xlu1 %v5724_v4, %s5406_s30 }
0x16d1   :  { %3723 = vrot.lane.b32.xlu1 %v5728_v10, %s5406_s30 }
0x173d   :  { %v3612_v7 = vpop.xlane.xlu0 %3611 }
0x173e   :  { %5350 = vrcp.f32 %v3612_v7 }
0x1741   :  { %v3615_v3 = vpop.xlane.xlu1 %3614  ;;  %v3639_v12 = vpop.permute.xlu0 %3638 }
0x1742   :  { %5352 = vrcp.f32 %v3615_v3  ;;  %5097 = vmatprep.subr.mxu1 %v3639_v12 }
0x1743   :  { %5098 = vmatpush3.msra.mxu1 %v3639_v12  ;;  %v4001_v12 = vld [vmem:[%s4467_s11 + $0x8] sm:$0xff] }
0x1745   :  { %v3637_v47 = vpop.permute.xlu1 %3636 }
0x1746   :  { %5099 = vmatprep.subr.mxu1 %v3637_v47 }
0x1747   :  { %5100 = vmatpush3.msra.mxu1 %v3637_v47 }
0x1748   :  { %5102 = vmatmul.mubr.msk.f32.vlgmr.msra.gmra.mxu1 %vm330_vm1, %v3633_v0  ;;  %5111 = vmatprep.subr.mxu1 %v1869_v20 }
0x1749   :  { %v3726_v4 = vpop.permute.xlu1 %3725  ;;  %5112 = vmatpush3.msra.mxu1 %v1869_v20 }
0x174a   :  { %5104 = vmatprep.subr.mxu0 %v3726_v4 }
0x174b   :  { %v5351_v10 = vpop.eup %5350  ;;  %5105 = vmatpush3.msra.mxu0 %v3726_v4 }
0x174c   :  { %v3622_v14 = vmul.f32 %v5351_v10, %v3612_v7 }
0x174d   :  { %v3724_v57 = vpop.permute.xlu1 %3723 }
0x174e   :  { %v3626_v11 = vsub.f32 2.0, %v3622_v14  ;;  %5106 = vmatprep.subr.mxu0 %v3724_v57 }
0x174f   :  { %v5353_v56 = vpop.eup %5352  ;;  %5107 = vmatpush3.msra.mxu0 %v3724_v57 }
0x1750   :  { %v3630_v13 = vmul.f32 %v5351_v10, %v3626_v11  ;;  %v3623_v16 = vmul.f32 %v5353_v56, %v3615_v3  ;;  %5119 = vmatprep.subr.mxu0 %v4003_v45  ;;  %v4002_v3 = vld [vmem:[%s4467_s11 + $0x10] sm:$0xff] }
0x1752   :  { %v3634_v15 = vmul.f32 %v5343_v51, %v3630_v13  ;;  %v3627_v17 = vsub.f32 2.0, %v3623_v16 }
0x1754   :  { %v3631_v18 = vmul.f32 %v5353_v56, %v3627_v17  ;;  %5108 = vmatprep.mubr.msk.f32.mxu0 %vm330_vm1, %v3634_v15  ;;  %v4596_v15 = vld [vmem:[%s4465_s15] ss:$0 sm:$0xff] }
0x1756   :  { %v3635_v19 = vmul.f32 %v5345_v53, %v3631_v18 }
0x1758   :  { %5109 = vmatmul.mubr.msk.f32.vlgmr.msra.gmra.mxu0 %vm330_vm1, %v3635_v19 }
0x1759   :  { %5120 = vmatpush3.msra.mxu0 %v4003_v45 }
0x175a   :  { %5121 = vmatprep.subr.mxu0 %v4002_v3 }
0x175b   :  { %5122 = vmatpush3.msra.mxu0 %v4002_v3 }
0x175c   :  { %5123 = vmatprep.subr.mxu0 %v4001_v12 }
0x175d   :  { %5124 = vmatpush3.msra.mxu0 %v4001_v12 }
0x175e   :  { %5125 = vmatprep.subr.mxu0 %v4000_v5 }
0x175f   :  { %5126 = vmatpush3.msra.mxu0 %v4000_v5 }
0x1808   :  { %v5103_v21 = vpop.f32.mrf.mxu1 }
0x180a   :  { %v3714_v22 = vpop.f32.mrf.mxu1 }
0x180b   :  { %5113 = vmatprep.mubr.msk.f32.mxu1 %vm1876_vm2, %v3714_v22 }
0x180c   :  { %5114 = vmatmul.mubr.msk.f32.vlgmr.msra.gmra.mxu1 %vm1876_vm2, %v5103_v21 }
0x1818   :  { %v5110_v23 = vpop.f32.mrf.mxu0 }
0x181a   :  { %v3801_v24 = vpop.f32.mrf.mxu0 }
0x181b   :  { %5116 = vmatprep.mubr.msk.f32.mxu1 %vm1876_vm2, %v3801_v24 }
0x181c   :  { %5117 = vmatmul.mubr.msk.f32.gmra.mxu1 %vm1876_vm2, %v5110_v23  ;;  %v4597_v23 = vld [vmem:[%s4466_s19] ss:$0 sm:$0xff] }
0x18cc   :  { %v5115_v29 = vpop.f32.mrf.mxu1 }
0x18cd   :  { %v3908_v30 = vadd.f32 %v5115_v29, %v5956_v31 }
0x18ce   :  { %v3888_v37 = vpop.f32.mrf.mxu1 }
0x18cf   :  { %v3912_v34 = vadd.f32 %v3908_v30, %v5671_v59  ;;  %v3907_v33 = vadd.f32 %v3888_v37, %v5960_v38 }
0x18d1   :  { %v5993_v39 = vadd.f32 %v4595_v32, %v3912_v34  ;;  %v3911_v26 = vadd.f32 %v3907_v33, %v5674_v61 }
0x18d3   :  { %v5996_v40 = vadd.f32 %v4595_v32, %v3911_v26  ;;  %v3931_v43 = vsel %vm138_vm0, %v5993_v39, 0.0 }
0x18d4   :  { %3932 = vadd.xlane.f32.xlu1 %v3931_v43 }
0x18d5   :  { %v3928_v25 = vsel %vm138_vm0, %v5996_v40, 0.0 }
0x18d6   :  { %3929 = vadd.xlane.f32.xlu0 %v3928_v25 }
0x18dc   :  { %v5118_v31 = vpop.f32.mrf.mxu1 }
0x18dd   :  { %v3910_v42 = vadd.f32 %v5118_v31, %v5964_v35 }
0x18de   :  { %v3898_v59 = vpop.f32.mrf.mxu1 }
0x18df   :  { %v3909_v38 = vadd.f32 %v3898_v59, %v5966_v41  ;;  %v3914_v46 = vadd.f32 %v3910_v42, %v5681_v1  ;;  %v4159_v59 = vld [vmem:[%s6038_s23 + $0x78] sm:$0xff] }
0x18e0   :  { %5133 = vmatprep.subr.mxu1 %v4159_v59 }
0x18e1   :  { %v3913_v61 = vadd.f32 %v3909_v38, %v5684_v2  ;;  %v6008_v27 = vadd.f32 %v4595_v32, %v3914_v46  ;;  %5134 = vmatpush3.msra.mxu1 %v4159_v59  ;;  %v4158_v38 = vld [vmem:[%s6038_s23 + $0x70] sm:$0xff]  ;;  %v4157_v46 = vld [vmem:[%s6038_s23 + $0x68] sm:$0xff] }
0x18e2   :  { %5135 = vmatprep.subr.mxu1 %v4158_v38 }
0x18e3   :  { %v6006_v36 = vadd.f32 %v4595_v32, %v3913_v61  ;;  %v3937_v48 = vsel %vm138_vm0, %v6008_v27, 0.0  ;;  %5136 = vmatpush3.msra.mxu1 %v4158_v38  ;;  %v4156_v61 = vld [vmem:[%s6038_s23 + $0x60] sm:$0xff] }
0x18e4   :  { %5137 = vmatprep.subr.mxu1 %v4157_v46  ;;  %v4603_v38 = vld [vmem:[%s4470_s27] ss:$0 sm:$0xff] }
0x18e5   :  { %v3934_v44 = vsel %vm138_vm0, %v6006_v36, 0.0  ;;  %5138 = vmatpush3.msra.mxu1 %v4157_v46 }
0x18e6   :  { %3935 = vadd.xlane.f32.xlu0 %v3934_v44  ;;  %5139 = vmatprep.subr.mxu1 %v4156_v61  ;;  %v4155_v44 = vld [vmem:[%s6038_s23 + $0x58] sm:$0xff] }
0x18e7   :  { %5140 = vmatpush3.msra.mxu1 %v4156_v61 }
0x18e8   :  { %5141 = vmatprep.subr.mxu1 %v4155_v44 }
0x18e9   :  { %5142 = vmatpush3.msra.mxu1 %v4155_v44 }
0x18ea   :  { %3938 = vadd.xlane.f32.xlu0 %v3937_v48  ;;  %v4154_v48 = vld [vmem:[%s6038_s23 + $0x50] sm:$0xff] }
0x18eb   :  { %5143 = vmatprep.subr.mxu1 %v4154_v48 }
0x18ec   :  { %5144 = vmatpush3.msra.mxu1 %v4154_v48 }
0x195d   :  { %v3933_v35 = vpop.xlane.xlu1 %3932 }
0x195e   :  { %v3941_v28 = vmul.f32 0.03125, %v3933_v35  ;;  %v4153_v35 = vld [vmem:[%s6038_s23 + $0x48] sm:$0xff] }
0x195f   :  { %v3930_v49 = vpop.xlane.xlu0 %3929  ;;  %5145 = vmatprep.subr.mxu1 %v4153_v35 }
0x1960   :  { %v3945_v41 = vsub.f32 %v5993_v39, %v3941_v28  ;;  %v3940_v1 = vmul.f32 0.03125, %v3930_v49  ;;  %v4152_v28 = vld [vmem:[%s6038_s23 + $0x40] sm:$0xff]  ;;  %5146 = vmatpush3.msra.mxu1 %v4153_v35  ;;  %v4151_v49 = vld [vmem:[%s6038_s23 + $0x38] sm:$0xff] }
0x1961   :  { %5147 = vmatprep.subr.mxu1 %v4152_v28 }
0x1962   :  { %v3944_v2 = vsub.f32 %v5996_v40, %v3940_v1  ;;  %v3949_v50 = vmul.f32 %v3945_v41, %v3945_v41  ;;  %5148 = vmatpush3.msra.mxu1 %v4152_v28  ;;  %v4149_v1 = vld [vmem:[%s6038_s23 + $0x28] sm:$0xff] }
0x1963   :  { %5149 = vmatprep.subr.mxu1 %v4151_v49 }
0x1964   :  { %v3955_v51 = vsel %vm138_vm0, %v3949_v50, 0.0  ;;  %v3948_v52 = vmul.f32 %v3944_v2, %v3944_v2  ;;  %5150 = vmatpush3.msra.mxu1 %v4151_v49  ;;  %v4147_v50 = vld [vmem:[%s6038_s23 + $0x18] sm:$0xff] }
0x1965   :  { %3956 = vadd.xlane.f32.xlu1 %v3955_v51  ;;  %v4146_v51 = vld [vmem:[%s6038_s23 + $0x10] sm:$0xff] }
0x1966   :  { %v3952_v53 = vsel %vm138_vm0, %v3948_v52, 0.0  ;;  %v4145_v52 = vld [vmem:[%s6038_s23 + $0x8] sm:$0xff] }
0x1967   :  { %3953 = vadd.xlane.f32.xlu0 %v3952_v53  ;;  %v4144_v53 = vld [vmem:[%s6038_s23] sm:$0xff] }
0x196f   :  { %v3936_v8 = vpop.xlane.xlu0 %3935 }
0x1970   :  { %v3942_v54 = vmul.f32 0.03125, %v3936_v8  ;;  %v4598_v8 = vld [vmem:[%s4468_s25] ss:$0 sm:$0xff] }
0x1972   :  { %v3946_v55 = vsub.f32 %v6006_v36, %v3942_v54 }
0x1973   :  { %v3939_v6 = vpop.xlane.xlu0 %3938 }
0x1974   :  { %v3943_v58 = vmul.f32 0.03125, %v3939_v6  ;;  %v3950_v60 = vmul.f32 %v3946_v55, %v3946_v55 }
0x1976   :  { %v3947_v62 = vsub.f32 %v6008_v27, %v3943_v58  ;;  %v3958_v63 = vsel %vm138_vm0, %v3950_v60, 0.0 }
0x1977   :  { %3959 = vadd.xlane.f32.xlu0 %v3958_v63 }
0x1978   :  { %v3951_v9 = vmul.f32 %v3947_v62, %v3947_v62 }
0x197a   :  { %v3961_v7 = vsel %vm138_vm0, %v3951_v9, 0.0 }
0x197b   :  { %3962 = vadd.xlane.f32.xlu1 %v3961_v7 }
0x19ee   :  { %v3957_v47 = vpop.xlane.xlu1 %3956 }
0x19ef   :  { %v3965_v0 = vmul.f32 0.03125, %v3957_v47 }
0x19f0   :  { %v3954_v4 = vpop.xlane.xlu0 %3953 }
0x19f1   :  { %v3969_v10 = vadd.f32 1e-05, %v3965_v0  ;;  %v3964_v14 = vmul.f32 0.03125, %v3954_v4 }
0x19f3   :  { %5354 = vrsqrt.f32 %v3969_v10  ;;  %v3968_v57 = vadd.f32 1e-05, %v3964_v14 }
0x19f5   :  { %5356 = vrsqrt.f32 %v3968_v57 }
0x1a00   :  { %v5355_v11 = vpop.eup %5354  ;;  %v3960_v56 = vpop.xlane.xlu0 %3959 }
0x1a01   :  { %v3977_v13 = vmul.f32 %v5355_v11, %v3945_v41  ;;  %v3966_v16 = vmul.f32 0.03125, %v3960_v56  ;;  %v4150_v41 = vld [vmem:[%s6038_s23 + $0x30] sm:$0xff] }
0x1a02   :  { %v5357_v17 = vpop.eup %5356  ;;  %5151 = vmatprep.subr.mxu1 %v4150_v41 }
0x1a03   :  { %v3970_v18 = vadd.f32 1e-05, %v3966_v16  ;;  %v3976_v19 = vmul.f32 %v5357_v17, %v3944_v2  ;;  %v3987_v21 = vmul.f32 %v4596_v15, %v3977_v13  ;;  %5152 = vmatpush3.msra.mxu1 %v4150_v41  ;;  %v4148_v2 = vld [vmem:[%s6038_s23 + $0x20] sm:$0xff] }
0x1a04   :  { %v3963_v20 = vpop.xlane.xlu1 %3962  ;;  %5153 = vmatprep.subr.mxu1 %v4149_v1 }
0x1a05   :  { %5358 = vrsqrt.f32 %v3970_v18  ;;  %v3967_v22 = vmul.f32 0.03125, %v3963_v20  ;;  %v3986_v24 = vmul.f32 %v4596_v15, %v3976_v19  ;;  %v3997_v32 = vadd.f32 %v4597_v23, %v3987_v21  ;;  %5154 = vmatpush3.msra.mxu1 %v4149_v1 }
0x1a06   :  { %5155 = vmatprep.subr.mxu1 %v4148_v2 }
0x1a07   :  { %v3971_v29 = vadd.f32 1e-05, %v3967_v22  ;;  %v3996_v30 = vadd.f32 %v4597_v23, %v3986_v24  ;;  %5156 = vmatpush3.msra.mxu1 %v4148_v2 }
0x1a08   :  { %5157 = vmatprep.subr.mxu1 %v4147_v50 }
0x1a09   :  { %5360 = vrsqrt.f32 %v3971_v29  ;;  %5127 = vmatprep.mubr.msk.f32.mxu0 %vm138_vm0, %v3996_v30  ;;  %5158 = vmatpush3.msra.mxu1 %v4147_v50 }
0x1a0a   :  { %5128 = vmatmul.mubr.msk.f32.vlgmr.msra.gmra.mxu0 %vm138_vm0, %v3997_v32  ;;  %5159 = vmatprep.subr.mxu1 %v4146_v51 }
0x1a0b   :  { %5160 = vmatpush3.msra.mxu1 %v4146_v51 }
0x1a0c   :  { %5161 = vmatprep.subr.mxu1 %v4145_v52 }
0x1a0d   :  { %5162 = vmatpush3.msra.mxu1 %v4145_v52 }
0x1a0e   :  { %5163 = vmatprep.subr.mxu1 %v4144_v53 }
0x1a0f   :  { %5164 = vmatpush3.msra.mxu1 %v4144_v53 }
0x1a12   :  { %v5359_v37 = vpop.eup %5358 }
0x1a13   :  { %v3978_v34 = vmul.f32 %v5359_v37, %v3946_v55 }
0x1a15   :  { %v3988_v33 = vmul.f32 %v4596_v15, %v3978_v34 }
0x1a16   :  { %v5361_v26 = vpop.eup %5360 }
0x1a17   :  { %v3998_v43 = vadd.f32 %v4597_v23, %v3988_v33  ;;  %v3979_v25 = vmul.f32 %v5361_v26, %v3947_v62 }
0x1a19   :  { %5130 = vmatprep.mubr.msk.f32.mxu0 %vm138_vm0, %v3998_v43  ;;  %v3989_v31 = vmul.f32 %v4596_v15, %v3979_v25 }
0x1a1b   :  { %v3999_v42 = vadd.f32 %v4597_v23, %v3989_v31 }
0x1a1d   :  { %5131 = vmatmul.mubr.msk.f32.gmra.mxu0 %vm138_vm0, %v3999_v42 }
0x1aca   :  { %v5129_v54 = vpop.f32.mrf.mxu0 }
0x1acb   :  { %v4095_v55 = vadd.f32 %v5129_v54, %v4598_v8 }
0x1acc   :  { %v4089_v6 = vpop.f32.mrf.mxu0 }
0x1acd   :  { %v4113_v58 = vmul.f32 0.044715, %v4095_v55  ;;  %v4090_v60 = vadd.f32 %v4598_v8, %v4089_v6  ;;  %v4109_v23 = vmul.f32 0.5, %v4095_v55 }
0x1acf   :  { %v4117_v62 = vmul.f32 %v4113_v58, %v4095_v55  ;;  %v4112_v63 = vmul.f32 0.044715, %v4090_v60  ;;  %v4108_v21 = vmul.f32 0.5, %v4090_v60 }
0x1ad1   :  { %v4121_v9 = vmul.f32 %v4117_v62, %v4095_v55  ;;  %v4116_v7 = vmul.f32 %v4112_v63, %v4090_v60 }
0x1ad3   :  { %v4125_v45 = vadd.f32 %v4121_v9, %v4095_v55  ;;  %v4120_v3 = vmul.f32 %v4116_v7, %v4090_v60 }
0x1ad5   :  { %v4129_v12 = vmul.f32 0.7978846, %v4125_v45  ;;  %v4124_v5 = vadd.f32 %v4120_v3, %v4090_v60 }
0x1ad7   :  { %5362 = vtanh.f32 %v4129_v12  ;;  %v4128_v47 = vmul.f32 0.7978846, %v4124_v5 }
0x1ad9   :  { %5364 = vtanh.f32 %v4128_v47 }
0x1add   :  { %v5132_v0 = vpop.f32.mrf.mxu0 }
0x1ade   :  { %v4105_v4 = vadd.f32 %v5132_v0, %v4598_v8 }
0x1adf   :  { %v4099_v10 = vpop.f32.mrf.mxu0 }
0x1ae0   :  { %v4115_v14 = vmul.f32 0.044715, %v4105_v4  ;;  %v4100_v57 = vadd.f32 %v4598_v8, %v4099_v10  ;;  %v4111_v31 = vmul.f32 0.5, %v4105_v4 }
0x1ae2   :  { %v4119_v11 = vmul.f32 %v4115_v14, %v4105_v4  ;;  %v4114_v56 = vmul.f32 0.044715, %v4100_v57  ;;  %v4110_v43 = vmul.f32 0.5, %v4100_v57  ;;  %v4333_v14 = vld [vmem:[%s4473_s5 + $0x18] sm:$0xff] }
0x1ae3   :  { %5171 = vmatprep.subr.mxu0 %v4333_v14 }
0x1ae4   :  { %v5363_v13 = vpop.eup %5362  ;;  %v4118_v16 = vmul.f32 %v4114_v56, %v4100_v57  ;;  %v4123_v15 = vmul.f32 %v4119_v11, %v4105_v4  ;;  %5172 = vmatpush3.msra.mxu0 %v4333_v14  ;;  %v4331_v11 = vld [vmem:[%s4473_s5 + $0x8] sm:$0xff]  ;;  %v4330_v56 = vld [vmem:[%s4473_s5] sm:$0xff] }
0x1ae5   :  { %v4137_v18 = vadd.f32 1.0, %v5363_v13 }
0x1ae6   :  { %v5365_v17 = vpop.eup %5364  ;;  %v4122_v19 = vmul.f32 %v4118_v16, %v4100_v57  ;;  %v4127_v20 = vadd.f32 %v4123_v15, %v4105_v4 }
0x1ae7   :  { %v4136_v22 = vadd.f32 1.0, %v5365_v17  ;;  %v4141_v32 = vmul.f32 %v4137_v18, %v4109_v23  ;;  %v4604_v23 = vld [vmem:[%s4471_s9] ss:$0 sm:$0xff] }
0x1ae8   :  { %v4126_v24 = vadd.f32 %v4122_v19, %v4100_v57  ;;  %v4131_v29 = vmul.f32 0.7978846, %v4127_v20  ;;  %v4332_v57 = vld [vmem:[%s4473_s5 + $0x10] sm:$0xff] }
0x1ae9   :  { %v4140_v30 = vmul.f32 %v4136_v22, %v4108_v21  ;;  %5173 = vmatprep.subr.mxu0 %v4332_v57 }
0x1aea   :  { %v4130_v37 = vmul.f32 0.7978846, %v4126_v24  ;;  %5366 = vtanh.f32 %v4131_v29  ;;  %5174 = vmatpush3.msra.mxu0 %v4332_v57 }
0x1aeb   :  { %5165 = vmatprep.mubr.f32.mxu1 %v4140_v30  ;;  %5175 = vmatprep.subr.mxu0 %v4331_v11 }
0x1aec   :  { %5166 = vmatmul.mubr.f32.vlgmr.msra.gmra.mxu1 %v4141_v32  ;;  %5368 = vtanh.f32 %v4130_v37  ;;  %5176 = vmatpush3.msra.mxu0 %v4331_v11 }
0x1aed   :  { %5177 = vmatprep.subr.mxu0 %v4330_v56 }
0x1aee   :  { %5178 = vmatpush3.msra.mxu0 %v4330_v56 }
0x1af7   :  { %v5367_v34 = vpop.eup %5366 }
0x1af8   :  { %v4139_v26 = vadd.f32 1.0, %v5367_v34 }
0x1af9   :  { %v5369_v33 = vpop.eup %5368 }
0x1afa   :  { %v4138_v25 = vadd.f32 1.0, %v5369_v33  ;;  %v4143_v59 = vmul.f32 %v4139_v26, %v4111_v31  ;;  %v4605_v26 = vld [vmem:[%s4472_s13] ss:$0 sm:$0xff] }
0x1afc   :  { %v4142_v42 = vmul.f32 %v4138_v25, %v4110_v43 }
0x1afe   :  { %5168 = vmatprep.mubr.f32.mxu1 %v4142_v42 }
0x1aff   :  { %5169 = vmatmul.mubr.f32.gmra.mxu1 %v4143_v59 }
0x1bac   :  { %v5167_v46 = vpop.f32.mrf.mxu1 }
0x1bad   :  { %v4239_v61 = vadd.f32 %v5167_v46, %v4603_v38 }
0x1bae   :  { %v4233_v44 = vpop.f32.mrf.mxu1 }
0x1baf   :  { %v4253_v48 = vadd.f32 %v4239_v61, %v5993_v39  ;;  %v4234_v35 = vadd.f32 %v4603_v38, %v4233_v44 }
0x1bb1   :  { %v4252_v28 = vadd.f32 %v4234_v35, %v5996_v40  ;;  %v4261_v49 = vsel %vm138_vm0, %v4253_v48, 0.0 }
0x1bb2   :  { %4262 = vadd.xlane.f32.xlu1 %v4261_v49  ;;  %v4606_v49 = vld [vmem:[%s4474_s17] ss:$0 sm:$0xff] }
0x1bb3   :  { %v4258_v41 = vsel %vm138_vm0, %v4252_v28, 0.0 }
0x1bb4   :  { %4259 = vadd.xlane.f32.xlu0 %v4258_v41 }
0x1bbf   :  { %v5170_v1 = vpop.f32.mrf.mxu1 }
0x1bc0   :  { %v4249_v2 = vadd.f32 %v5170_v1, %v4603_v38 }
0x1bc1   :  { %v4243_v50 = vpop.f32.mrf.mxu1 }
0x1bc2   :  { %v4255_v51 = vadd.f32 %v4249_v2, %v6008_v27  ;;  %v4244_v52 = vadd.f32 %v4603_v38, %v4243_v50 }
0x1bc4   :  { %v4254_v53 = vadd.f32 %v4244_v52, %v6006_v36  ;;  %v4267_v8 = vsel %vm138_vm0, %v4255_v51, 0.0 }
0x1bc5   :  { %4268 = vadd.xlane.f32.xlu1 %v4267_v8 }
0x1bc6   :  { %v4264_v39 = vsel %vm138_vm0, %v4254_v53, 0.0 }
0x1bc7   :  { %4265 = vadd.xlane.f32.xlu0 %v4264_v39 }
0x1c3b   :  { %v4263_v40 = vpop.xlane.xlu1 %4262 }
0x1c3c   :  { %v4271_v54 = vmul.f32 0.03125, %v4263_v40 }
0x1c3d   :  { %v4260_v55 = vpop.xlane.xlu0 %4259 }
0x1c3e   :  { %v4275_v6 = vsub.f32 %v4253_v48, %v4271_v54  ;;  %v4270_v58 = vmul.f32 0.03125, %v4260_v55 }
0x1c40   :  { %v4274_v60 = vsub.f32 %v4252_v28, %v4270_v58  ;;  %v4279_v62 = vmul.f32 %v4275_v6, %v4275_v6 }
0x1c42   :  { %v4285_v63 = vsel %vm138_vm0, %v4279_v62, 0.0  ;;  %v4278_v9 = vmul.f32 %v4274_v60, %v4274_v60 }
0x1c43   :  { %4286 = vadd.xlane.f32.xlu1 %v4285_v63 }
0x1c44   :  { %v4282_v27 = vsel %vm138_vm0, %v4278_v9, 0.0 }
0x1c45   :  { %4283 = vadd.xlane.f32.xlu0 %v4282_v27 }
0x1c4e   :  { %v4269_v36 = vpop.xlane.xlu1 %4268 }
0x1c4f   :  { %v4273_v7 = vmul.f32 0.03125, %v4269_v36 }
0x1c50   :  { %v4266_v45 = vpop.xlane.xlu0 %4265 }
0x1c51   :  { %v4277_v3 = vsub.f32 %v4255_v51, %v4273_v7  ;;  %v4272_v12 = vmul.f32 0.03125, %v4266_v45 }
0x1c53   :  { %v4276_v5 = vsub.f32 %v4254_v53, %v4272_v12  ;;  %v4281_v47 = vmul.f32 %v4277_v3, %v4277_v3 }
0x1c55   :  { %v4291_v0 = vsel %vm138_vm0, %v4281_v47, 0.0  ;;  %v4280_v4 = vmul.f32 %v4276_v5, %v4276_v5 }
0x1c56   :  { %4292 = vadd.xlane.f32.xlu1 %v4291_v0 }
0x1c57   :  { %v4288_v10 = vsel %vm138_vm0, %v4280_v4, 0.0 }
0x1c58   :  { %4289 = vadd.xlane.f32.xlu0 %v4288_v10 }
0x1ccc   :  { %v4287_v13 = vpop.xlane.xlu1 %4286 }
0x1ccd   :  { %v4295_v16 = vmul.f32 0.03125, %v4287_v13 }
0x1cce   :  { %v4284_v15 = vpop.xlane.xlu0 %4283 }
0x1ccf   :  { %v4299_v17 = vadd.f32 1e-05, %v4295_v16  ;;  %v4294_v18 = vmul.f32 0.03125, %v4284_v15 }
0x1cd1   :  { %5370 = vrsqrt.f32 %v4299_v17  ;;  %v4298_v19 = vadd.f32 1e-05, %v4294_v18 }
0x1cd3   :  { %5372 = vrsqrt.f32 %v4298_v19 }
0x1cde   :  { %v5371_v20 = vpop.eup %5370 }
0x1cdf   :  { %v4307_v21 = vmul.f32 %v5371_v20, %v4275_v6  ;;  %v4293_v22 = vpop.xlane.xlu1 %4292 }
0x1ce0   :  { %v5373_v24 = vpop.eup %5372  ;;  %v4297_v29 = vmul.f32 0.03125, %v4293_v22 }
0x1ce1   :  { %v4290_v30 = vpop.xlane.xlu0 %4289  ;;  %v4306_v32 = vmul.f32 %v5373_v24, %v4274_v60  ;;  %v4317_v33 = vmul.f32 %v4604_v23, %v4307_v21 }
0x1ce2   :  { %v4301_v37 = vadd.f32 1e-05, %v4297_v29  ;;  %v4296_v34 = vmul.f32 0.03125, %v4290_v30 }
0x1ce3   :  { %v4316_v43 = vmul.f32 %v4604_v23, %v4306_v32  ;;  %v4327_v42 = vadd.f32 %v4605_v26, %v4317_v33 }
0x1ce4   :  { %5374 = vrsqrt.f32 %v4301_v37  ;;  %v4300_v25 = vadd.f32 1e-05, %v4296_v34 }
0x1ce5   :  { %v4326_v31 = vadd.f32 %v4605_v26, %v4316_v43 }
0x1ce6   :  { %5376 = vrsqrt.f32 %v4300_v25 }
0x1ce7   :  { %5179 = vmatprep.mubr.msk.f32.mxu0 %vm138_vm0, %v4326_v31 }
0x1ce8   :  { %5180 = vmatmul.mubr.msk.f32.vlgmr.msra.gmra.mxu0 %vm138_vm0, %v4327_v42 }
0x1cf1   :  { %v5375_v59 = vpop.eup %5374 }
0x1cf2   :  { %v4309_v38 = vmul.f32 %v5375_v59, %v4277_v3 }
0x1cf3   :  { %v5377_v46 = vpop.eup %5376 }
0x1cf4   :  { %v4308_v61 = vmul.f32 %v5377_v46, %v4276_v5  ;;  %v4319_v44 = vmul.f32 %v4604_v23, %v4309_v38 }
0x1cf6   :  { %v4318_v48 = vmul.f32 %v4604_v23, %v4308_v61  ;;  %v4329_v28 = vadd.f32 %v4605_v26, %v4319_v44 }
0x1cf8   :  { %v4328_v35 = vadd.f32 %v4605_v26, %v4318_v48 }
0x1cfa   :  { %5182 = vmatprep.mubr.msk.f32.mxu0 %vm138_vm0, %v4328_v35 }
0x1cfb   :  { %5183 = vmatmul.mubr.msk.f32.gmra.mxu0 %vm138_vm0, %v4329_v28 }
0x1da8   :  { %v5181_v41 = vpop.f32.mrf.mxu0 }
0x1da9   :  { %v4425_v1 = vadd.f32 %v5181_v41, %v4606_v49 }
0x1daa   :  { %v4419_v2 = vpop.f32.mrf.mxu0 }
0x1dab   :  { %4439 = vst [vmem:[%s4475_s21 + $0x8] sm:$0xff] %v4425_v1  ;;  %v4420_v50 = vadd.f32 %v4606_v49, %v4419_v2 }
0x1dad   :  { %4438 = vst [vmem:[%s4475_s21] sm:$0xff] %v4420_v50 }
0x1dbb   :  { %v5184_v51 = vpop.f32.mrf.mxu0 }
0x1dbc   :  { %v4435_v52 = vadd.f32 %v5184_v51, %v4606_v49 }
0x1dbd   :  { %v4429_v53 = vpop.f32.mrf.mxu0 }
0x1dbe   :  { %4441 = vst [vmem:[%s4475_s21 + $0x18] sm:$0xff] %v4435_v52  ;;  %v4430_v8 = vadd.f32 %v4606_v49, %v4429_v53 }
0x1dc0   :  { %4440 = vst [vmem:[%s4475_s21 + $0x10] sm:$0xff] %v4430_v8 }

</bundles_post_ra>
